<compile_context>
chip_gen: v7x
topology: tpu7x:2x2x1
jax: 0.10.0
libtpu: 0.0.40
codegen_flags: <defaults>
</compile_context>

<pallas_src>
import functools

import jax
import jax.numpy as jnp
from jax import lax
from jax.experimental import pallas as pl
from jax.experimental.pallas import tpu as pltpu

_MXU_DTYPE = jnp.bfloat16


# ---------------------------------------------------------------- utilities
def _ceil_to(x, m):
    return ((x + m - 1) // m) * m


@functools.lru_cache(maxsize=None)
def _vmem_limit_bytes():
    # Generation-aware VMEM budget: ~3/4 of per-core capacity
    # (v5e/v6e: 128 MiB -> 96 MiB, v7x: 64 MiB -> 48 MiB). Fallback: 48 MiB.
    try:
        cap = getattr(pltpu.get_tpu_info(), "vmem_capacity_bytes", None)
        if cap:
            return int(cap) * 3 // 4
    except Exception:
        pass
    return 48 * 1024 * 1024


def _cparams(sem):
    return pltpu.CompilerParams(dimension_semantics=sem,
                                vmem_limit_bytes=_vmem_limit_bytes())


# ----------------------------------------------- tiled matmul + bias kernel
def _matmul_bias_kernel(x_ref, w_ref, b_ref, o_ref):
    acc = jnp.dot(x_ref[...], w_ref[...], preferred_element_type=jnp.float32)
    o_ref[...] = (acc + b_ref[...]).astype(o_ref.dtype)


def matmul_bias(x, w, b, tm=512, out_dtype=jnp.float32):
    """(M,K) @ (K,N) + b.  Rows tiled ("parallel"); K/N are full-dim blocks
    (no 128-padding passes); bf16 MXU inputs, f32 accumulation."""
    M, K = x.shape
    _, N = w.shape
    tm = min(tm, _ceil_to(M, 8))
    Mp = _ceil_to(M, tm)
    xp = x if Mp == M else jnp.pad(x, ((0, Mp - M), (0, 0)))
    if xp.dtype != _MXU_DTYPE:
        xp = xp.astype(_MXU_DTYPE)
    wp = w.astype(_MXU_DTYPE)
    bp = b.reshape(1, N).astype(jnp.float32)

    out = pl.pallas_call(
        _matmul_bias_kernel,
        grid=(Mp // tm,),
        in_specs=[
            pl.BlockSpec((tm, K), lambda i: (i, 0)),
            pl.BlockSpec((K, N), lambda i: (0, 0)),      # weights resident
            pl.BlockSpec((1, N), lambda i: (0, 0)),
        ],
        out_specs=pl.BlockSpec((tm, N), lambda i: (i, 0)),
        out_shape=jax.ShapeDtypeStruct((Mp, N), out_dtype),
        compiler_params=_cparams(("parallel",)),
    )(xp, wp, bp)
    return out if Mp == M else out[:M]


# ------------------------------------- fused conv3x3 + ReLU + 2x2 maxpool
def _conv_pool_kernel(x_ref, w_ref, b_ref, o_ref, *, Ho, Wo, Cout):
    # x_ref: (H+2, W+2, Cin)  spatially padded image (bf16), resident.
    # w_ref: (9, Cin, Cout)   tap-major weights (bf16), resident across grid.
    # b_ref: (1, Cout)        f32 bias.
    # o_ref: (Ho, Wo, Cout)   pooled output (bf16).
    Wc = 2 * Wo
    bias = b_ref[...]

    def conv_row(y):
        # In-kernel im2col: 9 shifted VMEM slices -> 9 (Wc,Cin)@(Cin,Cout) dots.
        acc = jnp.zeros((Wc, Cout), jnp.float32)
        for dy in range(3):
            for dx in range(3):
                xs = x_ref[y + dy, pl.ds(dx, Wc), :]
                acc += jnp.dot(xs, w_ref[3 * dy + dx],
                               preferred_element_type=jnp.float32)
        return jnp.maximum(acc + bias, 0.0)              # bias + ReLU

    def body(r, carry):
        rows = jnp.maximum(conv_row(2 * r), conv_row(2 * r + 1))  # (Wc, Cout)
        pooled = jnp.max(rows.reshape(Wo, 2, Cout), axis=1)       # 2x2 maxpool
        o_ref[r] = pooled.astype(o_ref.dtype)
        return carry

    lax.fori_loop(0, Ho, body, 0)


def conv3x3_relu_maxpool(x, w, b):
    """Fused 3x3/s1/p1 conv + ReLU + 2x2/s2 maxpool on NHWC input (bf16 out).
    x: (B,H,W,Cin); w: (Cout,Cin,3,3) PyTorch layout; b: (Cout,).
    Only HBM traffic is the layer input once and the pooled bf16 output once."""
    B, H, W, Cin = x.shape
    Cout = w.shape[0]
    Ho, Wo = H // 2, W // 2

    xp = jnp.pad(x, ((0, 0), (1, 1), (1, 1), (0, 0))).astype(_MXU_DTYPE)
    wmat = jnp.transpose(w, (2, 3, 1, 0)).reshape(9, Cin, Cout)   # (kh,kw,ci,co)
    wmat = wmat.astype(_MXU_DTYPE)
    bmat = b.reshape(1, Cout).astype(jnp.float32)

    return pl.pallas_call(
        functools.partial(_conv_pool_kernel, Ho=Ho, Wo=Wo, Cout=Cout),
        grid=(B,),
        in_specs=[
            pl.BlockSpec((None, H + 2, W + 2, Cin), lambda bi: (bi, 0, 0, 0)),
            pl.BlockSpec((9, Cin, Cout), lambda bi: (0, 0, 0)),   # resident
            pl.BlockSpec((1, Cout), lambda bi: (0, 0)),
        ],
        out_specs=pl.BlockSpec((None, Ho, Wo, Cout), lambda bi: (bi, 0, 0, 0)),
        out_shape=jax.ShapeDtypeStruct((B, Ho, Wo, Cout), _MXU_DTYPE),
        compiler_params=_cparams(("parallel",)),
    )(xp, wmat, bmat)


# ---------------------------------------- adaptive avg pool over height (H->1)
def _mean_h_kernel(x_ref, o_ref, *, inv_h):
    s = jnp.sum(x_ref[...].astype(jnp.float32), axis=0) * inv_h
    o_ref[...] = s.astype(o_ref.dtype)


def mean_over_height(x):
    """AdaptiveAvgPool2d((1, None)) + squeeze(2): NHWC -> (B, W, C), tiled per
    image (no whole-array block, no wrapper transpose); bf16 out, f32 sum."""
    B, H, W, C = x.shape
    return pl.pallas_call(
        functools.partial(_mean_h_kernel, inv_h=1.0 / H),
        grid=(B,),
        in_specs=[pl.BlockSpec((None, H, W, C), lambda bi: (bi, 0, 0, 0))],
        out_specs=pl.BlockSpec((None, W, C), lambda bi: (bi, 0, 0)),
        out_shape=jax.ShapeDtypeStruct((B, W, C), _MXU_DTYPE),
        compiler_params=_cparams(("parallel",)),
    )(x)


# ------------------------------------------ fused bidirectional LSTM sequence
def _lstm_seq_kernel(xproj_ref, wh_ref, hseq_ref, h_sc, c_sc, *, H, Tt):
    d = pl.program_id(0)            # direction: 0 = forward, 1 = reverse
    c = pl.program_id(1)            # time chunk ("arbitrary", innermost)

    # h/c scratch is shared by both directions: the time-chunk axis is the
    # innermost sequential grid axis, so c==0 re-initializes the state at the
    # start of each direction; on megacore the "parallel" direction axis gives
    # each core its own scratch instance.
    @pl.when(c == 0)
    def _():
        h_sc[...] = jnp.zeros_like(h_sc)
        c_sc[...] = jnp.zeros_like(c_sc)

    wh = wh_ref[...]                # (H, 4H) bf16, resident for all chunks

    def step(s, carry):
        h, cc = carry
        # Reverse direction walks the chunk backwards; chunk order itself is
        # reversed by the index_map, so hseq lands at the original time index.
        t = jnp.where(d == 0, s, Tt - 1 - s)
        gates = xproj_ref[t] + jnp.dot(h.astype(_MXU_DTYPE), wh,
                                       preferred_element_type=jnp.float32)
        # Gate order: i, f, g, o (kept as simple lane slices for clarity).
        i = jax.nn.sigmoid(gates[:, 0 * H:1 * H])
        f = jax.nn.sigmoid(gates[:, 1 * H:2 * H])
        g = jnp.tanh(gates[:, 2 * H:3 * H])
        o = jax.nn.sigmoid(gates[:, 3 * H:4 * H])
        c_new = f * cc + i * g
        h_new = o * jnp.tanh(c_new)
        hseq_ref[t] = h_new.astype(hseq_ref.dtype)
        return h_new, c_new

    h_fin, c_fin = lax.fori_loop(0, Tt, step, (h_sc[...], c_sc[...]))
    h_sc[...] = h_fin
    c_sc[...] = c_fin


def _time_chunk(T, target=128):
    for tt in range(min(T, target), 0, -1):
        if T % tt == 0:
            return tt
    return 1


def lstm_bidir_layer(layer_in, w_ih_fwd, w_hh_fwd, b_fwd,
                     w_ih_rev, w_hh_rev, b_rev, H):
    """One bidirectional LSTM layer: (T, Bp, In) -> (T, Bp, 2H) bf16.
    x@Wx(+both biases) is hoisted out of the recurrence; the recurrence runs
    as one pallas_call with grid=(direction, time-chunk) and an in-kernel
    fori_loop over the chunk.  Reverse direction handled by index_maps only.
    # TODO(synk): on single-core v5e/v6e, fusing both directions into one
    # sequential pass (block-diagonal Wh) would halve the grid steps."""
    T, Bp, In = layer_in.shape
    flat = layer_in.reshape(T * Bp, In)

    def xproj(w_ih, bias):
        return matmul_bias(flat, w_ih.T, bias).reshape(T, Bp, 4 * H)

    xproj_all = jnp.stack([xproj(w_ih_fwd, b_fwd), xproj(w_ih_rev, b_rev)])
    wh_all = jnp.stack([w_hh_fwd.T, w_hh_rev.T]).astype(_MXU_DTYPE)  # (2,H,4H)

    Tt = _time_chunk(T)
    nc = T // Tt

    def chunk_idx(d, c):
        # forward: chunks ascend; reverse: chunks descend.
        return (1 - d) * c + d * (nc - 1 - c)

    hseq = pl.pallas_call(
        functools.partial(_lstm_seq_kernel, H=H, Tt=Tt),
        grid=(2, nc),                                   # (direction, chunk)
        in_specs=[
            pl.BlockSpec((None, Tt, Bp, 4 * H),
                         lambda d, c: (d, chunk_idx(d, c), 0, 0)),
            pl.BlockSpec((None, H, 4 * H), lambda d, c: (d, 0, 0)),  # resident
        ],
        out_specs=pl.BlockSpec((None, Tt, Bp, H),
                               lambda d, c: (d, chunk_idx(d, c), 0, 0)),
        out_shape=jax.ShapeDtypeStruct((2, T, Bp, H), _MXU_DTYPE),
        scratch_shapes=[pltpu.VMEM((Bp, H), jnp.float32),   # h state
                        pltpu.VMEM((Bp, H), jnp.float32)],  # c state
        compiler_params=_cparams(("parallel", "arbitrary")),
    )(xproj_all, wh_all)

    return jnp.concatenate([hseq[0], hseq[1]], axis=-1)    # (T, Bp, 2H)


# ---------------------------------------------------------------- full model
def crnn_forward(x_nchw, params, hidden_size):
    x = jnp.transpose(x_nchw, (0, 2, 3, 1)).astype(_MXU_DTYPE)  # NCHW -> NHWC

    x = conv3x3_relu_maxpool(x, params["conv1_w"], params["conv1_b"])
    x = conv3x3_relu_maxpool(x, params["conv2_w"], params["conv2_b"])
    x = conv3x3_relu_maxpool(x, params["conv3_w"], params["conv3_b"])

    x = mean_over_height(x)                  # (B, W, 256)   == squeeze(2)
    seq = jnp.transpose(x, (1, 0, 2))        # (T=W, B, 256) == permute(2,0,1)
    T, B, _ = seq.shape
    H = hidden_size
    Bp = _ceil_to(B, 8)
    # Pad batch to a sublane multiple once; padded rows are dropped at the end
    # (the LSTM never mixes batch rows, so they cannot pollute real outputs).
    seq = jnp.pad(seq, ((0, 0), (0, Bp - B), (0, 0)))

    layer_in = seq
    for layer in range(2):
        layer_in = lstm_bidir_layer(
            layer_in,
            params[f"lstm_w_ih_l{layer}"], params[f"lstm_w_hh_l{layer}"],
            params[f"lstm_b_ih_l{layer}"] + params[f"lstm_b_hh_l{layer}"],
            params[f"lstm_w_ih_l{layer}_reverse"],
            params[f"lstm_w_hh_l{layer}_reverse"],
            params[f"lstm_b_ih_l{layer}_reverse"]
            + params[f"lstm_b_hh_l{layer}_reverse"],
            H)

    flat = layer_in.reshape(T * Bp, 2 * H)
    logits = matmul_bias(flat, params["fc_w"].T, params["fc_b"])
    return logits.reshape(T, Bp, -1)[:, :B, :]


# ------------------------------------------------------------ parameter init
def init_params(key, num_chars=10, hidden_size=32):
    params = {}

    def nrm(k, shape, scale=0.05):
        return scale * jax.random.normal(k, shape, jnp.float32)

    keys = iter(jax.random.split(key, 40))
    params["conv1_w"] = nrm(next(keys), (64, 3, 3, 3))
    params["conv1_b"] = nrm(next(keys), (64,))
    params["conv2_w"] = nrm(next(keys), (128, 64, 3, 3))
    params["conv2_b"] = nrm(next(keys), (128,))
    params["conv3_w"] = nrm(next(keys), (256, 128, 3, 3))
    params["conv3_b"] = nrm(next(keys), (256,))

    H = hidden_size
    for layer in range(2):
        In = 256 if layer == 0 else 2 * H
        for suffix in ("", "_reverse"):
            params[f"lstm_w_ih_l{layer}{suffix}"] = nrm(next(keys), (4 * H, In))
            params[f"lstm_w_hh_l{layer}{suffix}"] = nrm(next(keys), (4 * H, H))
            params[f"lstm_b_ih_l{layer}{suffix}"] = nrm(next(keys), (4 * H,))
            params[f"lstm_b_hh_l{layer}{suffix}"] = nrm(next(keys), (4 * H,))

    params["fc_w"] = nrm(next(keys), (num_chars, 2 * H))
    params["fc_b"] = nrm(next(keys), (num_chars,))
    return params


if __name__ == "__main__":
    key = jax.random.PRNGKey(0)
    kx, kp = jax.random.split(key)
    x = jax.random.normal(kx, (2, 3, 16, 16), jnp.float32)  # NCHW, like PyTorch
    params = init_params(kp, num_chars=10, hidden_size=32)

    fwd = jax.jit(functools.partial(crnn_forward, hidden_size=32))
    logits = fwd(x, params)
    jax.block_until_ready(logits)

    # 16 / (2*2*2) = 2 time steps, batch 2, 10 classes
    assert logits.shape == (2, 2, 10), logits.shape
    assert logits.dtype == jnp.float32
    print("KERNEL_OK")
</pallas_src>

<mosaic_0001>
module attributes {stable_mosaic.version = 11 : i64} {
  func.func @_conv_pool_kernel(%arg0: i32, %arg1: memref<1x18x18x3xbf16, #tpu.memory_space<vmem>>, %arg2: memref<9x3x64xbf16, #tpu.memory_space<vmem>>, %arg3: memref<1x64xf32, #tpu.memory_space<vmem>>, %arg4: memref<1x8x8x64xbf16, #tpu.memory_space<vmem>>) attributes {dimension_semantics = [#tpu.dimension_semantics<parallel>], iteration_bounds = array<i64: 2>, scalar_prefetch = 0 : i64, scratch_operands = 0 : i64, tpu.core_type = #tpu.core_type<tc>, window_params = [{transform_indices = @transform_0, window_bounds = array<i64: 1, 18, 18, 3>}, {pipeline_mode = #tpu.pipeline_mode<synchronous>, transform_indices = @transform_1, window_bounds = array<i64: 9, 3, 64>}, {pipeline_mode = #tpu.pipeline_mode<synchronous>, transform_indices = @transform_2, window_bounds = array<i64: 1, 64>}, {transform_indices = @transform_3, window_bounds = array<i64: 1, 8, 8, 64>}]} {
    %c0 = arith.constant 0 : index
    %c0_0 = arith.constant 0 : index
    %0 = vector.load %arg3[%c0, %c0_0] : memref<1x64xf32, #tpu.memory_space<vmem>>, vector<1x64xf32>
    %c0_i32 = arith.constant 0 : i32
    %c8_i32 = arith.constant 8 : i32
    %1 = arith.addi %c0_i32, %c8_i32 : i32
    %c1_i32 = arith.constant 1 : i32
    scf.for %arg5 = %c0_i32 to %1 step %c1_i32  : i32 {
      %c2_i32 = arith.constant 2 : i32
      %2 = arith.muli %c2_i32, %arg5 : i32
      %cst = arith.constant 0.000000e+00 : f32
      %3 = vector.broadcast %cst : f32 to vector<16x64xf32>
      %c0_i32_2 = arith.constant 0 : i32
      %4 = arith.addi %2, %c0_i32_2 : i32
      %c0_3 = arith.constant 0 : index
      %5 = arith.index_cast %4 : i32 to index
      %c0_4 = arith.constant 0 : index
      %c0_5 = arith.constant 0 : index
      %6 = vector.load %arg1[%c0_3, %5, %c0_4, %c0_5] : memref<1x18x18x3xbf16, #tpu.memory_space<vmem>>, vector<1x1x16x3xbf16>
      %7 = vector.shape_cast %6 : vector<1x1x16x3xbf16> to vector<16x3xbf16>
      %c0_6 = arith.constant 0 : index
      %c0_7 = arith.constant 0 : index
      %c0_8 = arith.constant 0 : index
      %8 = vector.load %arg2[%c0_6, %c0_7, %c0_8] : memref<9x3x64xbf16, #tpu.memory_space<vmem>>, vector<1x3x64xbf16>
      %9 = vector.shape_cast %8 : vector<1x3x64xbf16> to vector<3x64xbf16>
      %cst_9 = arith.constant dense<0.000000e+00> : vector<16x64xf32>
      %10 = tpu.matmul %7, %9, %cst_9 {dimension_numbers = #tpu.dot_dimension_numbers<[1], [0], [0], [1], [0, 0, 1, 1], [], []>} : vector<16x3xbf16>, vector<3x64xbf16>, vector<16x64xf32> -> vector<16x64xf32>
      %11 = arith.addf %3, %10 : vector<16x64xf32>
      %c0_i32_10 = arith.constant 0 : i32
      %12 = arith.addi %2, %c0_i32_10 : i32
      %c0_11 = arith.constant 0 : index
      %13 = arith.index_cast %12 : i32 to index
      %c1 = arith.constant 1 : index
      %c0_12 = arith.constant 0 : index
      %14 = vector.load %arg1[%c0_11, %13, %c1, %c0_12] : memref<1x18x18x3xbf16, #tpu.memory_space<vmem>>, vector<1x1x16x3xbf16>
      %15 = vector.shape_cast %14 : vector<1x1x16x3xbf16> to vector<16x3xbf16>
      %c1_13 = arith.constant 1 : index
      %c0_14 = arith.constant 0 : index
      %c0_15 = arith.constant 0 : index
      %16 = vector.load %arg2[%c1_13, %c0_14, %c0_15] : memref<9x3x64xbf16, #tpu.memory_space<vmem>>, vector<1x3x64xbf16>
      %17 = vector.shape_cast %16 : vector<1x3x64xbf16> to vector<3x64xbf16>
      %cst_16 = arith.constant dense<0.000000e+00> : vector<16x64xf32>
      %18 = tpu.matmul %15, %17, %cst_16 {dimension_numbers = #tpu.dot_dimension_numbers<[1], [0], [0], [1], [0, 0, 1, 1], [], []>} : vector<16x3xbf16>, vector<3x64xbf16>, vector<16x64xf32> -> vector<16x64xf32>
      %19 = arith.addf %11, %18 : vector<16x64xf32>
      %c0_i32_17 = arith.constant 0 : i32
      %20 = arith.addi %2, %c0_i32_17 : i32
      %c0_18 = arith.constant 0 : index
      %21 = arith.index_cast %20 : i32 to index
      %c2 = arith.constant 2 : index
      %c0_19 = arith.constant 0 : index
      %22 = vector.load %arg1[%c0_18, %21, %c2, %c0_19] : memref<1x18x18x3xbf16, #tpu.memory_space<vmem>>, vector<1x1x16x3xbf16>
      %23 = vector.shape_cast %22 : vector<1x1x16x3xbf16> to vector<16x3xbf16>
      %c2_20 = arith.constant 2 : index
      %c0_21 = arith.constant 0 : index
      %c0_22 = arith.constant 0 : index
      %24 = vector.load %arg2[%c2_20, %c0_21, %c0_22] : memref<9x3x64xbf16, #tpu.memory_space<vmem>>, vector<1x3x64xbf16>
      %25 = vector.shape_cast %24 : vector<1x3x64xbf16> to vector<3x64xbf16>
      %cst_23 = arith.constant dense<0.000000e+00> : vector<16x64xf32>
      %26 = tpu.matmul %23, %25, %cst_23 {dimension_numbers = #tpu.dot_dimension_numbers<[1], [0], [0], [1], [0, 0, 1, 1], [], []>} : vector<16x3xbf16>, vector<3x64xbf16>, vector<16x64xf32> -> vector<16x64xf32>
      %27 = arith.addf %19, %26 : vector<16x64xf32>
      %c1_i32_24 = arith.constant 1 : i32
      %28 = arith.addi %2, %c1_i32_24 : i32
      %c0_25 = arith.constant 0 : index
      %29 = arith.index_cast %28 : i32 to index
      %c0_26 = arith.constant 0 : index
      %c0_27 = arith.constant 0 : index
      %30 = vector.load %arg1[%c0_25, %29, %c0_26, %c0_27] : memref<1x18x18x3xbf16, #tpu.memory_space<vmem>>, vector<1x1x16x3xbf16>
      %31 = vector.shape_cast %30 : vector<1x1x16x3xbf16> to vector<16x3xbf16>
      %c3 = arith.constant 3 : index
      %c0_28 = arith.constant 0 : index
      %c0_29 = arith.constant 0 : index
      %32 = vector.load %arg2[%c3, %c0_28, %c0_29] : memref<9x3x64xbf16, #tpu.memory_space<vmem>>, vector<1x3x64xbf16>
      %33 = vector.shape_cast %32 : vector<1x3x64xbf16> to vector<3x64xbf16>
      %cst_30 = arith.constant dense<0.000000e+00> : vector<16x64xf32>
      %34 = tpu.matmul %31, %33, %cst_30 {dimension_numbers = #tpu.dot_dimension_numbers<[1], [0], [0], [1], [0, 0, 1, 1], [], []>} : vector<16x3xbf16>, vector<3x64xbf16>, vector<16x64xf32> -> vector<16x64xf32>
      %35 = arith.addf %27, %34 : vector<16x64xf32>
      %c1_i32_31 = arith.constant 1 : i32
      %36 = arith.addi %2, %c1_i32_31 : i32
      %c0_32 = arith.constant 0 : index
      %37 = arith.index_cast %36 : i32 to index
      %c1_33 = arith.constant 1 : index
      %c0_34 = arith.constant 0 : index
      %38 = vector.load %arg1[%c0_32, %37, %c1_33, %c0_34] : memref<1x18x18x3xbf16, #tpu.memory_space<vmem>>, vector<1x1x16x3xbf16>
      %39 = vector.shape_cast %38 : vector<1x1x16x3xbf16> to vector<16x3xbf16>
      %c4 = arith.constant 4 : index
      %c0_35 = arith.constant 0 : index
      %c0_36 = arith.constant 0 : index
      %40 = vector.load %arg2[%c4, %c0_35, %c0_36] : memref<9x3x64xbf16, #tpu.memory_space<vmem>>, vector<1x3x64xbf16>
      %41 = vector.shape_cast %40 : vector<1x3x64xbf16> to vector<3x64xbf16>
      %cst_37 = arith.constant dense<0.000000e+00> : vector<16x64xf32>
      %42 = tpu.matmul %39, %41, %cst_37 {dimension_numbers = #tpu.dot_dimension_numbers<[1], [0], [0], [1], [0, 0, 1, 1], [], []>} : vector<16x3xbf16>, vector<3x64xbf16>, vector<16x64xf32> -> vector<16x64xf32>
      %43 = arith.addf %35, %42 : vector<16x64xf32>
      %c1_i32_38 = arith.constant 1 : i32
      %44 = arith.addi %2, %c1_i32_38 : i32
      %c0_39 = arith.constant 0 : index
      %45 = arith.index_cast %44 : i32 to index
      %c2_40 = arith.constant 2 : index
      %c0_41 = arith.constant 0 : index
      %46 = vector.load %arg1[%c0_39, %45, %c2_40, %c0_41] : memref<1x18x18x3xbf16, #tpu.memory_space<vmem>>, vector<1x1x16x3xbf16>
      %47 = vector.shape_cast %46 : vector<1x1x16x3xbf16> to vector<16x3xbf16>
      %c5 = arith.constant 5 : index
      %c0_42 = arith.constant 0 : index
      %c0_43 = arith.constant 0 : index
      %48 = vector.load %arg2[%c5, %c0_42, %c0_43] : memref<9x3x64xbf16, #tpu.memory_space<vmem>>, vector<1x3x64xbf16>
      %49 = vector.shape_cast %48 : vector<1x3x64xbf16> to vector<3x64xbf16>
      %cst_44 = arith.constant dense<0.000000e+00> : vector<16x64xf32>
      %50 = tpu.matmul %47, %49, %cst_44 {dimension_numbers = #tpu.dot_dimension_numbers<[1], [0], [0], [1], [0, 0, 1, 1], [], []>} : vector<16x3xbf16>, vector<3x64xbf16>, vector<16x64xf32> -> vector<16x64xf32>
      %51 = arith.addf %43, %50 : vector<16x64xf32>
      %c2_i32_45 = arith.constant 2 : i32
      %52 = arith.addi %2, %c2_i32_45 : i32
      %c0_46 = arith.constant 0 : index
      %53 = arith.index_cast %52 : i32 to index
      %c0_47 = arith.constant 0 : index
      %c0_48 = arith.constant 0 : index
      %54 = vector.load %arg1[%c0_46, %53, %c0_47, %c0_48] : memref<1x18x18x3xbf16, #tpu.memory_space<vmem>>, vector<1x1x16x3xbf16>
      %55 = vector.shape_cast %54 : vector<1x1x16x3xbf16> to vector<16x3xbf16>
      %c6 = arith.constant 6 : index
      %c0_49 = arith.constant 0 : index
      %c0_50 = arith.constant 0 : index
      %56 = vector.load %arg2[%c6, %c0_49, %c0_50] : memref<9x3x64xbf16, #tpu.memory_space<vmem>>, vector<1x3x64xbf16>
      %57 = vector.shape_cast %56 : vector<1x3x64xbf16> to vector<3x64xbf16>
      %cst_51 = arith.constant dense<0.000000e+00> : vector<16x64xf32>
      %58 = tpu.matmul %55, %57, %cst_51 {dimension_numbers = #tpu.dot_dimension_numbers<[1], [0], [0], [1], [0, 0, 1, 1], [], []>} : vector<16x3xbf16>, vector<3x64xbf16>, vector<16x64xf32> -> vector<16x64xf32>
      %59 = arith.addf %51, %58 : vector<16x64xf32>
      %c2_i32_52 = arith.constant 2 : i32
      %60 = arith.addi %2, %c2_i32_52 : i32
      %c0_53 = arith.constant 0 : index
      %61 = arith.index_cast %60 : i32 to index
      %c1_54 = arith.constant 1 : index
      %c0_55 = arith.constant 0 : index
      %62 = vector.load %arg1[%c0_53, %61, %c1_54, %c0_55] : memref<1x18x18x3xbf16, #tpu.memory_space<vmem>>, vector<1x1x16x3xbf16>
      %63 = vector.shape_cast %62 : vector<1x1x16x3xbf16> to vector<16x3xbf16>
      %c7 = arith.constant 7 : index
      %c0_56 = arith.constant 0 : index
      %c0_57 = arith.constant 0 : index
      %64 = vector.load %arg2[%c7, %c0_56, %c0_57] : memref<9x3x64xbf16, #tpu.memory_space<vmem>>, vector<1x3x64xbf16>
      %65 = vector.shape_cast %64 : vector<1x3x64xbf16> to vector<3x64xbf16>
      %cst_58 = arith.constant dense<0.000000e+00> : vector<16x64xf32>
      %66 = tpu.matmul %63, %65, %cst_58 {dimension_numbers = #tpu.dot_dimension_numbers<[1], [0], [0], [1], [0, 0, 1, 1], [], []>} : vector<16x3xbf16>, vector<3x64xbf16>, vector<16x64xf32> -> vector<16x64xf32>
      %67 = arith.addf %59, %66 : vector<16x64xf32>
      %c2_i32_59 = arith.constant 2 : i32
      %68 = arith.addi %2, %c2_i32_59 : i32
      %c0_60 = arith.constant 0 : index
      %69 = arith.index_cast %68 : i32 to index
      %c2_61 = arith.constant 2 : index
      %c0_62 = arith.constant 0 : index
      %70 = vector.load %arg1[%c0_60, %69, %c2_61, %c0_62] : memref<1x18x18x3xbf16, #tpu.memory_space<vmem>>, vector<1x1x16x3xbf16>
      %71 = vector.shape_cast %70 : vector<1x1x16x3xbf16> to vector<16x3xbf16>
      %c8 = arith.constant 8 : index
      %c0_63 = arith.constant 0 : index
      %c0_64 = arith.constant 0 : index
      %72 = vector.load %arg2[%c8, %c0_63, %c0_64] : memref<9x3x64xbf16, #tpu.memory_space<vmem>>, vector<1x3x64xbf16>
      %73 = vector.shape_cast %72 : vector<1x3x64xbf16> to vector<3x64xbf16>
      %cst_65 = arith.constant dense<0.000000e+00> : vector<16x64xf32>
      %74 = tpu.matmul %71, %73, %cst_65 {dimension_numbers = #tpu.dot_dimension_numbers<[1], [0], [0], [1], [0, 0, 1, 1], [], []>} : vector<16x3xbf16>, vector<3x64xbf16>, vector<16x64xf32> -> vector<16x64xf32>
      %75 = arith.addf %67, %74 : vector<16x64xf32>
      %76 = vector.broadcast %0 : vector<1x64xf32> to vector<16x64xf32>
      %77 = arith.addf %75, %76 : vector<16x64xf32>
      %cst_66 = arith.constant 0.000000e+00 : f32
      %78 = vector.broadcast %cst_66 : f32 to vector<16x64xf32>
      %79 = arith.maximumf %77, %78 : vector<16x64xf32>
      %c2_i32_67 = arith.constant 2 : i32
      %80 = arith.muli %c2_i32_67, %arg5 : i32
      %c1_i32_68 = arith.constant 1 : i32
      %81 = arith.addi %80, %c1_i32_68 : i32
      %cst_69 = arith.constant 0.000000e+00 : f32
      %82 = vector.broadcast %cst_69 : f32 to vector<16x64xf32>
      %c0_i32_70 = arith.constant 0 : i32
      %83 = arith.addi %81, %c0_i32_70 : i32
      %c0_71 = arith.constant 0 : index
      %84 = arith.index_cast %83 : i32 to index
      %c0_72 = arith.constant 0 : index
      %c0_73 = arith.constant 0 : index
      %85 = vector.load %arg1[%c0_71, %84, %c0_72, %c0_73] : memref<1x18x18x3xbf16, #tpu.memory_space<vmem>>, vector<1x1x16x3xbf16>
      %86 = vector.shape_cast %85 : vector<1x1x16x3xbf16> to vector<16x3xbf16>
      %c0_74 = arith.constant 0 : index
      %c0_75 = arith.constant 0 : index
      %c0_76 = arith.constant 0 : index
      %87 = vector.load %arg2[%c0_74, %c0_75, %c0_76] : memref<9x3x64xbf16, #tpu.memory_space<vmem>>, vector<1x3x64xbf16>
      %88 = vector.shape_cast %87 : vector<1x3x64xbf16> to vector<3x64xbf16>
      %cst_77 = arith.constant dense<0.000000e+00> : vector<16x64xf32>
      %89 = tpu.matmul %86, %88, %cst_77 {dimension_numbers = #tpu.dot_dimension_numbers<[1], [0], [0], [1], [0, 0, 1, 1], [], []>} : vector<16x3xbf16>, vector<3x64xbf16>, vector<16x64xf32> -> vector<16x64xf32>
      %90 = arith.addf %82, %89 : vector<16x64xf32>
      %c0_i32_78 = arith.constant 0 : i32
      %91 = arith.addi %81, %c0_i32_78 : i32
      %c0_79 = arith.constant 0 : index
      %92 = arith.index_cast %91 : i32 to index
      %c1_80 = arith.constant 1 : index
      %c0_81 = arith.constant 0 : index
      %93 = vector.load %arg1[%c0_79, %92, %c1_80, %c0_81] : memref<1x18x18x3xbf16, #tpu.memory_space<vmem>>, vector<1x1x16x3xbf16>
      %94 = vector.shape_cast %93 : vector<1x1x16x3xbf16> to vector<16x3xbf16>
      %c1_82 = arith.constant 1 : index
      %c0_83 = arith.constant 0 : index
      %c0_84 = arith.constant 0 : index
      %95 = vector.load %arg2[%c1_82, %c0_83, %c0_84] : memref<9x3x64xbf16, #tpu.memory_space<vmem>>, vector<1x3x64xbf16>
      %96 = vector.shape_cast %95 : vector<1x3x64xbf16> to vector<3x64xbf16>
      %cst_85 = arith.constant dense<0.000000e+00> : vector<16x64xf32>
      %97 = tpu.matmul %94, %96, %cst_85 {dimension_numbers = #tpu.dot_dimension_numbers<[1], [0], [0], [1], [0, 0, 1, 1], [], []>} : vector<16x3xbf16>, vector<3x64xbf16>, vector<16x64xf32> -> vector<16x64xf32>
      %98 = arith.addf %90, %97 : vector<16x64xf32>
      %c0_i32_86 = arith.constant 0 : i32
      %99 = arith.addi %81, %c0_i32_86 : i32
      %c0_87 = arith.constant 0 : index
      %100 = arith.index_cast %99 : i32 to index
      %c2_88 = arith.constant 2 : index
      %c0_89 = arith.constant 0 : index
      %101 = vector.load %arg1[%c0_87, %100, %c2_88, %c0_89] : memref<1x18x18x3xbf16, #tpu.memory_space<vmem>>, vector<1x1x16x3xbf16>
      %102 = vector.shape_cast %101 : vector<1x1x16x3xbf16> to vector<16x3xbf16>
      %c2_90 = arith.constant 2 : index
      %c0_91 = arith.constant 0 : index
      %c0_92 = arith.constant 0 : index
      %103 = vector.load %arg2[%c2_90, %c0_91, %c0_92] : memref<9x3x64xbf16, #tpu.memory_space<vmem>>, vector<1x3x64xbf16>
      %104 = vector.shape_cast %103 : vector<1x3x64xbf16> to vector<3x64xbf16>
      %cst_93 = arith.constant dense<0.000000e+00> : vector<16x64xf32>
      %105 = tpu.matmul %102, %104, %cst_93 {dimension_numbers = #tpu.dot_dimension_numbers<[1], [0], [0], [1], [0, 0, 1, 1], [], []>} : vector<16x3xbf16>, vector<3x64xbf16>, vector<16x64xf32> -> vector<16x64xf32>
      %106 = arith.addf %98, %105 : vector<16x64xf32>
      %c1_i32_94 = arith.constant 1 : i32
      %107 = arith.addi %81, %c1_i32_94 : i32
      %c0_95 = arith.constant 0 : index
      %108 = arith.index_cast %107 : i32 to index
      %c0_96 = arith.constant 0 : index
      %c0_97 = arith.constant 0 : index
      %109 = vector.load %arg1[%c0_95, %108, %c0_96, %c0_97] : memref<1x18x18x3xbf16, #tpu.memory_space<vmem>>, vector<1x1x16x3xbf16>
      %110 = vector.shape_cast %109 : vector<1x1x16x3xbf16> to vector<16x3xbf16>
      %c3_98 = arith.constant 3 : index
      %c0_99 = arith.constant 0 : index
      %c0_100 = arith.constant 0 : index
      %111 = vector.load %arg2[%c3_98, %c0_99, %c0_100] : memref<9x3x64xbf16, #tpu.memory_space<vmem>>, vector<1x3x64xbf16>
      %112 = vector.shape_cast %111 : vector<1x3x64xbf16> to vector<3x64xbf16>
      %cst_101 = arith.constant dense<0.000000e+00> : vector<16x64xf32>
      %113 = tpu.matmul %110, %112, %cst_101 {dimension_numbers = #tpu.dot_dimension_numbers<[1], [0], [0], [1], [0, 0, 1, 1], [], []>} : vector<16x3xbf16>, vector<3x64xbf16>, vector<16x64xf32> -> vector<16x64xf32>
      %114 = arith.addf %106, %113 : vector<16x64xf32>
      %c1_i32_102 = arith.constant 1 : i32
      %115 = arith.addi %81, %c1_i32_102 : i32
      %c0_103 = arith.constant 0 : index
      %116 = arith.index_cast %115 : i32 to index
      %c1_104 = arith.constant 1 : index
      %c0_105 = arith.constant 0 : index
      %117 = vector.load %arg1[%c0_103, %116, %c1_104, %c0_105] : memref<1x18x18x3xbf16, #tpu.memory_space<vmem>>, vector<1x1x16x3xbf16>
      %118 = vector.shape_cast %117 : vector<1x1x16x3xbf16> to vector<16x3xbf16>
      %c4_106 = arith.constant 4 : index
      %c0_107 = arith.constant 0 : index
      %c0_108 = arith.constant 0 : index
      %119 = vector.load %arg2[%c4_106, %c0_107, %c0_108] : memref<9x3x64xbf16, #tpu.memory_space<vmem>>, vector<1x3x64xbf16>
      %120 = vector.shape_cast %119 : vector<1x3x64xbf16> to vector<3x64xbf16>
      %cst_109 = arith.constant dense<0.000000e+00> : vector<16x64xf32>
      %121 = tpu.matmul %118, %120, %cst_109 {dimension_numbers = #tpu.dot_dimension_numbers<[1], [0], [0], [1], [0, 0, 1, 1], [], []>} : vector<16x3xbf16>, vector<3x64xbf16>, vector<16x64xf32> -> vector<16x64xf32>
      %122 = arith.addf %114, %121 : vector<16x64xf32>
      %c1_i32_110 = arith.constant 1 : i32
      %123 = arith.addi %81, %c1_i32_110 : i32
      %c0_111 = arith.constant 0 : index
      %124 = arith.index_cast %123 : i32 to index
      %c2_112 = arith.constant 2 : index
      %c0_113 = arith.constant 0 : index
      %125 = vector.load %arg1[%c0_111, %124, %c2_112, %c0_113] : memref<1x18x18x3xbf16, #tpu.memory_space<vmem>>, vector<1x1x16x3xbf16>
      %126 = vector.shape_cast %125 : vector<1x1x16x3xbf16> to vector<16x3xbf16>
      %c5_114 = arith.constant 5 : index
      %c0_115 = arith.constant 0 : index
      %c0_116 = arith.constant 0 : index
      %127 = vector.load %arg2[%c5_114, %c0_115, %c0_116] : memref<9x3x64xbf16, #tpu.memory_space<vmem>>, vector<1x3x64xbf16>
      %128 = vector.shape_cast %127 : vector<1x3x64xbf16> to vector<3x64xbf16>
      %cst_117 = arith.constant dense<0.000000e+00> : vector<16x64xf32>
      %129 = tpu.matmul %126, %128, %cst_117 {dimension_numbers = #tpu.dot_dimension_numbers<[1], [0], [0], [1], [0, 0, 1, 1], [], []>} : vector<16x3xbf16>, vector<3x64xbf16>, vector<16x64xf32> -> vector<16x64xf32>
      %130 = arith.addf %122, %129 : vector<16x64xf32>
      %c2_i32_118 = arith.constant 2 : i32
      %131 = arith.addi %81, %c2_i32_118 : i32
      %c0_119 = arith.constant 0 : index
      %132 = arith.index_cast %131 : i32 to index
      %c0_120 = arith.constant 0 : index
      %c0_121 = arith.constant 0 : index
      %133 = vector.load %arg1[%c0_119, %132, %c0_120, %c0_121] : memref<1x18x18x3xbf16, #tpu.memory_space<vmem>>, vector<1x1x16x3xbf16>
      %134 = vector.shape_cast %133 : vector<1x1x16x3xbf16> to vector<16x3xbf16>
      %c6_122 = arith.constant 6 : index
      %c0_123 = arith.constant 0 : index
      %c0_124 = arith.constant 0 : index
      %135 = vector.load %arg2[%c6_122, %c0_123, %c0_124] : memref<9x3x64xbf16, #tpu.memory_space<vmem>>, vector<1x3x64xbf16>
      %136 = vector.shape_cast %135 : vector<1x3x64xbf16> to vector<3x64xbf16>
      %cst_125 = arith.constant dense<0.000000e+00> : vector<16x64xf32>
      %137 = tpu.matmul %134, %136, %cst_125 {dimension_numbers = #tpu.dot_dimension_numbers<[1], [0], [0], [1], [0, 0, 1, 1], [], []>} : vector<16x3xbf16>, vector<3x64xbf16>, vector<16x64xf32> -> vector<16x64xf32>
      %138 = arith.addf %130, %137 : vector<16x64xf32>
      %c2_i32_126 = arith.constant 2 : i32
      %139 = arith.addi %81, %c2_i32_126 : i32
      %c0_127 = arith.constant 0 : index
      %140 = arith.index_cast %139 : i32 to index
      %c1_128 = arith.constant 1 : index
      %c0_129 = arith.constant 0 : index
      %141 = vector.load %arg1[%c0_127, %140, %c1_128, %c0_129] : memref<1x18x18x3xbf16, #tpu.memory_space<vmem>>, vector<1x1x16x3xbf16>
      %142 = vector.shape_cast %141 : vector<1x1x16x3xbf16> to vector<16x3xbf16>
      %c7_130 = arith.constant 7 : index
      %c0_131 = arith.constant 0 : index
      %c0_132 = arith.constant 0 : index
      %143 = vector.load %arg2[%c7_130, %c0_131, %c0_132] : memref<9x3x64xbf16, #tpu.memory_space<vmem>>, vector<1x3x64xbf16>
      %144 = vector.shape_cast %143 : vector<1x3x64xbf16> to vector<3x64xbf16>
      %cst_133 = arith.constant dense<0.000000e+00> : vector<16x64xf32>
      %145 = tpu.matmul %142, %144, %cst_133 {dimension_numbers = #tpu.dot_dimension_numbers<[1], [0], [0], [1], [0, 0, 1, 1], [], []>} : vector<16x3xbf16>, vector<3x64xbf16>, vector<16x64xf32> -> vector<16x64xf32>
      %146 = arith.addf %138, %145 : vector<16x64xf32>
      %c2_i32_134 = arith.constant 2 : i32
      %147 = arith.addi %81, %c2_i32_134 : i32
      %c0_135 = arith.constant 0 : index
      %148 = arith.index_cast %147 : i32 to index
      %c2_136 = arith.constant 2 : index
      %c0_137 = arith.constant 0 : index
      %149 = vector.load %arg1[%c0_135, %148, %c2_136, %c0_137] : memref<1x18x18x3xbf16, #tpu.memory_space<vmem>>, vector<1x1x16x3xbf16>
      %150 = vector.shape_cast %149 : vector<1x1x16x3xbf16> to vector<16x3xbf16>
      %c8_138 = arith.constant 8 : index
      %c0_139 = arith.constant 0 : index
      %c0_140 = arith.constant 0 : index
      %151 = vector.load %arg2[%c8_138, %c0_139, %c0_140] : memref<9x3x64xbf16, #tpu.memory_space<vmem>>, vector<1x3x64xbf16>
      %152 = vector.shape_cast %151 : vector<1x3x64xbf16> to vector<3x64xbf16>
      %cst_141 = arith.constant dense<0.000000e+00> : vector<16x64xf32>
      %153 = tpu.matmul %150, %152, %cst_141 {dimension_numbers = #tpu.dot_dimension_numbers<[1], [0], [0], [1], [0, 0, 1, 1], [], []>} : vector<16x3xbf16>, vector<3x64xbf16>, vector<16x64xf32> -> vector<16x64xf32>
      %154 = arith.addf %146, %153 : vector<16x64xf32>
      %155 = vector.broadcast %0 : vector<1x64xf32> to vector<16x64xf32>
      %156 = arith.addf %154, %155 : vector<16x64xf32>
      %cst_142 = arith.constant 0.000000e+00 : f32
      %157 = vector.broadcast %cst_142 : f32 to vector<16x64xf32>
      %158 = arith.maximumf %156, %157 : vector<16x64xf32>
      %159 = arith.maximumf %79, %158 : vector<16x64xf32>
      %160 = vector.shape_cast %159 : vector<16x64xf32> to vector<8x2x64xf32>
      %cst_143 = arith.constant dense<0xFF800000> : vector<8x64xf32>
      %161 = vector.multi_reduction <maximumf>, %160, %cst_143 [1] : vector<8x2x64xf32> to vector<8x64xf32>
      %162 = arith.truncf %161 : vector<8x64xf32> to vector<8x64xbf16>
      %c0_144 = arith.constant 0 : index
      %163 = arith.index_cast %arg5 : i32 to index
      %c0_145 = arith.constant 0 : index
      %c0_146 = arith.constant 0 : index
      %164 = vector.load %arg4[%c0_144, %163, %c0_145, %c0_146] : memref<1x8x8x64xbf16, #tpu.memory_space<vmem>>, vector<1x1x8x64xbf16>
      %165 = vector.shape_cast %164 : vector<1x1x8x64xbf16> to vector<8x64xbf16>
      %166 = vector.shape_cast %162 : vector<8x64xbf16> to vector<1x1x8x64xbf16>
      tpu.vector_store %arg4[%c0_144, %163, %c0_145, %c0_146], %166 {strides = array<i32>} : memref<1x8x8x64xbf16, #tpu.memory_space<vmem>>, vector<1x1x8x64xbf16>,
    }
    %c8_i32_1 = arith.constant 8 : i32
    return
  }
  func.func @transform_0(%arg0: i32) -> (i32, i32, i32, i32) {
    %c0_i32 = arith.constant 0 : i32
    %c0_i32_0 = arith.constant 0 : i32
    %c0_i32_1 = arith.constant 0 : i32
    %c0_i32_2 = arith.constant 0 : i32
    return %arg0, %c0_i32, %c0_i32_0, %c0_i32_1 : i32, i32, i32, i32
  }
  func.func @transform_1(%arg0: i32) -> (i32, i32, i32) {
    %c0_i32 = arith.constant 0 : i32
    %c0_i32_0 = arith.constant 0 : i32
    %c0_i32_1 = arith.constant 0 : i32
    %c0_i32_2 = arith.constant 0 : i32
    return %c0_i32, %c0_i32_0, %c0_i32_1 : i32, i32, i32
  }
  func.func @transform_2(%arg0: i32) -> (i32, i32) {
    %c0_i32 = arith.constant 0 : i32
    %c0_i32_0 = arith.constant 0 : i32
    %c0_i32_1 = arith.constant 0 : i32
    return %c0_i32, %c0_i32_0 : i32, i32
  }
  func.func @transform_3(%arg0: i32) -> (i32, i32, i32, i32) {
    %c0_i32 = arith.constant 0 : i32
    %c0_i32_0 = arith.constant 0 : i32
    %c0_i32_1 = arith.constant 0 : i32
    %c0_i32_2 = arith.constant 0 : i32
    return %arg0, %c0_i32, %c0_i32_0, %c0_i32_1 : i32, i32, i32, i32
  }
}

module attributes {stable_mosaic.version = 11 : i64} {
  func.func @_conv_pool_kernel(%arg0: i32, %arg1: memref<1x10x10x64xbf16, #tpu.memory_space<vmem>>, %arg2: memref<9x64x128xbf16, #tpu.memory_space<vmem>>, %arg3: memref<1x128xf32, #tpu.memory_space<vmem>>, %arg4: memref<1x4x4x128xbf16, #tpu.memory_space<vmem>>) attributes {dimension_semantics = [#tpu.dimension_semantics<parallel>], iteration_bounds = array<i64: 2>, scalar_prefetch = 0 : i64, scratch_operands = 0 : i64, tpu.core_type = #tpu.core_type<tc>, window_params = [{transform_indices = @transform_0, window_bounds = array<i64: 1, 10, 10, 64>}, {pipeline_mode = #tpu.pipeline_mode<synchronous>, transform_indices = @transform_1, window_bounds = array<i64: 9, 64, 128>}, {pipeline_mode = #tpu.pipeline_mode<synchronous>, transform_indices = @transform_2, window_bounds = array<i64: 1, 128>}, {transform_indices = @transform_3, window_bounds = array<i64: 1, 4, 4, 128>}]} {
    %c0 = arith.constant 0 : index
    %c0_0 = arith.constant 0 : index
    %0 = vector.load %arg3[%c0, %c0_0] : memref<1x128xf32, #tpu.memory_space<vmem>>, vector<1x128xf32>
    %c0_i32 = arith.constant 0 : i32
    %c4_i32 = arith.constant 4 : i32
    %1 = arith.addi %c0_i32, %c4_i32 : i32
    %c1_i32 = arith.constant 1 : i32
    scf.for %arg5 = %c0_i32 to %1 step %c1_i32  : i32 {
      %c2_i32 = arith.constant 2 : i32
      %2 = arith.muli %c2_i32, %arg5 : i32
      %cst = arith.constant 0.000000e+00 : f32
      %3 = vector.broadcast %cst : f32 to vector<8x128xf32>
      %c0_i32_2 = arith.constant 0 : i32
      %4 = arith.addi %2, %c0_i32_2 : i32
      %c0_3 = arith.constant 0 : index
      %5 = arith.index_cast %4 : i32 to index
      %c0_4 = arith.constant 0 : index
      %c0_5 = arith.constant 0 : index
      %6 = vector.load %arg1[%c0_3, %5, %c0_4, %c0_5] : memref<1x10x10x64xbf16, #tpu.memory_space<vmem>>, vector<1x1x8x64xbf16>
      %7 = vector.shape_cast %6 : vector<1x1x8x64xbf16> to vector<8x64xbf16>
      %c0_6 = arith.constant 0 : index
      %c0_7 = arith.constant 0 : index
      %c0_8 = arith.constant 0 : index
      %8 = vector.load %arg2[%c0_6, %c0_7, %c0_8] : memref<9x64x128xbf16, #tpu.memory_space<vmem>>, vector<1x64x128xbf16>
      %9 = vector.shape_cast %8 : vector<1x64x128xbf16> to vector<64x128xbf16>
      %cst_9 = arith.constant dense<0.000000e+00> : vector<8x128xf32>
      %10 = tpu.matmul %7, %9, %cst_9 {dimension_numbers = #tpu.dot_dimension_numbers<[1], [0], [0], [1], [0, 0, 1, 1], [], []>} : vector<8x64xbf16>, vector<64x128xbf16>, vector<8x128xf32> -> vector<8x128xf32>
      %11 = arith.addf %3, %10 : vector<8x128xf32>
      %c0_i32_10 = arith.constant 0 : i32
      %12 = arith.addi %2, %c0_i32_10 : i32
      %c0_11 = arith.constant 0 : index
      %13 = arith.index_cast %12 : i32 to index
      %c1 = arith.constant 1 : index
      %c0_12 = arith.constant 0 : index
      %14 = vector.load %arg1[%c0_11, %13, %c1, %c0_12] : memref<1x10x10x64xbf16, #tpu.memory_space<vmem>>, vector<1x1x8x64xbf16>
      %15 = vector.shape_cast %14 : vector<1x1x8x64xbf16> to vector<8x64xbf16>
      %c1_13 = arith.constant 1 : index
      %c0_14 = arith.constant 0 : index
      %c0_15 = arith.constant 0 : index
      %16 = vector.load %arg2[%c1_13, %c0_14, %c0_15] : memref<9x64x128xbf16, #tpu.memory_space<vmem>>, vector<1x64x128xbf16>
      %17 = vector.shape_cast %16 : vector<1x64x128xbf16> to vector<64x128xbf16>
      %cst_16 = arith.constant dense<0.000000e+00> : vector<8x128xf32>
      %18 = tpu.matmul %15, %17, %cst_16 {dimension_numbers = #tpu.dot_dimension_numbers<[1], [0], [0], [1], [0, 0, 1, 1], [], []>} : vector<8x64xbf16>, vector<64x128xbf16>, vector<8x128xf32> -> vector<8x128xf32>
      %19 = arith.addf %11, %18 : vector<8x128xf32>
      %c0_i32_17 = arith.constant 0 : i32
      %20 = arith.addi %2, %c0_i32_17 : i32
      %c0_18 = arith.constant 0 : index
      %21 = arith.index_cast %20 : i32 to index
      %c2 = arith.constant 2 : index
      %c0_19 = arith.constant 0 : index
      %22 = vector.load %arg1[%c0_18, %21, %c2, %c0_19] : memref<1x10x10x64xbf16, #tpu.memory_space<vmem>>, vector<1x1x8x64xbf16>
      %23 = vector.shape_cast %22 : vector<1x1x8x64xbf16> to vector<8x64xbf16>
      %c2_20 = arith.constant 2 : index
      %c0_21 = arith.constant 0 : index
      %c0_22 = arith.constant 0 : index
      %24 = vector.load %arg2[%c2_20, %c0_21, %c0_22] : memref<9x64x128xbf16, #tpu.memory_space<vmem>>, vector<1x64x128xbf16>
      %25 = vector.shape_cast %24 : vector<1x64x128xbf16> to vector<64x128xbf16>
      %cst_23 = arith.constant dense<0.000000e+00> : vector<8x128xf32>
      %26 = tpu.matmul %23, %25, %cst_23 {dimension_numbers = #tpu.dot_dimension_numbers<[1], [0], [0], [1], [0, 0, 1, 1], [], []>} : vector<8x64xbf16>, vector<64x128xbf16>, vector<8x128xf32> -> vector<8x128xf32>
      %27 = arith.addf %19, %26 : vector<8x128xf32>
      %c1_i32_24 = arith.constant 1 : i32
      %28 = arith.addi %2, %c1_i32_24 : i32
      %c0_25 = arith.constant 0 : index
      %29 = arith.index_cast %28 : i32 to index
      %c0_26 = arith.constant 0 : index
      %c0_27 = arith.constant 0 : index
      %30 = vector.load %arg1[%c0_25, %29, %c0_26, %c0_27] : memref<1x10x10x64xbf16, #tpu.memory_space<vmem>>, vector<1x1x8x64xbf16>
      %31 = vector.shape_cast %30 : vector<1x1x8x64xbf16> to vector<8x64xbf16>
      %c3 = arith.constant 3 : index
      %c0_28 = arith.constant 0 : index
      %c0_29 = arith.constant 0 : index
      %32 = vector.load %arg2[%c3, %c0_28, %c0_29] : memref<9x64x128xbf16, #tpu.memory_space<vmem>>, vector<1x64x128xbf16>
      %33 = vector.shape_cast %32 : vector<1x64x128xbf16> to vector<64x128xbf16>
      %cst_30 = arith.constant dense<0.000000e+00> : vector<8x128xf32>
      %34 = tpu.matmul %31, %33, %cst_30 {dimension_numbers = #tpu.dot_dimension_numbers<[1], [0], [0], [1], [0, 0, 1, 1], [], []>} : vector<8x64xbf16>, vector<64x128xbf16>, vector<8x128xf32> -> vector<8x128xf32>
      %35 = arith.addf %27, %34 : vector<8x128xf32>
      %c1_i32_31 = arith.constant 1 : i32
      %36 = arith.addi %2, %c1_i32_31 : i32
      %c0_32 = arith.constant 0 : index
      %37 = arith.index_cast %36 : i32 to index
      %c1_33 = arith.constant 1 : index
      %c0_34 = arith.constant 0 : index
      %38 = vector.load %arg1[%c0_32, %37, %c1_33, %c0_34] : memref<1x10x10x64xbf16, #tpu.memory_space<vmem>>, vector<1x1x8x64xbf16>
      %39 = vector.shape_cast %38 : vector<1x1x8x64xbf16> to vector<8x64xbf16>
      %c4 = arith.constant 4 : index
      %c0_35 = arith.constant 0 : index
      %c0_36 = arith.constant 0 : index
      %40 = vector.load %arg2[%c4, %c0_35, %c0_36] : memref<9x64x128xbf16, #tpu.memory_space<vmem>>, vector<1x64x128xbf16>
      %41 = vector.shape_cast %40 : vector<1x64x128xbf16> to vector<64x128xbf16>
      %cst_37 = arith.constant dense<0.000000e+00> : vector<8x128xf32>
      %42 = tpu.matmul %39, %41, %cst_37 {dimension_numbers = #tpu.dot_dimension_numbers<[1], [0], [0], [1], [0, 0, 1, 1], [], []>} : vector<8x64xbf16>, vector<64x128xbf16>, vector<8x128xf32> -> vector<8x128xf32>
      %43 = arith.addf %35, %42 : vector<8x128xf32>
      %c1_i32_38 = arith.constant 1 : i32
      %44 = arith.addi %2, %c1_i32_38 : i32
      %c0_39 = arith.constant 0 : index
      %45 = arith.index_cast %44 : i32 to index
      %c2_40 = arith.constant 2 : index
      %c0_41 = arith.constant 0 : index
      %46 = vector.load %arg1[%c0_39, %45, %c2_40, %c0_41] : memref<1x10x10x64xbf16, #tpu.memory_space<vmem>>, vector<1x1x8x64xbf16>
      %47 = vector.shape_cast %46 : vector<1x1x8x64xbf16> to vector<8x64xbf16>
      %c5 = arith.constant 5 : index
      %c0_42 = arith.constant 0 : index
      %c0_43 = arith.constant 0 : index
      %48 = vector.load %arg2[%c5, %c0_42, %c0_43] : memref<9x64x128xbf16, #tpu.memory_space<vmem>>, vector<1x64x128xbf16>
      %49 = vector.shape_cast %48 : vector<1x64x128xbf16> to vector<64x128xbf16>
      %cst_44 = arith.constant dense<0.000000e+00> : vector<8x128xf32>
      %50 = tpu.matmul %47, %49, %cst_44 {dimension_numbers = #tpu.dot_dimension_numbers<[1], [0], [0], [1], [0, 0, 1, 1], [], []>} : vector<8x64xbf16>, vector<64x128xbf16>, vector<8x128xf32> -> vector<8x128xf32>
      %51 = arith.addf %43, %50 : vector<8x128xf32>
      %c2_i32_45 = arith.constant 2 : i32
      %52 = arith.addi %2, %c2_i32_45 : i32
      %c0_46 = arith.constant 0 : index
      %53 = arith.index_cast %52 : i32 to index
      %c0_47 = arith.constant 0 : index
      %c0_48 = arith.constant 0 : index
      %54 = vector.load %arg1[%c0_46, %53, %c0_47, %c0_48] : memref<1x10x10x64xbf16, #tpu.memory_space<vmem>>, vector<1x1x8x64xbf16>
      %55 = vector.shape_cast %54 : vector<1x1x8x64xbf16> to vector<8x64xbf16>
      %c6 = arith.constant 6 : index
      %c0_49 = arith.constant 0 : index
      %c0_50 = arith.constant 0 : index
      %56 = vector.load %arg2[%c6, %c0_49, %c0_50] : memref<9x64x128xbf16, #tpu.memory_space<vmem>>, vector<1x64x128xbf16>
      %57 = vector.shape_cast %56 : vector<1x64x128xbf16> to vector<64x128xbf16>
      %cst_51 = arith.constant dense<0.000000e+00> : vector<8x128xf32>
      %58 = tpu.matmul %55, %57, %cst_51 {dimension_numbers = #tpu.dot_dimension_numbers<[1], [0], [0], [1], [0, 0, 1, 1], [], []>} : vector<8x64xbf16>, vector<64x128xbf16>, vector<8x128xf32> -> vector<8x128xf32>
      %59 = arith.addf %51, %58 : vector<8x128xf32>
      %c2_i32_52 = arith.constant 2 : i32
      %60 = arith.addi %2, %c2_i32_52 : i32
      %c0_53 = arith.constant 0 : index
      %61 = arith.index_cast %60 : i32 to index
      %c1_54 = arith.constant 1 : index
      %c0_55 = arith.constant 0 : index
      %62 = vector.load %arg1[%c0_53, %61, %c1_54, %c0_55] : memref<1x10x10x64xbf16, #tpu.memory_space<vmem>>, vector<1x1x8x64xbf16>
      %63 = vector.shape_cast %62 : vector<1x1x8x64xbf16> to vector<8x64xbf16>
      %c7 = arith.constant 7 : index
      %c0_56 = arith.constant 0 : index
      %c0_57 = arith.constant 0 : index
      %64 = vector.load %arg2[%c7, %c0_56, %c0_57] : memref<9x64x128xbf16, #tpu.memory_space<vmem>>, vector<1x64x128xbf16>
      %65 = vector.shape_cast %64 : vector<1x64x128xbf16> to vector<64x128xbf16>
      %cst_58 = arith.constant dense<0.000000e+00> : vector<8x128xf32>
      %66 = tpu.matmul %63, %65, %cst_58 {dimension_numbers = #tpu.dot_dimension_numbers<[1], [0], [0], [1], [0, 0, 1, 1], [], []>} : vector<8x64xbf16>, vector<64x128xbf16>, vector<8x128xf32> -> vector<8x128xf32>
      %67 = arith.addf %59, %66 : vector<8x128xf32>
      %c2_i32_59 = arith.constant 2 : i32
      %68 = arith.addi %2, %c2_i32_59 : i32
      %c0_60 = arith.constant 0 : index
      %69 = arith.index_cast %68 : i32 to index
      %c2_61 = arith.constant 2 : index
      %c0_62 = arith.constant 0 : index
      %70 = vector.load %arg1[%c0_60, %69, %c2_61, %c0_62] : memref<1x10x10x64xbf16, #tpu.memory_space<vmem>>, vector<1x1x8x64xbf16>
      %71 = vector.shape_cast %70 : vector<1x1x8x64xbf16> to vector<8x64xbf16>
      %c8 = arith.constant 8 : index
      %c0_63 = arith.constant 0 : index
      %c0_64 = arith.constant 0 : index
      %72 = vector.load %arg2[%c8, %c0_63, %c0_64] : memref<9x64x128xbf16, #tpu.memory_space<vmem>>, vector<1x64x128xbf16>
      %73 = vector.shape_cast %72 : vector<1x64x128xbf16> to vector<64x128xbf16>
      %cst_65 = arith.constant dense<0.000000e+00> : vector<8x128xf32>
      %74 = tpu.matmul %71, %73, %cst_65 {dimension_numbers = #tpu.dot_dimension_numbers<[1], [0], [0], [1], [0, 0, 1, 1], [], []>} : vector<8x64xbf16>, vector<64x128xbf16>, vector<8x128xf32> -> vector<8x128xf32>
      %75 = arith.addf %67, %74 : vector<8x128xf32>
      %76 = vector.broadcast %0 : vector<1x128xf32> to vector<8x128xf32>
      %77 = arith.addf %75, %76 : vector<8x128xf32>
      %cst_66 = arith.constant 0.000000e+00 : f32
      %78 = vector.broadcast %cst_66 : f32 to vector<8x128xf32>
      %79 = arith.maximumf %77, %78 : vector<8x128xf32>
      %c2_i32_67 = arith.constant 2 : i32
      %80 = arith.muli %c2_i32_67, %arg5 : i32
      %c1_i32_68 = arith.constant 1 : i32
      %81 = arith.addi %80, %c1_i32_68 : i32
      %cst_69 = arith.constant 0.000000e+00 : f32
      %82 = vector.broadcast %cst_69 : f32 to vector<8x128xf32>
      %c0_i32_70 = arith.constant 0 : i32
      %83 = arith.addi %81, %c0_i32_70 : i32
      %c0_71 = arith.constant 0 : index
      %84 = arith.index_cast %83 : i32 to index
      %c0_72 = arith.constant 0 : index
      %c0_73 = arith.constant 0 : index
      %85 = vector.load %arg1[%c0_71, %84, %c0_72, %c0_73] : memref<1x10x10x64xbf16, #tpu.memory_space<vmem>>, vector<1x1x8x64xbf16>
      %86 = vector.shape_cast %85 : vector<1x1x8x64xbf16> to vector<8x64xbf16>
      %c0_74 = arith.constant 0 : index
      %c0_75 = arith.constant 0 : index
      %c0_76 = arith.constant 0 : index
      %87 = vector.load %arg2[%c0_74, %c0_75, %c0_76] : memref<9x64x128xbf16, #tpu.memory_space<vmem>>, vector<1x64x128xbf16>
      %88 = vector.shape_cast %87 : vector<1x64x128xbf16> to vector<64x128xbf16>
      %cst_77 = arith.constant dense<0.000000e+00> : vector<8x128xf32>
      %89 = tpu.matmul %86, %88, %cst_77 {dimension_numbers = #tpu.dot_dimension_numbers<[1], [0], [0], [1], [0, 0, 1, 1], [], []>} : vector<8x64xbf16>, vector<64x128xbf16>, vector<8x128xf32> -> vector<8x128xf32>
      %90 = arith.addf %82, %89 : vector<8x128xf32>
      %c0_i32_78 = arith.constant 0 : i32
      %91 = arith.addi %81, %c0_i32_78 : i32
      %c0_79 = arith.constant 0 : index
      %92 = arith.index_cast %91 : i32 to index
      %c1_80 = arith.constant 1 : index
      %c0_81 = arith.constant 0 : index
      %93 = vector.load %arg1[%c0_79, %92, %c1_80, %c0_81] : memref<1x10x10x64xbf16, #tpu.memory_space<vmem>>, vector<1x1x8x64xbf16>
      %94 = vector.shape_cast %93 : vector<1x1x8x64xbf16> to vector<8x64xbf16>
      %c1_82 = arith.constant 1 : index
      %c0_83 = arith.constant 0 : index
      %c0_84 = arith.constant 0 : index
      %95 = vector.load %arg2[%c1_82, %c0_83, %c0_84] : memref<9x64x128xbf16, #tpu.memory_space<vmem>>, vector<1x64x128xbf16>
      %96 = vector.shape_cast %95 : vector<1x64x128xbf16> to vector<64x128xbf16>
      %cst_85 = arith.constant dense<0.000000e+00> : vector<8x128xf32>
      %97 = tpu.matmul %94, %96, %cst_85 {dimension_numbers = #tpu.dot_dimension_numbers<[1], [0], [0], [1], [0, 0, 1, 1], [], []>} : vector<8x64xbf16>, vector<64x128xbf16>, vector<8x128xf32> -> vector<8x128xf32>
      %98 = arith.addf %90, %97 : vector<8x128xf32>
      %c0_i32_86 = arith.constant 0 : i32
      %99 = arith.addi %81, %c0_i32_86 : i32
      %c0_87 = arith.constant 0 : index
      %100 = arith.index_cast %99 : i32 to index
      %c2_88 = arith.constant 2 : index
      %c0_89 = arith.constant 0 : index
      %101 = vector.load %arg1[%c0_87, %100, %c2_88, %c0_89] : memref<1x10x10x64xbf16, #tpu.memory_space<vmem>>, vector<1x1x8x64xbf16>
      %102 = vector.shape_cast %101 : vector<1x1x8x64xbf16> to vector<8x64xbf16>
      %c2_90 = arith.constant 2 : index
      %c0_91 = arith.constant 0 : index
      %c0_92 = arith.constant 0 : index
      %103 = vector.load %arg2[%c2_90, %c0_91, %c0_92] : memref<9x64x128xbf16, #tpu.memory_space<vmem>>, vector<1x64x128xbf16>
      %104 = vector.shape_cast %103 : vector<1x64x128xbf16> to vector<64x128xbf16>
      %cst_93 = arith.constant dense<0.000000e+00> : vector<8x128xf32>
      %105 = tpu.matmul %102, %104, %cst_93 {dimension_numbers = #tpu.dot_dimension_numbers<[1], [0], [0], [1], [0, 0, 1, 1], [], []>} : vector<8x64xbf16>, vector<64x128xbf16>, vector<8x128xf32> -> vector<8x128xf32>
      %106 = arith.addf %98, %105 : vector<8x128xf32>
      %c1_i32_94 = arith.constant 1 : i32
      %107 = arith.addi %81, %c1_i32_94 : i32
      %c0_95 = arith.constant 0 : index
      %108 = arith.index_cast %107 : i32 to index
      %c0_96 = arith.constant 0 : index
      %c0_97 = arith.constant 0 : index
      %109 = vector.load %arg1[%c0_95, %108, %c0_96, %c0_97] : memref<1x10x10x64xbf16, #tpu.memory_space<vmem>>, vector<1x1x8x64xbf16>
      %110 = vector.shape_cast %109 : vector<1x1x8x64xbf16> to vector<8x64xbf16>
      %c3_98 = arith.constant 3 : index
      %c0_99 = arith.constant 0 : index
      %c0_100 = arith.constant 0 : index
      %111 = vector.load %arg2[%c3_98, %c0_99, %c0_100] : memref<9x64x128xbf16, #tpu.memory_space<vmem>>, vector<1x64x128xbf16>
      %112 = vector.shape_cast %111 : vector<1x64x128xbf16> to vector<64x128xbf16>
      %cst_101 = arith.constant dense<0.000000e+00> : vector<8x128xf32>
      %113 = tpu.matmul %110, %112, %cst_101 {dimension_numbers = #tpu.dot_dimension_numbers<[1], [0], [0], [1], [0, 0, 1, 1], [], []>} : vector<8x64xbf16>, vector<64x128xbf16>, vector<8x128xf32> -> vector<8x128xf32>
      %114 = arith.addf %106, %113 : vector<8x128xf32>
      %c1_i32_102 = arith.constant 1 : i32
      %115 = arith.addi %81, %c1_i32_102 : i32
      %c0_103 = arith.constant 0 : index
      %116 = arith.index_cast %115 : i32 to index
      %c1_104 = arith.constant 1 : index
      %c0_105 = arith.constant 0 : index
      %117 = vector.load %arg1[%c0_103, %116, %c1_104, %c0_105] : memref<1x10x10x64xbf16, #tpu.memory_space<vmem>>, vector<1x1x8x64xbf16>
      %118 = vector.shape_cast %117 : vector<1x1x8x64xbf16> to vector<8x64xbf16>
      %c4_106 = arith.constant 4 : index
      %c0_107 = arith.constant 0 : index
      %c0_108 = arith.constant 0 : index
      %119 = vector.load %arg2[%c4_106, %c0_107, %c0_108] : memref<9x64x128xbf16, #tpu.memory_space<vmem>>, vector<1x64x128xbf16>
      %120 = vector.shape_cast %119 : vector<1x64x128xbf16> to vector<64x128xbf16>
      %cst_109 = arith.constant dense<0.000000e+00> : vector<8x128xf32>
      %121 = tpu.matmul %118, %120, %cst_109 {dimension_numbers = #tpu.dot_dimension_numbers<[1], [0], [0], [1], [0, 0, 1, 1], [], []>} : vector<8x64xbf16>, vector<64x128xbf16>, vector<8x128xf32> -> vector<8x128xf32>
      %122 = arith.addf %114, %121 : vector<8x128xf32>
      %c1_i32_110 = arith.constant 1 : i32
      %123 = arith.addi %81, %c1_i32_110 : i32
      %c0_111 = arith.constant 0 : index
      %124 = arith.index_cast %123 : i32 to index
      %c2_112 = arith.constant 2 : index
      %c0_113 = arith.constant 0 : index
      %125 = vector.load %arg1[%c0_111, %124, %c2_112, %c0_113] : memref<1x10x10x64xbf16, #tpu.memory_space<vmem>>, vector<1x1x8x64xbf16>
      %126 = vector.shape_cast %125 : vector<1x1x8x64xbf16> to vector<8x64xbf16>
      %c5_114 = arith.constant 5 : index
      %c0_115 = arith.constant 0 : index
      %c0_116 = arith.constant 0 : index
      %127 = vector.load %arg2[%c5_114, %c0_115, %c0_116] : memref<9x64x128xbf16, #tpu.memory_space<vmem>>, vector<1x64x128xbf16>
      %128 = vector.shape_cast %127 : vector<1x64x128xbf16> to vector<64x128xbf16>
      %cst_117 = arith.constant dense<0.000000e+00> : vector<8x128xf32>
      %129 = tpu.matmul %126, %128, %cst_117 {dimension_numbers = #tpu.dot_dimension_numbers<[1], [0], [0], [1], [0, 0, 1, 1], [], []>} : vector<8x64xbf16>, vector<64x128xbf16>, vector<8x128xf32> -> vector<8x128xf32>
      %130 = arith.addf %122, %129 : vector<8x128xf32>
      %c2_i32_118 = arith.constant 2 : i32
      %131 = arith.addi %81, %c2_i32_118 : i32
      %c0_119 = arith.constant 0 : index
      %132 = arith.index_cast %131 : i32 to index
      %c0_120 = arith.constant 0 : index
      %c0_121 = arith.constant 0 : index
      %133 = vector.load %arg1[%c0_119, %132, %c0_120, %c0_121] : memref<1x10x10x64xbf16, #tpu.memory_space<vmem>>, vector<1x1x8x64xbf16>
      %134 = vector.shape_cast %133 : vector<1x1x8x64xbf16> to vector<8x64xbf16>
      %c6_122 = arith.constant 6 : index
      %c0_123 = arith.constant 0 : index
      %c0_124 = arith.constant 0 : index
      %135 = vector.load %arg2[%c6_122, %c0_123, %c0_124] : memref<9x64x128xbf16, #tpu.memory_space<vmem>>, vector<1x64x128xbf16>
      %136 = vector.shape_cast %135 : vector<1x64x128xbf16> to vector<64x128xbf16>
      %cst_125 = arith.constant dense<0.000000e+00> : vector<8x128xf32>
      %137 = tpu.matmul %134, %136, %cst_125 {dimension_numbers = #tpu.dot_dimension_numbers<[1], [0], [0], [1], [0, 0, 1, 1], [], []>} : vector<8x64xbf16>, vector<64x128xbf16>, vector<8x128xf32> -> vector<8x128xf32>
      %138 = arith.addf %130, %137 : vector<8x128xf32>
      %c2_i32_126 = arith.constant 2 : i32
      %139 = arith.addi %81, %c2_i32_126 : i32
      %c0_127 = arith.constant 0 : index
      %140 = arith.index_cast %139 : i32 to index
      %c1_128 = arith.constant 1 : index
      %c0_129 = arith.constant 0 : index
      %141 = vector.load %arg1[%c0_127, %140, %c1_128, %c0_129] : memref<1x10x10x64xbf16, #tpu.memory_space<vmem>>, vector<1x1x8x64xbf16>
      %142 = vector.shape_cast %141 : vector<1x1x8x64xbf16> to vector<8x64xbf16>
      %c7_130 = arith.constant 7 : index
      %c0_131 = arith.constant 0 : index
      %c0_132 = arith.constant 0 : index
      %143 = vector.load %arg2[%c7_130, %c0_131, %c0_132] : memref<9x64x128xbf16, #tpu.memory_space<vmem>>, vector<1x64x128xbf16>
      %144 = vector.shape_cast %143 : vector<1x64x128xbf16> to vector<64x128xbf16>
      %cst_133 = arith.constant dense<0.000000e+00> : vector<8x128xf32>
      %145 = tpu.matmul %142, %144, %cst_133 {dimension_numbers = #tpu.dot_dimension_numbers<[1], [0], [0], [1], [0, 0, 1, 1], [], []>} : vector<8x64xbf16>, vector<64x128xbf16>, vector<8x128xf32> -> vector<8x128xf32>
      %146 = arith.addf %138, %145 : vector<8x128xf32>
      %c2_i32_134 = arith.constant 2 : i32
      %147 = arith.addi %81, %c2_i32_134 : i32
      %c0_135 = arith.constant 0 : index
      %148 = arith.index_cast %147 : i32 to index
      %c2_136 = arith.constant 2 : index
      %c0_137 = arith.constant 0 : index
      %149 = vector.load %arg1[%c0_135, %148, %c2_136, %c0_137] : memref<1x10x10x64xbf16, #tpu.memory_space<vmem>>, vector<1x1x8x64xbf16>
      %150 = vector.shape_cast %149 : vector<1x1x8x64xbf16> to vector<8x64xbf16>
      %c8_138 = arith.constant 8 : index
      %c0_139 = arith.constant 0 : index
      %c0_140 = arith.constant 0 : index
      %151 = vector.load %arg2[%c8_138, %c0_139, %c0_140] : memref<9x64x128xbf16, #tpu.memory_space<vmem>>, vector<1x64x128xbf16>
      %152 = vector.shape_cast %151 : vector<1x64x128xbf16> to vector<64x128xbf16>
      %cst_141 = arith.constant dense<0.000000e+00> : vector<8x128xf32>
      %153 = tpu.matmul %150, %152, %cst_141 {dimension_numbers = #tpu.dot_dimension_numbers<[1], [0], [0], [1], [0, 0, 1, 1], [], []>} : vector<8x64xbf16>, vector<64x128xbf16>, vector<8x128xf32> -> vector<8x128xf32>
      %154 = arith.addf %146, %153 : vector<8x128xf32>
      %155 = vector.broadcast %0 : vector<1x128xf32> to vector<8x128xf32>
      %156 = arith.addf %154, %155 : vector<8x128xf32>
      %cst_142 = arith.constant 0.000000e+00 : f32
      %157 = vector.broadcast %cst_142 : f32 to vector<8x128xf32>
      %158 = arith.maximumf %156, %157 : vector<8x128xf32>
      %159 = arith.maximumf %79, %158 : vector<8x128xf32>
      %160 = vector.shape_cast %159 : vector<8x128xf32> to vector<4x2x128xf32>
      %cst_143 = arith.constant dense<0xFF800000> : vector<4x128xf32>
      %161 = vector.multi_reduction <maximumf>, %160, %cst_143 [1] : vector<4x2x128xf32> to vector<4x128xf32>
      %162 = arith.truncf %161 : vector<4x128xf32> to vector<4x128xbf16>
      %c0_144 = arith.constant 0 : index
      %163 = arith.index_cast %arg5 : i32 to index
      %c0_145 = arith.constant 0 : index
      %c0_146 = arith.constant 0 : index
      %164 = vector.load %arg4[%c0_144, %163, %c0_145, %c0_146] : memref<1x4x4x128xbf16, #tpu.memory_space<vmem>>, vector<1x1x4x128xbf16>
      %165 = vector.shape_cast %164 : vector<1x1x4x128xbf16> to vector<4x128xbf16>
      %166 = vector.shape_cast %162 : vector<4x128xbf16> to vector<1x1x4x128xbf16>
      tpu.vector_store %arg4[%c0_144, %163, %c0_145, %c0_146], %166 {strides = array<i32>} : memref<1x4x4x128xbf16, #tpu.memory_space<vmem>>, vector<1x1x4x128xbf16>,
    }
    %c4_i32_1 = arith.constant 4 : i32
    return
  }
  func.func @transform_0(%arg0: i32) -> (i32, i32, i32, i32) {
    %c0_i32 = arith.constant 0 : i32
    %c0_i32_0 = arith.constant 0 : i32
    %c0_i32_1 = arith.constant 0 : i32
    %c0_i32_2 = arith.constant 0 : i32
    return %arg0, %c0_i32, %c0_i32_0, %c0_i32_1 : i32, i32, i32, i32
  }
  func.func @transform_1(%arg0: i32) -> (i32, i32, i32) {
    %c0_i32 = arith.constant 0 : i32
    %c0_i32_0 = arith.constant 0 : i32
    %c0_i32_1 = arith.constant 0 : i32
    %c0_i32_2 = arith.constant 0 : i32
    return %c0_i32, %c0_i32_0, %c0_i32_1 : i32, i32, i32
  }
  func.func @transform_2(%arg0: i32) -> (i32, i32) {
    %c0_i32 = arith.constant 0 : i32
    %c0_i32_0 = arith.constant 0 : i32
    %c0_i32_1 = arith.constant 0 : i32
    return %c0_i32, %c0_i32_0 : i32, i32
  }
  func.func @transform_3(%arg0: i32) -> (i32, i32, i32, i32) {
    %c0_i32 = arith.constant 0 : i32
    %c0_i32_0 = arith.constant 0 : i32
    %c0_i32_1 = arith.constant 0 : i32
    %c0_i32_2 = arith.constant 0 : i32
    return %arg0, %c0_i32, %c0_i32_0, %c0_i32_1 : i32, i32, i32, i32
  }
}

module attributes {stable_mosaic.version = 11 : i64} {
  func.func @_conv_pool_kernel(%arg0: i32, %arg1: memref<1x6x6x128xbf16, #tpu.memory_space<vmem>>, %arg2: memref<9x128x256xbf16, #tpu.memory_space<vmem>>, %arg3: memref<1x256xf32, #tpu.memory_space<vmem>>, %arg4: memref<1x2x2x256xbf16, #tpu.memory_space<vmem>>) attributes {dimension_semantics = [#tpu.dimension_semantics<parallel>], iteration_bounds = array<i64: 2>, scalar_prefetch = 0 : i64, scratch_operands = 0 : i64, tpu.core_type = #tpu.core_type<tc>, window_params = [{transform_indices = @transform_0, window_bounds = array<i64: 1, 6, 6, 128>}, {pipeline_mode = #tpu.pipeline_mode<synchronous>, transform_indices = @transform_1, window_bounds = array<i64: 9, 128, 256>}, {pipeline_mode = #tpu.pipeline_mode<synchronous>, transform_indices = @transform_2, window_bounds = array<i64: 1, 256>}, {transform_indices = @transform_3, window_bounds = array<i64: 1, 2, 2, 256>}]} {
    %c0 = arith.constant 0 : index
    %c0_0 = arith.constant 0 : index
    %0 = vector.load %arg3[%c0, %c0_0] : memref<1x256xf32, #tpu.memory_space<vmem>>, vector<1x256xf32>
    %c0_i32 = arith.constant 0 : i32
    %c2_i32 = arith.constant 2 : i32
    %1 = arith.addi %c0_i32, %c2_i32 : i32
    %c1_i32 = arith.constant 1 : i32
    scf.for %arg5 = %c0_i32 to %1 step %c1_i32  : i32 {
      %c2_i32_2 = arith.constant 2 : i32
      %2 = arith.muli %c2_i32_2, %arg5 : i32
      %cst = arith.constant 0.000000e+00 : f32
      %3 = vector.broadcast %cst : f32 to vector<4x256xf32>
      %c0_i32_3 = arith.constant 0 : i32
      %4 = arith.addi %2, %c0_i32_3 : i32
      %c0_4 = arith.constant 0 : index
      %5 = arith.index_cast %4 : i32 to index
      %c0_5 = arith.constant 0 : index
      %c0_6 = arith.constant 0 : index
      %6 = vector.load %arg1[%c0_4, %5, %c0_5, %c0_6] : memref<1x6x6x128xbf16, #tpu.memory_space<vmem>>, vector<1x1x4x128xbf16>
      %7 = vector.shape_cast %6 : vector<1x1x4x128xbf16> to vector<4x128xbf16>
      %c0_7 = arith.constant 0 : index
      %c0_8 = arith.constant 0 : index
      %c0_9 = arith.constant 0 : index
      %8 = vector.load %arg2[%c0_7, %c0_8, %c0_9] : memref<9x128x256xbf16, #tpu.memory_space<vmem>>, vector<1x128x256xbf16>
      %9 = vector.shape_cast %8 : vector<1x128x256xbf16> to vector<128x256xbf16>
      %cst_10 = arith.constant dense<0.000000e+00> : vector<4x256xf32>
      %10 = tpu.matmul %7, %9, %cst_10 {dimension_numbers = #tpu.dot_dimension_numbers<[1], [0], [0], [1], [0, 0, 1, 1], [], []>} : vector<4x128xbf16>, vector<128x256xbf16>, vector<4x256xf32> -> vector<4x256xf32>
      %11 = arith.addf %3, %10 : vector<4x256xf32>
      %c0_i32_11 = arith.constant 0 : i32
      %12 = arith.addi %2, %c0_i32_11 : i32
      %c0_12 = arith.constant 0 : index
      %13 = arith.index_cast %12 : i32 to index
      %c1 = arith.constant 1 : index
      %c0_13 = arith.constant 0 : index
      %14 = vector.load %arg1[%c0_12, %13, %c1, %c0_13] : memref<1x6x6x128xbf16, #tpu.memory_space<vmem>>, vector<1x1x4x128xbf16>
      %15 = vector.shape_cast %14 : vector<1x1x4x128xbf16> to vector<4x128xbf16>
      %c1_14 = arith.constant 1 : index
      %c0_15 = arith.constant 0 : index
      %c0_16 = arith.constant 0 : index
      %16 = vector.load %arg2[%c1_14, %c0_15, %c0_16] : memref<9x128x256xbf16, #tpu.memory_space<vmem>>, vector<1x128x256xbf16>
      %17 = vector.shape_cast %16 : vector<1x128x256xbf16> to vector<128x256xbf16>
      %cst_17 = arith.constant dense<0.000000e+00> : vector<4x256xf32>
      %18 = tpu.matmul %15, %17, %cst_17 {dimension_numbers = #tpu.dot_dimension_numbers<[1], [0], [0], [1], [0, 0, 1, 1], [], []>} : vector<4x128xbf16>, vector<128x256xbf16>, vector<4x256xf32> -> vector<4x256xf32>
      %19 = arith.addf %11, %18 : vector<4x256xf32>
      %c0_i32_18 = arith.constant 0 : i32
      %20 = arith.addi %2, %c0_i32_18 : i32
      %c0_19 = arith.constant 0 : index
      %21 = arith.index_cast %20 : i32 to index
      %c2 = arith.constant 2 : index
      %c0_20 = arith.constant 0 : index
      %22 = vector.load %arg1[%c0_19, %21, %c2, %c0_20] : memref<1x6x6x128xbf16, #tpu.memory_space<vmem>>, vector<1x1x4x128xbf16>
      %23 = vector.shape_cast %22 : vector<1x1x4x128xbf16> to vector<4x128xbf16>
      %c2_21 = arith.constant 2 : index
      %c0_22 = arith.constant 0 : index
      %c0_23 = arith.constant 0 : index
      %24 = vector.load %arg2[%c2_21, %c0_22, %c0_23] : memref<9x128x256xbf16, #tpu.memory_space<vmem>>, vector<1x128x256xbf16>
      %25 = vector.shape_cast %24 : vector<1x128x256xbf16> to vector<128x256xbf16>
      %cst_24 = arith.constant dense<0.000000e+00> : vector<4x256xf32>
      %26 = tpu.matmul %23, %25, %cst_24 {dimension_numbers = #tpu.dot_dimension_numbers<[1], [0], [0], [1], [0, 0, 1, 1], [], []>} : vector<4x128xbf16>, vector<128x256xbf16>, vector<4x256xf32> -> vector<4x256xf32>
      %27 = arith.addf %19, %26 : vector<4x256xf32>
      %c1_i32_25 = arith.constant 1 : i32
      %28 = arith.addi %2, %c1_i32_25 : i32
      %c0_26 = arith.constant 0 : index
      %29 = arith.index_cast %28 : i32 to index
      %c0_27 = arith.constant 0 : index
      %c0_28 = arith.constant 0 : index
      %30 = vector.load %arg1[%c0_26, %29, %c0_27, %c0_28] : memref<1x6x6x128xbf16, #tpu.memory_space<vmem>>, vector<1x1x4x128xbf16>
      %31 = vector.shape_cast %30 : vector<1x1x4x128xbf16> to vector<4x128xbf16>
      %c3 = arith.constant 3 : index
      %c0_29 = arith.constant 0 : index
      %c0_30 = arith.constant 0 : index
      %32 = vector.load %arg2[%c3, %c0_29, %c0_30] : memref<9x128x256xbf16, #tpu.memory_space<vmem>>, vector<1x128x256xbf16>
      %33 = vector.shape_cast %32 : vector<1x128x256xbf16> to vector<128x256xbf16>
      %cst_31 = arith.constant dense<0.000000e+00> : vector<4x256xf32>
      %34 = tpu.matmul %31, %33, %cst_31 {dimension_numbers = #tpu.dot_dimension_numbers<[1], [0], [0], [1], [0, 0, 1, 1], [], []>} : vector<4x128xbf16>, vector<128x256xbf16>, vector<4x256xf32> -> vector<4x256xf32>
      %35 = arith.addf %27, %34 : vector<4x256xf32>
      %c1_i32_32 = arith.constant 1 : i32
      %36 = arith.addi %2, %c1_i32_32 : i32
      %c0_33 = arith.constant 0 : index
      %37 = arith.index_cast %36 : i32 to index
      %c1_34 = arith.constant 1 : index
      %c0_35 = arith.constant 0 : index
      %38 = vector.load %arg1[%c0_33, %37, %c1_34, %c0_35] : memref<1x6x6x128xbf16, #tpu.memory_space<vmem>>, vector<1x1x4x128xbf16>
      %39 = vector.shape_cast %38 : vector<1x1x4x128xbf16> to vector<4x128xbf16>
      %c4 = arith.constant 4 : index
      %c0_36 = arith.constant 0 : index
      %c0_37 = arith.constant 0 : index
      %40 = vector.load %arg2[%c4, %c0_36, %c0_37] : memref<9x128x256xbf16, #tpu.memory_space<vmem>>, vector<1x128x256xbf16>
      %41 = vector.shape_cast %40 : vector<1x128x256xbf16> to vector<128x256xbf16>
      %cst_38 = arith.constant dense<0.000000e+00> : vector<4x256xf32>
      %42 = tpu.matmul %39, %41, %cst_38 {dimension_numbers = #tpu.dot_dimension_numbers<[1], [0], [0], [1], [0, 0, 1, 1], [], []>} : vector<4x128xbf16>, vector<128x256xbf16>, vector<4x256xf32> -> vector<4x256xf32>
      %43 = arith.addf %35, %42 : vector<4x256xf32>
      %c1_i32_39 = arith.constant 1 : i32
      %44 = arith.addi %2, %c1_i32_39 : i32
      %c0_40 = arith.constant 0 : index
      %45 = arith.index_cast %44 : i32 to index
      %c2_41 = arith.constant 2 : index
      %c0_42 = arith.constant 0 : index
      %46 = vector.load %arg1[%c0_40, %45, %c2_41, %c0_42] : memref<1x6x6x128xbf16, #tpu.memory_space<vmem>>, vector<1x1x4x128xbf16>
      %47 = vector.shape_cast %46 : vector<1x1x4x128xbf16> to vector<4x128xbf16>
      %c5 = arith.constant 5 : index
      %c0_43 = arith.constant 0 : index
      %c0_44 = arith.constant 0 : index
      %48 = vector.load %arg2[%c5, %c0_43, %c0_44] : memref<9x128x256xbf16, #tpu.memory_space<vmem>>, vector<1x128x256xbf16>
      %49 = vector.shape_cast %48 : vector<1x128x256xbf16> to vector<128x256xbf16>
      %cst_45 = arith.constant dense<0.000000e+00> : vector<4x256xf32>
      %50 = tpu.matmul %47, %49, %cst_45 {dimension_numbers = #tpu.dot_dimension_numbers<[1], [0], [0], [1], [0, 0, 1, 1], [], []>} : vector<4x128xbf16>, vector<128x256xbf16>, vector<4x256xf32> -> vector<4x256xf32>
      %51 = arith.addf %43, %50 : vector<4x256xf32>
      %c2_i32_46 = arith.constant 2 : i32
      %52 = arith.addi %2, %c2_i32_46 : i32
      %c0_47 = arith.constant 0 : index
      %53 = arith.index_cast %52 : i32 to index
      %c0_48 = arith.constant 0 : index
      %c0_49 = arith.constant 0 : index
      %54 = vector.load %arg1[%c0_47, %53, %c0_48, %c0_49] : memref<1x6x6x128xbf16, #tpu.memory_space<vmem>>, vector<1x1x4x128xbf16>
      %55 = vector.shape_cast %54 : vector<1x1x4x128xbf16> to vector<4x128xbf16>
      %c6 = arith.constant 6 : index
      %c0_50 = arith.constant 0 : index
      %c0_51 = arith.constant 0 : index
      %56 = vector.load %arg2[%c6, %c0_50, %c0_51] : memref<9x128x256xbf16, #tpu.memory_space<vmem>>, vector<1x128x256xbf16>
      %57 = vector.shape_cast %56 : vector<1x128x256xbf16> to vector<128x256xbf16>
      %cst_52 = arith.constant dense<0.000000e+00> : vector<4x256xf32>
      %58 = tpu.matmul %55, %57, %cst_52 {dimension_numbers = #tpu.dot_dimension_numbers<[1], [0], [0], [1], [0, 0, 1, 1], [], []>} : vector<4x128xbf16>, vector<128x256xbf16>, vector<4x256xf32> -> vector<4x256xf32>
      %59 = arith.addf %51, %58 : vector<4x256xf32>
      %c2_i32_53 = arith.constant 2 : i32
      %60 = arith.addi %2, %c2_i32_53 : i32
      %c0_54 = arith.constant 0 : index
      %61 = arith.index_cast %60 : i32 to index
      %c1_55 = arith.constant 1 : index
      %c0_56 = arith.constant 0 : index
      %62 = vector.load %arg1[%c0_54, %61, %c1_55, %c0_56] : memref<1x6x6x128xbf16, #tpu.memory_space<vmem>>, vector<1x1x4x128xbf16>
      %63 = vector.shape_cast %62 : vector<1x1x4x128xbf16> to vector<4x128xbf16>
      %c7 = arith.constant 7 : index
      %c0_57 = arith.constant 0 : index
      %c0_58 = arith.constant 0 : index
      %64 = vector.load %arg2[%c7, %c0_57, %c0_58] : memref<9x128x256xbf16, #tpu.memory_space<vmem>>, vector<1x128x256xbf16>
      %65 = vector.shape_cast %64 : vector<1x128x256xbf16> to vector<128x256xbf16>
      %cst_59 = arith.constant dense<0.000000e+00> : vector<4x256xf32>
      %66 = tpu.matmul %63, %65, %cst_59 {dimension_numbers = #tpu.dot_dimension_numbers<[1], [0], [0], [1], [0, 0, 1, 1], [], []>} : vector<4x128xbf16>, vector<128x256xbf16>, vector<4x256xf32> -> vector<4x256xf32>
      %67 = arith.addf %59, %66 : vector<4x256xf32>
      %c2_i32_60 = arith.constant 2 : i32
      %68 = arith.addi %2, %c2_i32_60 : i32
      %c0_61 = arith.constant 0 : index
      %69 = arith.index_cast %68 : i32 to index
      %c2_62 = arith.constant 2 : index
      %c0_63 = arith.constant 0 : index
      %70 = vector.load %arg1[%c0_61, %69, %c2_62, %c0_63] : memref<1x6x6x128xbf16, #tpu.memory_space<vmem>>, vector<1x1x4x128xbf16>
      %71 = vector.shape_cast %70 : vector<1x1x4x128xbf16> to vector<4x128xbf16>
      %c8 = arith.constant 8 : index
      %c0_64 = arith.constant 0 : index
      %c0_65 = arith.constant 0 : index
      %72 = vector.load %arg2[%c8, %c0_64, %c0_65] : memref<9x128x256xbf16, #tpu.memory_space<vmem>>, vector<1x128x256xbf16>
      %73 = vector.shape_cast %72 : vector<1x128x256xbf16> to vector<128x256xbf16>
      %cst_66 = arith.constant dense<0.000000e+00> : vector<4x256xf32>
      %74 = tpu.matmul %71, %73, %cst_66 {dimension_numbers = #tpu.dot_dimension_numbers<[1], [0], [0], [1], [0, 0, 1, 1], [], []>} : vector<4x128xbf16>, vector<128x256xbf16>, vector<4x256xf32> -> vector<4x256xf32>
      %75 = arith.addf %67, %74 : vector<4x256xf32>
      %76 = vector.broadcast %0 : vector<1x256xf32> to vector<4x256xf32>
      %77 = arith.addf %75, %76 : vector<4x256xf32>
      %cst_67 = arith.constant 0.000000e+00 : f32
      %78 = vector.broadcast %cst_67 : f32 to vector<4x256xf32>
      %79 = arith.maximumf %77, %78 : vector<4x256xf32>
      %c2_i32_68 = arith.constant 2 : i32
      %80 = arith.muli %c2_i32_68, %arg5 : i32
      %c1_i32_69 = arith.constant 1 : i32
      %81 = arith.addi %80, %c1_i32_69 : i32
      %cst_70 = arith.constant 0.000000e+00 : f32
      %82 = vector.broadcast %cst_70 : f32 to vector<4x256xf32>
      %c0_i32_71 = arith.constant 0 : i32
      %83 = arith.addi %81, %c0_i32_71 : i32
      %c0_72 = arith.constant 0 : index
      %84 = arith.index_cast %83 : i32 to index
      %c0_73 = arith.constant 0 : index
      %c0_74 = arith.constant 0 : index
      %85 = vector.load %arg1[%c0_72, %84, %c0_73, %c0_74] : memref<1x6x6x128xbf16, #tpu.memory_space<vmem>>, vector<1x1x4x128xbf16>
      %86 = vector.shape_cast %85 : vector<1x1x4x128xbf16> to vector<4x128xbf16>
      %c0_75 = arith.constant 0 : index
      %c0_76 = arith.constant 0 : index
      %c0_77 = arith.constant 0 : index
      %87 = vector.load %arg2[%c0_75, %c0_76, %c0_77] : memref<9x128x256xbf16, #tpu.memory_space<vmem>>, vector<1x128x256xbf16>
      %88 = vector.shape_cast %87 : vector<1x128x256xbf16> to vector<128x256xbf16>
      %cst_78 = arith.constant dense<0.000000e+00> : vector<4x256xf32>
      %89 = tpu.matmul %86, %88, %cst_78 {dimension_numbers = #tpu.dot_dimension_numbers<[1], [0], [0], [1], [0, 0, 1, 1], [], []>} : vector<4x128xbf16>, vector<128x256xbf16>, vector<4x256xf32> -> vector<4x256xf32>
      %90 = arith.addf %82, %89 : vector<4x256xf32>
      %c0_i32_79 = arith.constant 0 : i32
      %91 = arith.addi %81, %c0_i32_79 : i32
      %c0_80 = arith.constant 0 : index
      %92 = arith.index_cast %91 : i32 to index
      %c1_81 = arith.constant 1 : index
      %c0_82 = arith.constant 0 : index
      %93 = vector.load %arg1[%c0_80, %92, %c1_81, %c0_82] : memref<1x6x6x128xbf16, #tpu.memory_space<vmem>>, vector<1x1x4x128xbf16>
      %94 = vector.shape_cast %93 : vector<1x1x4x128xbf16> to vector<4x128xbf16>
      %c1_83 = arith.constant 1 : index
      %c0_84 = arith.constant 0 : index
      %c0_85 = arith.constant 0 : index
      %95 = vector.load %arg2[%c1_83, %c0_84, %c0_85] : memref<9x128x256xbf16, #tpu.memory_space<vmem>>, vector<1x128x256xbf16>
      %96 = vector.shape_cast %95 : vector<1x128x256xbf16> to vector<128x256xbf16>
      %cst_86 = arith.constant dense<0.000000e+00> : vector<4x256xf32>
      %97 = tpu.matmul %94, %96, %cst_86 {dimension_numbers = #tpu.dot_dimension_numbers<[1], [0], [0], [1], [0, 0, 1, 1], [], []>} : vector<4x128xbf16>, vector<128x256xbf16>, vector<4x256xf32> -> vector<4x256xf32>
      %98 = arith.addf %90, %97 : vector<4x256xf32>
      %c0_i32_87 = arith.constant 0 : i32
      %99 = arith.addi %81, %c0_i32_87 : i32
      %c0_88 = arith.constant 0 : index
      %100 = arith.index_cast %99 : i32 to index
      %c2_89 = arith.constant 2 : index
      %c0_90 = arith.constant 0 : index
      %101 = vector.load %arg1[%c0_88, %100, %c2_89, %c0_90] : memref<1x6x6x128xbf16, #tpu.memory_space<vmem>>, vector<1x1x4x128xbf16>
      %102 = vector.shape_cast %101 : vector<1x1x4x128xbf16> to vector<4x128xbf16>
      %c2_91 = arith.constant 2 : index
      %c0_92 = arith.constant 0 : index
      %c0_93 = arith.constant 0 : index
      %103 = vector.load %arg2[%c2_91, %c0_92, %c0_93] : memref<9x128x256xbf16, #tpu.memory_space<vmem>>, vector<1x128x256xbf16>
      %104 = vector.shape_cast %103 : vector<1x128x256xbf16> to vector<128x256xbf16>
      %cst_94 = arith.constant dense<0.000000e+00> : vector<4x256xf32>
      %105 = tpu.matmul %102, %104, %cst_94 {dimension_numbers = #tpu.dot_dimension_numbers<[1], [0], [0], [1], [0, 0, 1, 1], [], []>} : vector<4x128xbf16>, vector<128x256xbf16>, vector<4x256xf32> -> vector<4x256xf32>
      %106 = arith.addf %98, %105 : vector<4x256xf32>
      %c1_i32_95 = arith.constant 1 : i32
      %107 = arith.addi %81, %c1_i32_95 : i32
      %c0_96 = arith.constant 0 : index
      %108 = arith.index_cast %107 : i32 to index
      %c0_97 = arith.constant 0 : index
      %c0_98 = arith.constant 0 : index
      %109 = vector.load %arg1[%c0_96, %108, %c0_97, %c0_98] : memref<1x6x6x128xbf16, #tpu.memory_space<vmem>>, vector<1x1x4x128xbf16>
      %110 = vector.shape_cast %109 : vector<1x1x4x128xbf16> to vector<4x128xbf16>
      %c3_99 = arith.constant 3 : index
      %c0_100 = arith.constant 0 : index
      %c0_101 = arith.constant 0 : index
      %111 = vector.load %arg2[%c3_99, %c0_100, %c0_101] : memref<9x128x256xbf16, #tpu.memory_space<vmem>>, vector<1x128x256xbf16>
      %112 = vector.shape_cast %111 : vector<1x128x256xbf16> to vector<128x256xbf16>
      %cst_102 = arith.constant dense<0.000000e+00> : vector<4x256xf32>
      %113 = tpu.matmul %110, %112, %cst_102 {dimension_numbers = #tpu.dot_dimension_numbers<[1], [0], [0], [1], [0, 0, 1, 1], [], []>} : vector<4x128xbf16>, vector<128x256xbf16>, vector<4x256xf32> -> vector<4x256xf32>
      %114 = arith.addf %106, %113 : vector<4x256xf32>
      %c1_i32_103 = arith.constant 1 : i32
      %115 = arith.addi %81, %c1_i32_103 : i32
      %c0_104 = arith.constant 0 : index
      %116 = arith.index_cast %115 : i32 to index
      %c1_105 = arith.constant 1 : index
      %c0_106 = arith.constant 0 : index
      %117 = vector.load %arg1[%c0_104, %116, %c1_105, %c0_106] : memref<1x6x6x128xbf16, #tpu.memory_space<vmem>>, vector<1x1x4x128xbf16>
      %118 = vector.shape_cast %117 : vector<1x1x4x128xbf16> to vector<4x128xbf16>
      %c4_107 = arith.constant 4 : index
      %c0_108 = arith.constant 0 : index
      %c0_109 = arith.constant 0 : index
      %119 = vector.load %arg2[%c4_107, %c0_108, %c0_109] : memref<9x128x256xbf16, #tpu.memory_space<vmem>>, vector<1x128x256xbf16>
      %120 = vector.shape_cast %119 : vector<1x128x256xbf16> to vector<128x256xbf16>
      %cst_110 = arith.constant dense<0.000000e+00> : vector<4x256xf32>
      %121 = tpu.matmul %118, %120, %cst_110 {dimension_numbers = #tpu.dot_dimension_numbers<[1], [0], [0], [1], [0, 0, 1, 1], [], []>} : vector<4x128xbf16>, vector<128x256xbf16>, vector<4x256xf32> -> vector<4x256xf32>
      %122 = arith.addf %114, %121 : vector<4x256xf32>
      %c1_i32_111 = arith.constant 1 : i32
      %123 = arith.addi %81, %c1_i32_111 : i32
      %c0_112 = arith.constant 0 : index
      %124 = arith.index_cast %123 : i32 to index
      %c2_113 = arith.constant 2 : index
      %c0_114 = arith.constant 0 : index
      %125 = vector.load %arg1[%c0_112, %124, %c2_113, %c0_114] : memref<1x6x6x128xbf16, #tpu.memory_space<vmem>>, vector<1x1x4x128xbf16>
      %126 = vector.shape_cast %125 : vector<1x1x4x128xbf16> to vector<4x128xbf16>
      %c5_115 = arith.constant 5 : index
      %c0_116 = arith.constant 0 : index
      %c0_117 = arith.constant 0 : index
      %127 = vector.load %arg2[%c5_115, %c0_116, %c0_117] : memref<9x128x256xbf16, #tpu.memory_space<vmem>>, vector<1x128x256xbf16>
      %128 = vector.shape_cast %127 : vector<1x128x256xbf16> to vector<128x256xbf16>
      %cst_118 = arith.constant dense<0.000000e+00> : vector<4x256xf32>
      %129 = tpu.matmul %126, %128, %cst_118 {dimension_numbers = #tpu.dot_dimension_numbers<[1], [0], [0], [1], [0, 0, 1, 1], [], []>} : vector<4x128xbf16>, vector<128x256xbf16>, vector<4x256xf32> -> vector<4x256xf32>
      %130 = arith.addf %122, %129 : vector<4x256xf32>
      %c2_i32_119 = arith.constant 2 : i32
      %131 = arith.addi %81, %c2_i32_119 : i32
      %c0_120 = arith.constant 0 : index
      %132 = arith.index_cast %131 : i32 to index
      %c0_121 = arith.constant 0 : index
      %c0_122 = arith.constant 0 : index
      %133 = vector.load %arg1[%c0_120, %132, %c0_121, %c0_122] : memref<1x6x6x128xbf16, #tpu.memory_space<vmem>>, vector<1x1x4x128xbf16>
      %134 = vector.shape_cast %133 : vector<1x1x4x128xbf16> to vector<4x128xbf16>
      %c6_123 = arith.constant 6 : index
      %c0_124 = arith.constant 0 : index
      %c0_125 = arith.constant 0 : index
      %135 = vector.load %arg2[%c6_123, %c0_124, %c0_125] : memref<9x128x256xbf16, #tpu.memory_space<vmem>>, vector<1x128x256xbf16>
      %136 = vector.shape_cast %135 : vector<1x128x256xbf16> to vector<128x256xbf16>
      %cst_126 = arith.constant dense<0.000000e+00> : vector<4x256xf32>
      %137 = tpu.matmul %134, %136, %cst_126 {dimension_numbers = #tpu.dot_dimension_numbers<[1], [0], [0], [1], [0, 0, 1, 1], [], []>} : vector<4x128xbf16>, vector<128x256xbf16>, vector<4x256xf32> -> vector<4x256xf32>
      %138 = arith.addf %130, %137 : vector<4x256xf32>
      %c2_i32_127 = arith.constant 2 : i32
      %139 = arith.addi %81, %c2_i32_127 : i32
      %c0_128 = arith.constant 0 : index
      %140 = arith.index_cast %139 : i32 to index
      %c1_129 = arith.constant 1 : index
      %c0_130 = arith.constant 0 : index
      %141 = vector.load %arg1[%c0_128, %140, %c1_129, %c0_130] : memref<1x6x6x128xbf16, #tpu.memory_space<vmem>>, vector<1x1x4x128xbf16>
      %142 = vector.shape_cast %141 : vector<1x1x4x128xbf16> to vector<4x128xbf16>
      %c7_131 = arith.constant 7 : index
      %c0_132 = arith.constant 0 : index
      %c0_133 = arith.constant 0 : index
      %143 = vector.load %arg2[%c7_131, %c0_132, %c0_133] : memref<9x128x256xbf16, #tpu.memory_space<vmem>>, vector<1x128x256xbf16>
      %144 = vector.shape_cast %143 : vector<1x128x256xbf16> to vector<128x256xbf16>
      %cst_134 = arith.constant dense<0.000000e+00> : vector<4x256xf32>
      %145 = tpu.matmul %142, %144, %cst_134 {dimension_numbers = #tpu.dot_dimension_numbers<[1], [0], [0], [1], [0, 0, 1, 1], [], []>} : vector<4x128xbf16>, vector<128x256xbf16>, vector<4x256xf32> -> vector<4x256xf32>
      %146 = arith.addf %138, %145 : vector<4x256xf32>
      %c2_i32_135 = arith.constant 2 : i32
      %147 = arith.addi %81, %c2_i32_135 : i32
      %c0_136 = arith.constant 0 : index
      %148 = arith.index_cast %147 : i32 to index
      %c2_137 = arith.constant 2 : index
      %c0_138 = arith.constant 0 : index
      %149 = vector.load %arg1[%c0_136, %148, %c2_137, %c0_138] : memref<1x6x6x128xbf16, #tpu.memory_space<vmem>>, vector<1x1x4x128xbf16>
      %150 = vector.shape_cast %149 : vector<1x1x4x128xbf16> to vector<4x128xbf16>
      %c8_139 = arith.constant 8 : index
      %c0_140 = arith.constant 0 : index
      %c0_141 = arith.constant 0 : index
      %151 = vector.load %arg2[%c8_139, %c0_140, %c0_141] : memref<9x128x256xbf16, #tpu.memory_space<vmem>>, vector<1x128x256xbf16>
      %152 = vector.shape_cast %151 : vector<1x128x256xbf16> to vector<128x256xbf16>
      %cst_142 = arith.constant dense<0.000000e+00> : vector<4x256xf32>
      %153 = tpu.matmul %150, %152, %cst_142 {dimension_numbers = #tpu.dot_dimension_numbers<[1], [0], [0], [1], [0, 0, 1, 1], [], []>} : vector<4x128xbf16>, vector<128x256xbf16>, vector<4x256xf32> -> vector<4x256xf32>
      %154 = arith.addf %146, %153 : vector<4x256xf32>
      %155 = vector.broadcast %0 : vector<1x256xf32> to vector<4x256xf32>
      %156 = arith.addf %154, %155 : vector<4x256xf32>
      %cst_143 = arith.constant 0.000000e+00 : f32
      %157 = vector.broadcast %cst_143 : f32 to vector<4x256xf32>
      %158 = arith.maximumf %156, %157 : vector<4x256xf32>
      %159 = arith.maximumf %79, %158 : vector<4x256xf32>
      %160 = vector.shape_cast %159 : vector<4x256xf32> to vector<2x2x256xf32>
      %cst_144 = arith.constant dense<0xFF800000> : vector<2x256xf32>
      %161 = vector.multi_reduction <maximumf>, %160, %cst_144 [1] : vector<2x2x256xf32> to vector<2x256xf32>
      %162 = arith.truncf %161 : vector<2x256xf32> to vector<2x256xbf16>
      %c0_145 = arith.constant 0 : index
      %163 = arith.index_cast %arg5 : i32 to index
      %c0_146 = arith.constant 0 : index
      %c0_147 = arith.constant 0 : index
      %164 = vector.load %arg4[%c0_145, %163, %c0_146, %c0_147] : memref<1x2x2x256xbf16, #tpu.memory_space<vmem>>, vector<1x1x2x256xbf16>
      %165 = vector.shape_cast %164 : vector<1x1x2x256xbf16> to vector<2x256xbf16>
      %166 = vector.shape_cast %162 : vector<2x256xbf16> to vector<1x1x2x256xbf16>
      tpu.vector_store %arg4[%c0_145, %163, %c0_146, %c0_147], %166 {strides = array<i32>} : memref<1x2x2x256xbf16, #tpu.memory_space<vmem>>, vector<1x1x2x256xbf16>,
    }
    %c2_i32_1 = arith.constant 2 : i32
    return
  }
  func.func @transform_0(%arg0: i32) -> (i32, i32, i32, i32) {
    %c0_i32 = arith.constant 0 : i32
    %c0_i32_0 = arith.constant 0 : i32
    %c0_i32_1 = arith.constant 0 : i32
    %c0_i32_2 = arith.constant 0 : i32
    return %arg0, %c0_i32, %c0_i32_0, %c0_i32_1 : i32, i32, i32, i32
  }
  func.func @transform_1(%arg0: i32) -> (i32, i32, i32) {
    %c0_i32 = arith.constant 0 : i32
    %c0_i32_0 = arith.constant 0 : i32
    %c0_i32_1 = arith.constant 0 : i32
    %c0_i32_2 = arith.constant 0 : i32
    return %c0_i32, %c0_i32_0, %c0_i32_1 : i32, i32, i32
  }
  func.func @transform_2(%arg0: i32) -> (i32, i32) {
    %c0_i32 = arith.constant 0 : i32
    %c0_i32_0 = arith.constant 0 : i32
    %c0_i32_1 = arith.constant 0 : i32
    return %c0_i32, %c0_i32_0 : i32, i32
  }
  func.func @transform_3(%arg0: i32) -> (i32, i32, i32, i32) {
    %c0_i32 = arith.constant 0 : i32
    %c0_i32_0 = arith.constant 0 : i32
    %c0_i32_1 = arith.constant 0 : i32
    %c0_i32_2 = arith.constant 0 : i32
    return %arg0, %c0_i32, %c0_i32_0, %c0_i32_1 : i32, i32, i32, i32
  }
}

module attributes {stable_mosaic.version = 11 : i64} {
  func.func @_mean_h_kernel(%arg0: i32, %arg1: memref<1x2x2x256xbf16, #tpu.memory_space<vmem>>, %arg2: memref<1x2x256xbf16, #tpu.memory_space<vmem>>) attributes {dimension_semantics = [#tpu.dimension_semantics<parallel>], iteration_bounds = array<i64: 2>, scalar_prefetch = 0 : i64, scratch_operands = 0 : i64, tpu.core_type = #tpu.core_type<tc>, window_params = [{transform_indices = @transform_0, window_bounds = array<i64: 1, 2, 2, 256>}, {transform_indices = @transform_1, window_bounds = array<i64: 1, 2, 256>}]} {
    %c0 = arith.constant 0 : index
    %c0_0 = arith.constant 0 : index
    %c0_1 = arith.constant 0 : index
    %c0_2 = arith.constant 0 : index
    %0 = vector.load %arg1[%c0, %c0_0, %c0_1, %c0_2] : memref<1x2x2x256xbf16, #tpu.memory_space<vmem>>, vector<1x2x2x256xbf16>
    %1 = vector.shape_cast %0 : vector<1x2x2x256xbf16> to vector<2x2x256xbf16>
    %2 = arith.extf %1 : vector<2x2x256xbf16> to vector<2x2x256xf32>
    %cst = arith.constant dense<0.000000e+00> : vector<2x256xf32>
    %3 = vector.multi_reduction <add>, %2, %cst [0] : vector<2x2x256xf32> to vector<2x256xf32>
    %cst_3 = arith.constant 5.000000e-01 : f32
    %4 = vector.broadcast %cst_3 : f32 to vector<2x256xf32>
    %5 = arith.mulf %3, %4 : vector<2x256xf32>
    %6 = arith.truncf %5 : vector<2x256xf32> to vector<2x256xbf16>
    %c0_4 = arith.constant 0 : index
    %c0_5 = arith.constant 0 : index
    %c0_6 = arith.constant 0 : index
    %7 = vector.load %arg2[%c0_4, %c0_5, %c0_6] : memref<1x2x256xbf16, #tpu.memory_space<vmem>>, vector<1x2x256xbf16>
    %8 = vector.shape_cast %7 : vector<1x2x256xbf16> to vector<2x256xbf16>
    %9 = vector.shape_cast %6 : vector<2x256xbf16> to vector<1x2x256xbf16>
    tpu.vector_store %arg2[%c0_4, %c0_5, %c0_6], %9 {strides = array<i32>} : memref<1x2x256xbf16, #tpu.memory_space<vmem>>, vector<1x2x256xbf16>,
    return
  }
  func.func @transform_0(%arg0: i32) -> (i32, i32, i32, i32) {
    %c0_i32 = arith.constant 0 : i32
    %c0_i32_0 = arith.constant 0 : i32
    %c0_i32_1 = arith.constant 0 : i32
    %c0_i32_2 = arith.constant 0 : i32
    return %arg0, %c0_i32, %c0_i32_0, %c0_i32_1 : i32, i32, i32, i32
  }
  func.func @transform_1(%arg0: i32) -> (i32, i32, i32) {
    %c0_i32 = arith.constant 0 : i32
    %c0_i32_0 = arith.constant 0 : i32
    %c0_i32_1 = arith.constant 0 : i32
    return %arg0, %c0_i32, %c0_i32_0 : i32, i32, i32
  }
}

module attributes {stable_mosaic.version = 11 : i64} {
  func.func @_matmul_bias_kernel(%arg0: i32, %arg1: memref<16x256xbf16, #tpu.memory_space<vmem>>, %arg2: memref<256x128xbf16, #tpu.memory_space<vmem>>, %arg3: memref<1x128xf32, #tpu.memory_space<vmem>>, %arg4: memref<16x128xf32, #tpu.memory_space<vmem>>) attributes {dimension_semantics = [#tpu.dimension_semantics<parallel>], iteration_bounds = array<i64: 1>, scalar_prefetch = 0 : i64, scratch_operands = 0 : i64, tpu.core_type = #tpu.core_type<tc>, window_params = [{transform_indices = @transform_0, window_bounds = array<i64: 16, 256>}, {pipeline_mode = #tpu.pipeline_mode<synchronous>, transform_indices = @transform_1, window_bounds = array<i64: 256, 128>}, {pipeline_mode = #tpu.pipeline_mode<synchronous>, transform_indices = @transform_2, window_bounds = array<i64: 1, 128>}, {transform_indices = @transform_3, window_bounds = array<i64: 16, 128>}]} {
    %c0 = arith.constant 0 : index
    %c0_0 = arith.constant 0 : index
    %0 = vector.load %arg1[%c0, %c0_0] : memref<16x256xbf16, #tpu.memory_space<vmem>>, vector<16x256xbf16>
    %c0_1 = arith.constant 0 : index
    %c0_2 = arith.constant 0 : index
    %1 = vector.load %arg2[%c0_1, %c0_2] : memref<256x128xbf16, #tpu.memory_space<vmem>>, vector<256x128xbf16>
    %cst = arith.constant dense<0.000000e+00> : vector<16x128xf32>
    %2 = tpu.matmul %0, %1, %cst {dimension_numbers = #tpu.dot_dimension_numbers<[1], [0], [0], [1], [0, 0, 1, 1], [], []>} : vector<16x256xbf16>, vector<256x128xbf16>, vector<16x128xf32> -> vector<16x128xf32>
    %c0_3 = arith.constant 0 : index
    %c0_4 = arith.constant 0 : index
    %3 = vector.load %arg3[%c0_3, %c0_4] : memref<1x128xf32, #tpu.memory_space<vmem>>, vector<1x128xf32>
    %4 = vector.broadcast %3 : vector<1x128xf32> to vector<16x128xf32>
    %5 = arith.addf %2, %4 : vector<16x128xf32>
    %c0_5 = arith.constant 0 : index
    %c0_6 = arith.constant 0 : index
    %6 = vector.load %arg4[%c0_5, %c0_6] : memref<16x128xf32, #tpu.memory_space<vmem>>, vector<16x128xf32>
    tpu.vector_store %arg4[%c0_5, %c0_6], %5 {strides = array<i32>} : memref<16x128xf32, #tpu.memory_space<vmem>>, vector<16x128xf32>,
    return
  }
  func.func @transform_0(%arg0: i32) -> (i32, i32) {
    %c0_i32 = arith.constant 0 : i32
    %c0_i32_0 = arith.constant 0 : i32
    return %arg0, %c0_i32 : i32, i32
  }
  func.func @transform_1(%arg0: i32) -> (i32, i32) {
    %c0_i32 = arith.constant 0 : i32
    %c0_i32_0 = arith.constant 0 : i32
    %c0_i32_1 = arith.constant 0 : i32
    return %c0_i32, %c0_i32_0 : i32, i32
  }
  func.func @transform_2(%arg0: i32) -> (i32, i32) {
    %c0_i32 = arith.constant 0 : i32
    %c0_i32_0 = arith.constant 0 : i32
    %c0_i32_1 = arith.constant 0 : i32
    return %c0_i32, %c0_i32_0 : i32, i32
  }
  func.func @transform_3(%arg0: i32) -> (i32, i32) {
    %c0_i32 = arith.constant 0 : i32
    %c0_i32_0 = arith.constant 0 : i32
    return %arg0, %c0_i32 : i32, i32
  }
}

module attributes {stable_mosaic.version = 11 : i64} {
  func.func @_lstm_seq_kernel(%arg0: i32, %arg1: i32, %arg2: memref<1x2x8x128xf32, #tpu.memory_space<vmem>>, %arg3: memref<1x32x128xbf16, #tpu.memory_space<vmem>>, %arg4: memref<1x2x8x32xbf16, #tpu.memory_space<vmem>>, %arg5: memref<8x32xf32, #tpu.memory_space<vmem>>, %arg6: memref<8x32xf32, #tpu.memory_space<vmem>>) attributes {dimension_semantics = [#tpu.dimension_semantics<parallel>, #tpu.dimension_semantics<arbitrary>], iteration_bounds = array<i64: 2, 1>, scalar_prefetch = 0 : i64, scratch_operands = 2 : i64, tpu.core_type = #tpu.core_type<tc>, window_params = [{transform_indices = @transform_0, window_bounds = array<i64: 1, 2, 8, 128>}, {transform_indices = @transform_1, window_bounds = array<i64: 1, 32, 128>}, {transform_indices = @transform_2, window_bounds = array<i64: 1, 2, 8, 32>}]} {
    %c0_i32 = arith.constant 0 : i32
    %0 = arith.cmpi eq, %arg1, %c0_i32 : i32
    %1 = arith.extui %0 : i1 to i32
    %c0_i32_0 = arith.constant 0 : i32
    %2 = arith.cmpi ne, %1, %c0_i32_0 : i32
    scf.if %2 {
      %cst = arith.constant 0.000000e+00 : f32
      %11 = vector.broadcast %cst : f32 to vector<8x32xf32>
      %c0_13 = arith.constant 0 : index
      %c0_14 = arith.constant 0 : index
      %12 = vector.load %arg5[%c0_13, %c0_14] : memref<8x32xf32, #tpu.memory_space<vmem>>, vector<8x32xf32>
      tpu.vector_store %arg5[%c0_13, %c0_14], %11 {strides = array<i32>} : memref<8x32xf32, #tpu.memory_space<vmem>>, vector<8x32xf32>,
      %cst_15 = arith.constant 0.000000e+00 : f32
      %13 = vector.broadcast %cst_15 : f32 to vector<8x32xf32>
      %c0_16 = arith.constant 0 : index
      %c0_17 = arith.constant 0 : index
      %14 = vector.load %arg6[%c0_16, %c0_17] : memref<8x32xf32, #tpu.memory_space<vmem>>, vector<8x32xf32>
      tpu.vector_store %arg6[%c0_16, %c0_17], %13 {strides = array<i32>} : memref<8x32xf32, #tpu.memory_space<vmem>>, vector<8x32xf32>,
    } else {
    }
    %c0 = arith.constant 0 : index
    %c0_1 = arith.constant 0 : index
    %c0_2 = arith.constant 0 : index
    %3 = vector.load %arg3[%c0, %c0_1, %c0_2] : memref<1x32x128xbf16, #tpu.memory_space<vmem>>, vector<1x32x128xbf16>
    %4 = vector.shape_cast %3 : vector<1x32x128xbf16> to vector<32x128xbf16>
    %c0_3 = arith.constant 0 : index
    %c0_4 = arith.constant 0 : index
    %5 = vector.load %arg5[%c0_3, %c0_4] : memref<8x32xf32, #tpu.memory_space<vmem>>, vector<8x32xf32>
    %c0_5 = arith.constant 0 : index
    %c0_6 = arith.constant 0 : index
    %6 = vector.load %arg6[%c0_5, %c0_6] : memref<8x32xf32, #tpu.memory_space<vmem>>, vector<8x32xf32>
    %c0_i32_7 = arith.constant 0 : i32
    %c2_i32 = arith.constant 2 : i32
    %7 = arith.addi %c0_i32_7, %c2_i32 : i32
    %c1_i32 = arith.constant 1 : i32
    %8:2 = scf.for %arg7 = %c0_i32_7 to %7 step %c1_i32 iter_args(%arg8 = %5, %arg9 = %6) -> (vector<8x32xf32>, vector<8x32xf32>)  : i32 {
      %c0_i32_13 = arith.constant 0 : i32
      %11 = arith.cmpi eq, %arg0, %c0_i32_13 : i32
      %c1_i32_14 = arith.constant 1 : i32
      %12 = arith.subi %c1_i32_14, %arg7 : i32
      %13 = arith.select %11, %arg7, %12 : i32
      %c0_15 = arith.constant 0 : index
      %14 = arith.index_cast %13 : i32 to index
      %c0_16 = arith.constant 0 : index
      %c0_17 = arith.constant 0 : index
      %15 = vector.load %arg2[%c0_15, %14, %c0_16, %c0_17] : memref<1x2x8x128xf32, #tpu.memory_space<vmem>>, vector<1x1x8x128xf32>
      %16 = vector.shape_cast %15 : vector<1x1x8x128xf32> to vector<8x128xf32>
      %17 = arith.truncf %arg8 : vector<8x32xf32> to vector<8x32xbf16>
      %cst = arith.constant dense<0.000000e+00> : vector<8x128xf32>
      %18 = tpu.matmul %17, %4, %cst {dimension_numbers = #tpu.dot_dimension_numbers<[1], [0], [0], [1], [0, 0, 1, 1], [], []>} : vector<8x32xbf16>, vector<32x128xbf16>, vector<8x128xf32> -> vector<8x128xf32>
      %19 = arith.addf %16, %18 : vector<8x128xf32>
      %20 = vector.extract_strided_slice %19 {offsets = [0, 0], sizes = [8, 32], strides = [1, 1]} : vector<8x128xf32> to vector<8x32xf32>
      %21 = arith.negf %20 : vector<8x32xf32>
      %22 = math.exp %21 : vector<8x32xf32>
      %cst_18 = arith.constant 1.000000e+00 : f32
      %23 = vector.broadcast %cst_18 : f32 to vector<8x32xf32>
      %24 = arith.addf %23, %22 : vector<8x32xf32>
      %25 = arith.divf %23, %24 : vector<8x32xf32>
      %26 = vector.extract_strided_slice %19 {offsets = [0, 32], sizes = [8, 32], strides = [1, 1]} : vector<8x128xf32> to vector<8x32xf32>
      %27 = arith.negf %26 : vector<8x32xf32>
      %28 = math.exp %27 : vector<8x32xf32>
      %cst_19 = arith.constant 1.000000e+00 : f32
      %29 = vector.broadcast %cst_19 : f32 to vector<8x32xf32>
      %30 = arith.addf %29, %28 : vector<8x32xf32>
      %31 = arith.divf %29, %30 : vector<8x32xf32>
      %32 = vector.extract_strided_slice %19 {offsets = [0, 64], sizes = [8, 32], strides = [1, 1]} : vector<8x128xf32> to vector<8x32xf32>
      %33 = math.tanh %32 : vector<8x32xf32>
      %34 = vector.extract_strided_slice %19 {offsets = [0, 96], sizes = [8, 32], strides = [1, 1]} : vector<8x128xf32> to vector<8x32xf32>
      %35 = arith.negf %34 : vector<8x32xf32>
      %36 = math.exp %35 : vector<8x32xf32>
      %cst_20 = arith.constant 1.000000e+00 : f32
      %37 = vector.broadcast %cst_20 : f32 to vector<8x32xf32>
      %38 = arith.addf %37, %36 : vector<8x32xf32>
      %39 = arith.divf %37, %38 : vector<8x32xf32>
      %40 = arith.mulf %31, %arg9 : vector<8x32xf32>
      %41 = arith.mulf %25, %33 : vector<8x32xf32>
      %42 = arith.addf %40, %41 : vector<8x32xf32>
      %43 = math.tanh %42 : vector<8x32xf32>
      %44 = arith.mulf %39, %43 : vector<8x32xf32>
      %45 = arith.truncf %44 : vector<8x32xf32> to vector<8x32xbf16>
      %c0_21 = arith.constant 0 : index
      %46 = arith.index_cast %13 : i32 to index
      %c0_22 = arith.constant 0 : index
      %c0_23 = arith.constant 0 : index
      %47 = vector.load %arg4[%c0_21, %46, %c0_22, %c0_23] : memref<1x2x8x32xbf16, #tpu.memory_space<vmem>>, vector<1x1x8x32xbf16>
      %48 = vector.shape_cast %47 : vector<1x1x8x32xbf16> to vector<8x32xbf16>
      %49 = vector.shape_cast %45 : vector<8x32xbf16> to vector<1x1x8x32xbf16>
      tpu.vector_store %arg4[%c0_21, %46, %c0_22, %c0_23], %49 {strides = array<i32>} : memref<1x2x8x32xbf16, #tpu.memory_space<vmem>>, vector<1x1x8x32xbf16>,
      scf.yield %44, %42 : vector<8x32xf32>, vector<8x32xf32>
    }
    %c2_i32_8 = arith.constant 2 : i32
    %c0_9 = arith.constant 0 : index
    %c0_10 = arith.constant 0 : index
    %9 = vector.load %arg5[%c0_9, %c0_10] : memref<8x32xf32, #tpu.memory_space<vmem>>, vector<8x32xf32>
    tpu.vector_store %arg5[%c0_9, %c0_10], %8#0 {strides = array<i32>} : memref<8x32xf32, #tpu.memory_space<vmem>>, vector<8x32xf32>,
    %c0_11 = arith.constant 0 : index
    %c0_12 = arith.constant 0 : index
    %10 = vector.load %arg6[%c0_11, %c0_12] : memref<8x32xf32, #tpu.memory_space<vmem>>, vector<8x32xf32>
    tpu.vector_store %arg6[%c0_11, %c0_12], %8#1 {strides = array<i32>} : memref<8x32xf32, #tpu.memory_space<vmem>>, vector<8x32xf32>,
    return
  }
  func.func @transform_0(%arg0: i32, %arg1: i32) -> (i32, i32, i32, i32) {
    %c1_i32 = arith.constant 1 : i32
    %0 = arith.subi %c1_i32, %arg0 : i32
    %1 = arith.muli %0, %arg1 : i32
    %c0_i32 = arith.constant 0 : i32
    %2 = arith.subi %c0_i32, %arg1 : i32
    %3 = arith.muli %arg0, %2 : i32
    %4 = arith.addi %1, %3 : i32
    %c0_i32_0 = arith.constant 0 : i32
    %c0_i32_1 = arith.constant 0 : i32
    %c0_i32_2 = arith.constant 0 : i32
    return %arg0, %4, %c0_i32_0, %c0_i32_1 : i32, i32, i32, i32
  }
  func.func @transform_1(%arg0: i32, %arg1: i32) -> (i32, i32, i32) {
    %c0_i32 = arith.constant 0 : i32
    %c0_i32_0 = arith.constant 0 : i32
    %c0_i32_1 = arith.constant 0 : i32
    return %arg0, %c0_i32, %c0_i32_0 : i32, i32, i32
  }
  func.func @transform_2(%arg0: i32, %arg1: i32) -> (i32, i32, i32, i32) {
    %c1_i32 = arith.constant 1 : i32
    %0 = arith.subi %c1_i32, %arg0 : i32
    %1 = arith.muli %0, %arg1 : i32
    %c0_i32 = arith.constant 0 : i32
    %2 = arith.subi %c0_i32, %arg1 : i32
    %3 = arith.muli %arg0, %2 : i32
    %4 = arith.addi %1, %3 : i32
    %c0_i32_0 = arith.constant 0 : i32
    %c0_i32_1 = arith.constant 0 : i32
    %c0_i32_2 = arith.constant 0 : i32
    return %arg0, %4, %c0_i32_0, %c0_i32_1 : i32, i32, i32, i32
  }
}

module attributes {stable_mosaic.version = 11 : i64} {
  func.func @_matmul_bias_kernel(%arg0: i32, %arg1: memref<16x64xbf16, #tpu.memory_space<vmem>>, %arg2: memref<64x128xbf16, #tpu.memory_space<vmem>>, %arg3: memref<1x128xf32, #tpu.memory_space<vmem>>, %arg4: memref<16x128xf32, #tpu.memory_space<vmem>>) attributes {dimension_semantics = [#tpu.dimension_semantics<parallel>], iteration_bounds = array<i64: 1>, scalar_prefetch = 0 : i64, scratch_operands = 0 : i64, tpu.core_type = #tpu.core_type<tc>, window_params = [{transform_indices = @transform_0, window_bounds = array<i64: 16, 64>}, {pipeline_mode = #tpu.pipeline_mode<synchronous>, transform_indices = @transform_1, window_bounds = array<i64: 64, 128>}, {pipeline_mode = #tpu.pipeline_mode<synchronous>, transform_indices = @transform_2, window_bounds = array<i64: 1, 128>}, {transform_indices = @transform_3, window_bounds = array<i64: 16, 128>}]} {
    %c0 = arith.constant 0 : index
    %c0_0 = arith.constant 0 : index
    %0 = vector.load %arg1[%c0, %c0_0] : memref<16x64xbf16, #tpu.memory_space<vmem>>, vector<16x64xbf16>
    %c0_1 = arith.constant 0 : index
    %c0_2 = arith.constant 0 : index
    %1 = vector.load %arg2[%c0_1, %c0_2] : memref<64x128xbf16, #tpu.memory_space<vmem>>, vector<64x128xbf16>
    %cst = arith.constant dense<0.000000e+00> : vector<16x128xf32>
    %2 = tpu.matmul %0, %1, %cst {dimension_numbers = #tpu.dot_dimension_numbers<[1], [0], [0], [1], [0, 0, 1, 1], [], []>} : vector<16x64xbf16>, vector<64x128xbf16>, vector<16x128xf32> -> vector<16x128xf32>
    %c0_3 = arith.constant 0 : index
    %c0_4 = arith.constant 0 : index
    %3 = vector.load %arg3[%c0_3, %c0_4] : memref<1x128xf32, #tpu.memory_space<vmem>>, vector<1x128xf32>
    %4 = vector.broadcast %3 : vector<1x128xf32> to vector<16x128xf32>
    %5 = arith.addf %2, %4 : vector<16x128xf32>
    %c0_5 = arith.constant 0 : index
    %c0_6 = arith.constant 0 : index
    %6 = vector.load %arg4[%c0_5, %c0_6] : memref<16x128xf32, #tpu.memory_space<vmem>>, vector<16x128xf32>
    tpu.vector_store %arg4[%c0_5, %c0_6], %5 {strides = array<i32>} : memref<16x128xf32, #tpu.memory_space<vmem>>, vector<16x128xf32>,
    return
  }
  func.func @transform_0(%arg0: i32) -> (i32, i32) {
    %c0_i32 = arith.constant 0 : i32
    %c0_i32_0 = arith.constant 0 : i32
    return %arg0, %c0_i32 : i32, i32
  }
  func.func @transform_1(%arg0: i32) -> (i32, i32) {
    %c0_i32 = arith.constant 0 : i32
    %c0_i32_0 = arith.constant 0 : i32
    %c0_i32_1 = arith.constant 0 : i32
    return %c0_i32, %c0_i32_0 : i32, i32
  }
  func.func @transform_2(%arg0: i32) -> (i32, i32) {
    %c0_i32 = arith.constant 0 : i32
    %c0_i32_0 = arith.constant 0 : i32
    %c0_i32_1 = arith.constant 0 : i32
    return %c0_i32, %c0_i32_0 : i32, i32
  }
  func.func @transform_3(%arg0: i32) -> (i32, i32) {
    %c0_i32 = arith.constant 0 : i32
    %c0_i32_0 = arith.constant 0 : i32
    return %arg0, %c0_i32 : i32, i32
  }
}

module attributes {stable_mosaic.version = 11 : i64} {
  func.func @_matmul_bias_kernel(%arg0: i32, %arg1: memref<16x64xbf16, #tpu.memory_space<vmem>>, %arg2: memref<64x10xbf16, #tpu.memory_space<vmem>>, %arg3: memref<1x10xf32, #tpu.memory_space<vmem>>, %arg4: memref<16x10xf32, #tpu.memory_space<vmem>>) attributes {dimension_semantics = [#tpu.dimension_semantics<parallel>], iteration_bounds = array<i64: 1>, scalar_prefetch = 0 : i64, scratch_operands = 0 : i64, tpu.core_type = #tpu.core_type<tc>, window_params = [{transform_indices = @transform_0, window_bounds = array<i64: 16, 64>}, {pipeline_mode = #tpu.pipeline_mode<synchronous>, transform_indices = @transform_1, window_bounds = array<i64: 64, 10>}, {pipeline_mode = #tpu.pipeline_mode<synchronous>, transform_indices = @transform_2, window_bounds = array<i64: 1, 10>}, {transform_indices = @transform_3, window_bounds = array<i64: 16, 10>}]} {
    %c0 = arith.constant 0 : index
    %c0_0 = arith.constant 0 : index
    %0 = vector.load %arg1[%c0, %c0_0] : memref<16x64xbf16, #tpu.memory_space<vmem>>, vector<16x64xbf16>
    %c0_1 = arith.constant 0 : index
    %c0_2 = arith.constant 0 : index
    %1 = vector.load %arg2[%c0_1, %c0_2] : memref<64x10xbf16, #tpu.memory_space<vmem>>, vector<64x10xbf16>
    %cst = arith.constant dense<0.000000e+00> : vector<16x10xf32>
    %2 = tpu.matmul %0, %1, %cst {dimension_numbers = #tpu.dot_dimension_numbers<[1], [0], [0], [1], [0, 0, 1, 1], [], []>} : vector<16x64xbf16>, vector<64x10xbf16>, vector<16x10xf32> -> vector<16x10xf32>
    %c0_3 = arith.constant 0 : index
    %c0_4 = arith.constant 0 : index
    %3 = vector.load %arg3[%c0_3, %c0_4] : memref<1x10xf32, #tpu.memory_space<vmem>>, vector<1x10xf32>
    %4 = vector.broadcast %3 : vector<1x10xf32> to vector<16x10xf32>
    %5 = arith.addf %2, %4 : vector<16x10xf32>
    %c0_5 = arith.constant 0 : index
    %c0_6 = arith.constant 0 : index
    %6 = vector.load %arg4[%c0_5, %c0_6] : memref<16x10xf32, #tpu.memory_space<vmem>>, vector<16x10xf32>
    tpu.vector_store %arg4[%c0_5, %c0_6], %5 {strides = array<i32>} : memref<16x10xf32, #tpu.memory_space<vmem>>, vector<16x10xf32>,
    return
  }
  func.func @transform_0(%arg0: i32) -> (i32, i32) {
    %c0_i32 = arith.constant 0 : i32
    %c0_i32_0 = arith.constant 0 : i32
    return %arg0, %c0_i32 : i32, i32
  }
  func.func @transform_1(%arg0: i32) -> (i32, i32) {
    %c0_i32 = arith.constant 0 : i32
    %c0_i32_0 = arith.constant 0 : i32
    %c0_i32_1 = arith.constant 0 : i32
    return %c0_i32, %c0_i32_0 : i32, i32
  }
  func.func @transform_2(%arg0: i32) -> (i32, i32) {
    %c0_i32 = arith.constant 0 : i32
    %c0_i32_0 = arith.constant 0 : i32
    %c0_i32_1 = arith.constant 0 : i32
    return %c0_i32, %c0_i32_0 : i32, i32
  }
  func.func @transform_3(%arg0: i32) -> (i32, i32) {
    %c0_i32 = arith.constant 0 : i32
    %c0_i32_0 = arith.constant 0 : i32
    return %arg0, %c0_i32 : i32, i32
  }
}

</mosaic_0001>

<bundles_post_ra>
// kernel: crnn_forward.14
= control target key start
LH: loop header
LB: loop body
LE: loop exit
PB: predicated region body
PF: predicated region fallthrough
CT: control target
= control target key end

     0   :  { %s262_s6 = smov 0   ;;  %s283_s0 = inlined_call_operand.vmem [shape: bf16[2,2,2,256], index: 0, kind: input, shape index: {}]   ;;  %s284_s1 = inlined_call_operand.vmem [shape: bf16[2,2,256], index: 1, kind: output, shape index: {}]  }
   0x1 LB: > { %s221_s7 = sadd.s32 4294967295, %s248_s6   ;;  %p225_p0 = scmp.ge.s32.totalorder %s248_s6, 1  ;;  %s248_s6 = sphi %s262_s6, %s11_s6  }
   0x2   : > { %p86_p1 = scmp.lt.s32.totalorder %s248_s6, 3 }
   0x4   : > { %p87_p2 = pnand %p225_p0, %p86_p1 }
   0x5   : > { %p104_p3 = scmp.lt.s32.totalorder (!%p87_p2), %s221_s7, 1  ;;  %v121_v0 = vlaneseq (!%p87_p2)  ;;  %v250_v1 = vmov (!%p87_p2), 1983009808   ;;  %vm138_vm0 = vcmask (!%p87_p2), 1041408   ;;  %v251_v10 = vmov (!%p87_p2), 1966171168  }
   0x6   : > { %90 = sbr.rel (%p87_p2) target bundleno = 33 (0x21), region = 24  ;;  %v119_v2 = vunpack.c.l.s4 (!%p87_p2), %v250_v1  ;;  %v153_v11 = vunpack.c.l.s4 (!%p87_p2), %v251_v10 }
   0x7   : > { %v122_v3 = vshrl.u32 (!%p87_p2), %v121_v0, 7 }
   0x8   : > { %v120_v4 = vunpack.c.0.s8 (!%p87_p2), %v119_v2  ;;  %v154_v19 = vunpack.c.0.s8 (!%p87_p2), %v153_v11 }
   0xa   : > { %v123_v5 = vsub.s32 (!%p87_p2), %v120_v4, %v122_v3  ;;  %v157_v25 = vsub.s32 (!%p87_p2), %v154_v19, %v122_v3 }
   0xd   : > { %s286_s7 = smov (!%p104_p3, %s221_s7), 1 }
   0xe   : > { %s226_s8 = sshll.u32 %s286_s7, 2  ;;  %s227_s12 = sshll.u32 %s286_s7, 1 }
   0xf   : > { %s107_s11 = scalar_lea.vmem %s283_s0, %s226_s8  ;;  %s111_s15 = scalar_lea.vmem %s284_s1, %s227_s12 }
  0x10   : > { %v112_v6 = vld [vmem:[%s107_s11] sm:$0x3]  ;;  %v113_v7 = vld [vmem:[%s107_s11 + $0x2] sm:$0x3] }
  0x11   : > { %v114_v8 = vunpack.c.l.bf16 %v112_v6  ;;  %v115_v9 = vunpack.c.l.bf16 %v113_v7 }
  0x13   : > { %v124_v12 = vrot.slane %v114_v8, %v123_v5  ;;  %v132_v13 = vrot.slane %v115_v9, %v123_v5 }
  0x15   : > { %v125_v14 = vcombine.high %v124_v12, %v124_v12  ;;  %v133_v15 = vcombine.high %v132_v13, %v132_v13  ;;  %v139_v16 = vsel %vm138_vm0, %v124_v12, 0.0  ;;  %v140_v17 = vsel %vm138_vm0, %v132_v13, 0.0 }
  0x16   : > { %v141_v18 = vadd.f32 %v140_v17, %v139_v16 }
  0x17   : > { %v142_v20 = vsel %vm138_vm0, %v125_v14, 0.0  ;;  %v143_v21 = vsel %vm138_vm0, %v133_v15, 0.0 }
  0x18   : > { %v144_v22 = vadd.f32 %v143_v21, %v142_v20  ;;  %v145_v23 = vmul.f32 0.5, %v141_v18 }
  0x1a   : > { %v146_v24 = vmul.f32 0.5, %v144_v22 }
  0x1c   : > { %v228_v26 = vpack.c.bf16 %v146_v24, %v145_v23 }
  0x1e   : > { %v158_v27 = vrot.slane %v228_v26, %v157_v25 }
  0x20   : > { %229 = vst.sshfl [vmem:[%s111_s15] sm:$0x5 pattern:$0x73625140] %v158_v27 }
  0x21 PF: > { %s11_s6 = sadd.s32 1, %s248_s6  }
  0x22   : > { %p8_p4 = scmp.ge.s32.totalorder %s11_s6, 4  }
  0x24   :  { %10 = sbr.rel (!%p8_p4) target bundleno = 1 (0x1), region = 54 }

// kernel: crnn_forward.11
= control target key start
LH: loop header
LB: loop body
LE: loop exit
PB: predicated region body
PF: predicated region fallthrough
CT: control target
= control target key end

     0   :  { %s1759_s12 = smov 0   ;;  %s1994_s0 = inlined_call_operand.vmem [shape: bf16[2,18,18,3], index: 0, kind: input, shape index: {}]   ;;  %s1995_s1 = inlined_call_operand.vmem [shape: bf16[9,3,64], index: 1, kind: input, shape index: {}]   ;;  %s1996_s2 = inlined_call_operand.vmem [shape: f32[1,64], index: 2, kind: input, shape index: {}]   ;;  %s1997_s3 = inlined_call_operand.vmem [shape: bf16[2,8,8,64], index: 3, kind: output, shape index: {}]  }
   0x1 LB: > { %s1441_s13 = sadd.s32 4294967295, %s1729_s12   ;;  %p1445_p0 = scmp.ge.s32.totalorder %s1729_s12, 1  ;;  %s1729_s12 = sphi %s1759_s12, %s13_s12  }
   0x2   : > { %p137_p1 = scmp.lt.s32.totalorder %s1729_s12, 3 }
   0x4   : > { %p138_p2 = pnand %p1445_p0, %p137_p1 }
   0x5   : > { %p161_p3 = scmp.lt.s32.totalorder (!%p138_p2), %s1441_s13, 1  ;;  %v1770_v0 = vld [vmem:[%s1996_s2] ss:$0 sm:$0xff] (!%p138_p2)  ;;  %s1782_s24 = smov (!%p138_p2), 0  }
   0x6   : > { %141 = sbr.rel (%p138_p2) target bundleno = 349 (0x15d), region = 32 }
   0xd   : > { %s1999_s13 = smov (!%p161_p3, %s1441_s13), 1 }
   0xe   : > { %s1683_s16 = smul.u32 216, %s1999_s13  ;;  %s1529_s17 = sshll.u32 %s1999_s13, 5 }
   0xf   : > { %s1775_s20 = scalar_lea.vmem %s1997_s3, %s1529_s17 }
  0x10   : > { %s1780_s23 = scalar_lea.vmem %s1994_s0, %s1683_s16 }
  0x11 LB: >> { %v1452_v1 = vld [vmem:[%s1995_s1 + $0x2] sm:$0x3]  ;;  %vm214_vm0 = vcmask 1040384   ;;  %vm215_vm1 = vcmask 1041408   ;;  %v1735_v2 = vmov 0.0   ;;  %v1736_v3 = vmov 65535   ;;  %s1733_s24 = sphi %s1782_s24, %s178_s24  }
  0x12   : >> { %1575 = vmatprep.subr.bf16.mxu0 %v1735_v2  ;;  %1581 = vmatprep.subr.bf16.mxu1 %v1735_v2  ;;  %v216_v4 = vsel %vm214_vm0, 4294967295, %v1736_v3  ;;  %v185_v5 = vld [vmem:[%s1995_s1] sm:$0x3]  ;;  %vm1737_vm2 = vmmov 0   ;;  %s1530_s29 = smul.u32 24, %s1733_s24  ;;  %vm210_vm3 = vcmask 23552  }
  0x13   : >> { %v1795_v6 = vsel %vm215_vm1, %v216_v4, 0  ;;  %1583 = vmatprep.mubr.msk.bf16.mxu1 %vm1737_vm2, %v1735_v2  ;;  %1577 = vmatprep.mubr.msk.bf16.mxu0 %vm1737_vm2, %v1735_v2  ;;  %v1464_v9 = vld [vmem:[%s1995_s1 + $0x6] sm:$0x3]  ;;  %vm197_vm4 = vsmask.f32 7424  ;;  %vm314_vm5 = vcmask 1046528  }
  0x14   : >> { %v1803_v7 = vand.u32 %v1452_v1, %v1795_v6  ;;  %v1806_v8 = vand.u32 %v1795_v6, %v185_v5  ;;  %s1812_s5 = scalar_lea.vmem %s1780_s23, %s1530_s29  ;;  %v1819_v12 = vand.u32 %v1464_v9, %v1795_v6  ;;  %v1457_v15 = vld [vmem:[%s1995_s1 + $0x4] sm:$0x3]  ;;  %v1475_v24 = vld [vmem:[%s1995_s1 + $0xa] sm:$0x3]  ;;  %v1470_v36 = vld [vmem:[%s1995_s1 + $0x8] sm:$0x3] }
  0x15   : >> { %v183_v10 = vld [vmem:[%s1812_s5] sm:$0xf]  ;;  %v184_v11 = vld [vmem:[%s1812_s5 + $0x4] sm:$0xf]  ;;  %v1467_v20 = vld [vmem:[%s1812_s5 + $0xc] sm:$0xf]  ;;  %v1844_v30 = vand.u32 %v1457_v15, %v1795_v6  ;;  %v1855_v37 = vand.u32 %v1475_v24, %v1795_v6  ;;  %v458_v52 = vand.u32 %v1470_v36, %v1795_v6 }
  0x16   : >> { %1576 = vmatpush3.bf16.msra.mxu0 %v1803_v7  ;;  %1582 = vmatpush3.bf16.msra.mxu1 %v1806_v8  ;;  %v1453_v13 = vcombine.low %v183_v10, %v184_v11  ;;  %v1706_v14 = vld [vmem:[%s1812_s5 + $0x8] ss:$0 sps:$4 sm:$0x11]   ;;  %v308_v16 = vld [vmem:[%s1812_s5] sm:$0xe]  ;;  %v1848_v33 = vld [vmem:[%s1812_s5 + $0xc] sm:$0xff]  }
  0x17   : >> { %1587 = vmatprep.subr.bf16.mxu0 %v1735_v2  ;;  %1593 = vmatprep.subr.bf16.mxu1 %v1735_v2  ;;  %v206_v19 = vshll.u32 %v1706_v14, 16  ;;  %v1468_v21 = vld [vmem:[%s1812_s5 + $0x10] sm:$0xf]  ;;  %v1474_v25 = vld [vmem:[%s1812_s5 + $0xc] sm:$0xe]  ;;  %v1458_v26 = vcombine.low %v308_v16, %v184_v11  ;;  %v316_v40 = vrot.slane %v1706_v14, 1 }
  0x18   : >> { %v199_v17 = vshrl.u32 %v1453_v13, 16  ;;  %v201_v18 = vshll.u32 %v1453_v13, 16  ;;  %v1485_v27 = vld [vmem:[%s1812_s5 + $0x18] sm:$0xf]  ;;  %v1841_v28 = vld [vmem:[%s1812_s5 + $0x1c] sm:$0xf]  ;;  %v1471_v31 = vcombine.low %v1467_v20, %v1468_v21  ;;  %v1476_v34 = vcombine.low %v1474_v25, %v1468_v21 }
  0x19   : >> { %1584 = vmatmul.mubr.msk.bf16.vlgmr.msra.gmra.mrb[0].mxu1 %vm210_vm3, %v1453_v13  ;;  %v208_v23 = vrot.slane %v206_v19, 1  ;;  %v1709_v32 = vld [vmem:[%s1812_s5 + $0x14] ss:$0 sps:$4 sm:$0x11]   ;;  %v1489_v38 = vcombine.low %v1485_v27, %v1841_v28  ;;  %v315_v39 = vrot.slane %v1458_v26, 1  ;;  %v1713_v20 = vld [vmem:[%s1812_s5 + $0x18] sm:$0xff]  }
  0x1a   : >> { %1594 = vmatpush3.bf16.msra.mxu1 %v1819_v12  ;;  %1595 = vmatprep.mubr.msk.bf16.mxu1 %vm1737_vm2, %v1735_v2  ;;  %v203_v22 = vrot.slane %v201_v18, 1  ;;  %v510_v41 = vrot.slane %v1709_v32, 1  ;;  %v445_v42 = vshll.u32 %v1471_v31, 16  ;;  %v1509_v43 = vld [vmem:[%s1812_s5 + $0x24] sm:$0xf]  ;;  %v509_v45 = vrot.slane %v1476_v34, 1 }
  0x1b   : >> { %1605 = vmatprep.subr.bf16.mxu1 %v1735_v2  ;;  %v1864_v44 = vld [vmem:[%s1812_s5 + $0x28] sm:$0xf]  ;;  %v1870_v46 = vld [vmem:[%s1812_s5 + $0x20] ss:$0 sps:$4 sm:$0x11]   ;;  %v639_v49 = vshll.u32 %v1489_v38, 16  ;;  %v317_v51 = vsel %vm314_vm5, %v315_v39, %v316_v40 }
  0x1c   : >> { %v204_v29 = vor.u32 %v203_v22, %v199_v17  ;;  %v1512_v47 = vcombine.low %v1509_v43, %v1864_v44  ;;  %v1488_v48 = vld [vmem:[%s1995_s1 + $0xe] sm:$0x3]  ;;  %v1880_v50 = vld [vmem:[%s1812_s5 + $0x2c] ss:$0 sps:$4 sm:$0x11]   ;;  %v443_v53 = vshrl.u32 %v1471_v31, 16  ;;  %v511_v59 = vsel %vm314_vm5, %v509_v45, %v510_v41 }
  0x1d   : >> { %v450_v54 = vshll.u32 %v1709_v32, 16  ;;  %v447_v55 = vrot.slane %v445_v42, 1  ;;  %v1095_v58 = vshll.u32 %v1880_v50, 16  ;;  %v1888_v60 = vand.u32 %v1488_v48, %v1795_v6  ;;  %v1482_v10 = vld [vmem:[%s1995_s1 + $0xc] sm:$0x3]  ;;  %s1526_s19 = sshll.u32 %s1733_s24, 2 }
  0x1e   : >> { %v209_v35 = vsel %vm197_vm4, %v204_v29, %v208_v23  ;;  %v1088_v56 = vshrl.u32 %v1512_v47, 16  ;;  %v1090_v57 = vshll.u32 %v1512_v47, 16  ;;  %v637_v61 = vshrl.u32 %v1489_v38, 16  ;;  %v1493_v18 = vld [vmem:[%s1995_s1 + $0x10] sm:$0x3]  ;;  %s1362_s21 = scalar_lea.vmem %s1775_s20, %s1526_s19  ;;  %s178_s24 = sadd.s32 1, %s1733_s24  }
  0x1f   : >> { %1578 = vmatmul.mubr.msk.bf16.vlgmr.msra.gmra.mrb[0].mxu0 %vm210_vm3, %v209_v35  ;;  %v641_v62 = vrot.slane %v639_v49, 1  ;;  %v644_v63 = vshll.u32 %v1870_v46, 16  ;;  %v1097_v3 = vrot.slane %v1095_v58, 1  ;;  %v448_v4 = vor.u32 %v447_v55, %v443_v53  ;;  %v1492_v19 = vld [vmem:[%s1812_s5 + $0x18] sm:$0xe]  ;;  %p175_p4 = scmp.ge.s32.totalorder %s178_s24, 8  }
  0x20   : >> { %1588 = vmatpush3.bf16.msra.mxu0 %v1844_v30  ;;  %1589 = vmatprep.mubr.msk.bf16.mxu0 %vm1737_vm2, %v1735_v2  ;;  %v1092_v1 = vrot.slane %v1090_v57, 1  ;;  %v452_v5 = vrot.slane %v450_v54, 1  ;;  %v578_v16 = vand.u32 %v1482_v10, %v1795_v6  ;;  %v710_v21 = vand.u32 %v1493_v18, %v1795_v6 }
  0x21   : >> { %1596 = vmatmul.mubr.msk.bf16.vlgmr.msra.gmra.mrb[4].mxu1 %vm210_vm3, %v1848_v33  ;;  %1599 = vmatprep.subr.bf16.mxu0 %v1735_v2  ;;  %v642_v11 = vor.u32 %v641_v62, %v637_v61  ;;  %v646_v13 = vrot.slane %v644_v63, 1  ;;  %v1494_v22 = vcombine.low %v1492_v19, %v1841_v28  ;;  %v704_v24 = vrot.slane %v1870_v46, 1 }
  0x22   : >> { %1606 = vmatpush3.bf16.msra.mxu1 %v1855_v37  ;;  %1607 = vmatprep.mubr.msk.bf16.mxu1 %vm1737_vm2, %v1735_v2  ;;  %v1093_v9 = vor.u32 %v1092_v1, %v1088_v56  ;;  %v453_v15 = vsel %vm197_vm4, %v448_v4, %v452_v5  ;;  %v1150_v26 = vrot.slane %v1880_v50, 1  ;;  %vm1248_vm6 = vcmask 517120  }
  0x23   : >> { %1617 = vmatprep.subr.bf16.mxu1 %v1735_v2  ;;  %v647_v17 = vsel %vm197_vm4, %v642_v11, %v646_v13  ;;  %v703_v23 = vrot.slane %v1494_v22, 1  ;;  %vm1345_vm7 = vcmask 1041409   ;;  %vm1347_vm8 = vcmask 1042434  }
  0x24   : >> { %v1098_v14 = vsel %vm197_vm4, %v1093_v9, %v1097_v3  ;;  %vm1349_vm9 = vcmask 1043459   ;;  %vm1351_vm10 = vcmask 1044484   ;;  %vm1353_vm11 = vcmask 1045509  }
  0x25   : >> { %v705_v6 = vsel %vm314_vm5, %v703_v23, %v704_v24  ;;  %vm1355_vm12 = vcmask 1046534   ;;  %vm1357_vm13 = vcmask 1047559   ;;  %vm1363_vm14 = vcmask 519168  }
  0x27   : >> { %1590 = vmatmul.mubr.msk.bf16.vlgmr.msra.gmra.mrb[4].mxu0 %vm210_vm3, %v317_v51 }
  0x28   : >> { %1600 = vmatpush3.bf16.msra.mxu0 %v458_v52  ;;  %1601 = vmatprep.mubr.msk.bf16.mxu0 %vm1737_vm2, %v1735_v2 }
  0x29   : >> { %1608 = vmatmul.mubr.msk.bf16.vlgmr.msra.gmra.mrb[8].mxu1 %vm210_vm3, %v511_v59  ;;  %1611 = vmatprep.subr.bf16.mxu0 %v1735_v2 }
  0x2a   : >> { %1618 = vmatpush3.bf16.msra.mxu1 %v1888_v60  ;;  %1619 = vmatprep.mubr.msk.bf16.mxu1 %vm1737_vm2, %v1735_v2 }
  0x2b   : >> { %1629 = vmatprep.subr.bf16.mxu1 %v1735_v2 }
  0x2f   : >> { %1602 = vmatmul.mubr.msk.bf16.vlgmr.msra.gmra.mrb[8].mxu0 %vm210_vm3, %v453_v15 }
  0x30   : >> { %1612 = vmatpush3.bf16.msra.mxu0 %v578_v16  ;;  %1613 = vmatprep.mubr.msk.bf16.mxu0 %vm1737_vm2, %v1735_v2 }
  0x31   : >> { %1620 = vmatmul.mubr.msk.bf16.vlgmr.msra.gmra.mrb[12].mxu1 %vm210_vm3, %v647_v17  ;;  %1623 = vmatprep.subr.bf16.mxu0 %v1735_v2 }
  0x32   : >> { %1630 = vmatpush3.bf16.msra.mxu1 %v1803_v7  ;;  %1631 = vmatprep.mubr.msk.bf16.mxu1 %vm1737_vm2, %v1735_v2  ;;  %v1515_v7 = vld [vmem:[%s1812_s5 + $0x24] sm:$0xe] }
  0x33   : >> { %1641 = vmatprep.subr.bf16.mxu1 %v1735_v2  ;;  %v1516_v25 = vcombine.low %v1515_v7, %v1864_v44 }
  0x37   : >> { %1614 = vmatmul.mubr.msk.bf16.vlgmr.msra.gmra.mrb[12].mxu0 %vm210_vm3, %v1713_v20 }
  0x38   : >> { %1624 = vmatpush3.bf16.msra.mxu0 %v710_v21  ;;  %1625 = vmatprep.mubr.msk.bf16.mxu0 %vm1737_vm2, %v1735_v2 }
  0x39   : >> { %1632 = vmatmul.mubr.msk.bf16.vlgmr.msra.gmra.mrb[16].mxu1 %vm210_vm3, %v453_v15  ;;  %1635 = vmatprep.subr.bf16.mxu0 %v1735_v2 }
  0x3a   : >> { %1642 = vmatpush3.bf16.msra.mxu1 %v1844_v30  ;;  %1643 = vmatprep.mubr.msk.bf16.mxu1 %vm1737_vm2, %v1735_v2 }
  0x3b   : >> { %1653 = vmatprep.subr.bf16.mxu1 %v1735_v2 }
  0x3f   : >> { %1626 = vmatmul.mubr.msk.bf16.vlgmr.msra.gmra.mrb[16].mxu0 %vm210_vm3, %v705_v6 }
  0x40   : >> { %1636 = vmatpush3.bf16.msra.mxu0 %v1806_v8  ;;  %1637 = vmatprep.mubr.msk.bf16.mxu0 %vm1737_vm2, %v1735_v2  ;;  %v1715_v8 = vld [vmem:[%s1812_s5 + $0x24] sm:$0xff]  }
  0x41   : >> { %1644 = vmatmul.mubr.msk.bf16.vlgmr.msra.gmra.mrb[20].mxu1 %vm210_vm3, %v511_v59  ;;  %1647 = vmatprep.subr.bf16.mxu0 %v1735_v2 }
  0x42   : >> { %1654 = vmatpush3.bf16.msra.mxu1 %v458_v52  ;;  %1655 = vmatprep.mubr.msk.bf16.mxu1 %vm1737_vm2, %v1735_v2 }
  0x43   : >> { %1665 = vmatprep.subr.bf16.mxu1 %v1735_v2 }
  0x47   : >> { %1638 = vmatmul.mubr.msk.bf16.vlgmr.msra.gmra.mrb[20].mxu0 %vm210_vm3, %v1848_v33 }
  0x48   : >> { %1648 = vmatpush3.bf16.msra.mxu0 %v1819_v12  ;;  %1649 = vmatprep.mubr.msk.bf16.mxu0 %vm1737_vm2, %v1735_v2  ;;  %v1149_v12 = vrot.slane %v1516_v25, 1 }
  0x49   : >> { %1656 = vmatmul.mubr.msk.bf16.vlgmr.msra.gmra.mrb[24].mxu1 %vm210_vm3, %v647_v17  ;;  %1659 = vmatprep.subr.bf16.mxu0 %v1735_v2 }
  0x4a   : >> { %1666 = vmatpush3.bf16.msra.mxu1 %v578_v16  ;;  %1667 = vmatprep.mubr.msk.bf16.mxu1 %vm1737_vm2, %v1735_v2  ;;  %v1151_v27 = vsel %vm314_vm5, %v1149_v12, %v1150_v26 }
  0x4b   : >> { %1677 = vmatprep.subr.bf16.mxu1 %v1735_v2 }
  0x4f   : >> { %1650 = vmatmul.mubr.msk.bf16.vlgmr.msra.gmra.mrb[24].mxu0 %vm210_vm3, %v1713_v20 }
  0x50   : >> { %1660 = vmatpush3.bf16.msra.mxu0 %v1855_v37  ;;  %1661 = vmatprep.mubr.msk.bf16.mxu0 %vm1737_vm2, %v1735_v2 }
  0x51   : >> { %1668 = vmatmul.mubr.msk.bf16.vlgmr.msra.gmra.mrb[28].mxu1 %vm210_vm3, %v1715_v8  ;;  %1671 = vmatprep.subr.bf16.mxu0 %v1735_v2 }
  0x52   : >> { %1678 = vmatpush3.bf16.msra.mxu1 %v710_v21  ;;  %1679 = vmatprep.mubr.msk.bf16.mxu1 %vm1737_vm2, %v1735_v2 }
  0x57   : >> { %1662 = vmatmul.mubr.msk.bf16.vlgmr.msra.gmra.mrb[28].mxu0 %vm210_vm3, %v705_v6 }
  0x58   : >> { %1672 = vmatpush3.bf16.msra.mxu0 %v1888_v60  ;;  %1673 = vmatprep.mubr.msk.bf16.mxu0 %vm1737_vm2, %v1735_v2 }
  0x59   : >> { %1680 = vmatmul.mubr.msk.bf16.vlgmr.msra.gmra.mrb[32].mxu1 %vm210_vm3, %v1151_v27 }
  0x5f   : >> { %1674 = vmatmul.mubr.msk.bf16.vlgmr.msra.gmra.mrb[32].mxu0 %vm210_vm3, %v1098_v14 }
  0xec   : >> { %v301_v28 = vpop.f32.mrb[0].mxu1 }
  0xed   : >> { %v1585_v29 = vpop.f32.mrb[1].mxu1 }
  0xee   : >> { %v304_v30 = vpop.f32.mrb[2].mxu1 }
  0xef   : >> { %v1586_v31 = vpop.f32.mrb[3].mxu1 }
  0xf2   : >> { %v255_v32 = vpop.f32.mrb[0].mxu0 }
  0xf3   : >> { %v302_v33 = vadd.f32 %v301_v28, %v255_v32  ;;  %v1579_v34 = vpop.f32.mrb[1].mxu0 }
  0xf4   : >> { %v258_v35 = vpop.f32.mrb[2].mxu0  ;;  %v420_v36 = vpop.f32.mrb[4].mxu1 }
  0xf5   : >> { %v305_v37 = vadd.f32 %v304_v30, %v258_v35  ;;  %v1580_v38 = vpop.f32.mrb[3].mxu0  ;;  %v1597_v39 = vpop.f32.mrb[5].mxu1 }
  0xf6   : >> { %v423_v40 = vpop.f32.mrb[6].mxu1 }
  0xf7   : >> { %v1598_v41 = vpop.f32.mrb[7].mxu1 }
  0xfa   : >> { %v358_v42 = vpop.f32.mrb[4].mxu0 }
  0xfb   : >> { %v365_v2 = vadd.f32 %v358_v42, %v302_v33  ;;  %v1591_v43 = vpop.f32.mrb[5].mxu0 }
  0xfc   : >> { %v361_v44 = vpop.f32.mrb[6].mxu0  ;;  %v552_v45 = vpop.f32.mrb[8].mxu1 }
  0xfd   : >> { %v366_v46 = vadd.f32 %v361_v44, %v305_v37  ;;  %v1592_v47 = vpop.f32.mrb[7].mxu0  ;;  %v427_v48 = vadd.f32 %v420_v36, %v365_v2  ;;  %v1609_v49 = vpop.f32.mrb[9].mxu1 }
  0xfe   : >> { %v555_v50 = vpop.f32.mrb[10].mxu1 }
  0xff   : >> { %v428_v51 = vadd.f32 %v423_v40, %v366_v46  ;;  %v1610_v52 = vpop.f32.mrb[11].mxu1 }
 0x102   : >> { %v494_v53 = vpop.f32.mrb[8].mxu0 }
 0x103   : >> { %v501_v54 = vadd.f32 %v494_v53, %v427_v48  ;;  %v1603_v55 = vpop.f32.mrb[9].mxu0 }
 0x104   : >> { %v497_v56 = vpop.f32.mrb[10].mxu0  ;;  %v688_v57 = vpop.f32.mrb[12].mxu1 }
 0x105   : >> { %v502_v58 = vadd.f32 %v497_v56, %v428_v51  ;;  %v1604_v59 = vpop.f32.mrb[11].mxu0  ;;  %v559_v60 = vadd.f32 %v552_v45, %v501_v54  ;;  %v1621_v61 = vpop.f32.mrb[13].mxu1 }
 0x106   : >> { %v691_v62 = vpop.f32.mrb[14].mxu1 }
 0x107   : >> { %v560_v63 = vadd.f32 %v555_v50, %v502_v58  ;;  %v1622_v1 = vpop.f32.mrb[15].mxu1 }
 0x10a   : >> { %v614_v3 = vpop.f32.mrb[12].mxu0 }
 0x10b   : >> { %v621_v4 = vadd.f32 %v614_v3, %v559_v60  ;;  %v1615_v5 = vpop.f32.mrb[13].mxu0  ;;  %v1738_v60 = vmov 1983009808  }
 0x10c   : >> { %v617_v9 = vpop.f32.mrb[14].mxu0  ;;  %v799_v10 = vpop.f32.mrb[16].mxu1  ;;  %v1208_v61 = vunpack.c.l.s4 %v1738_v60 }
 0x10d   : >> { %v622_v11 = vadd.f32 %v617_v9, %v560_v63  ;;  %v1616_v13 = vpop.f32.mrb[15].mxu0  ;;  %v695_v14 = vadd.f32 %v688_v57, %v621_v4  ;;  %v1633_v15 = vpop.f32.mrb[17].mxu1 }
 0x10e   : >> { %v802_v16 = vpop.f32.mrb[18].mxu1  ;;  %v1209_v4 = vunpack.c.0.s8 %v1208_v61 }
 0x10f   : >> { %v696_v17 = vadd.f32 %v691_v62, %v622_v11  ;;  %v1634_v18 = vpop.f32.mrb[19].mxu1  ;;  %v1210_v62 = vlaneseq }
 0x111   : >> { %v1211_v11 = vshrl.u32 %v1210_v62, 7 }
 0x112   : >> { %v746_v19 = vpop.f32.mrb[16].mxu0 }
 0x113   : >> { %v753_v20 = vadd.f32 %v746_v19, %v695_v14  ;;  %v1627_v21 = vpop.f32.mrb[17].mxu0 }
 0x114   : >> { %v749_v22 = vpop.f32.mrb[18].mxu0  ;;  %v881_v23 = vpop.f32.mrb[20].mxu1  ;;  %v1212_v21 = vsub.s32 %v1209_v4, %v1211_v11 }
 0x115   : >> { %v754_v24 = vadd.f32 %v749_v22, %v696_v17  ;;  %v1628_v6 = vpop.f32.mrb[19].mxu0  ;;  %v1645_v7 = vpop.f32.mrb[21].mxu1  ;;  %v761_v9 = vadd.f32 %v1770_v0, %v753_v20 }
 0x116   : >> { %v884_v8 = vpop.f32.mrb[22].mxu1 }
 0x117   : >> { %v1646_v25 = vpop.f32.mrb[23].mxu1  ;;  %v762_v15 = vadd.f32 %v1770_v0, %v754_v24  ;;  %v763_v18 = vmax.f32 %v761_v9, 0.0 }
 0x11a   : >> { %v840_v12 = vpop.f32.mrb[20].mxu0 }
 0x11b   : >> { %v841_v26 = vadd.f32 %v840_v12, %v799_v10  ;;  %v1639_v27 = vpop.f32.mrb[21].mxu0 }
 0x11c   : >> { %v843_v28 = vpop.f32.mrb[22].mxu0  ;;  %v967_v29 = vpop.f32.mrb[24].mxu1 }
 0x11d   : >> { %v844_v30 = vadd.f32 %v843_v28, %v802_v16  ;;  %v1640_v31 = vpop.f32.mrb[23].mxu0  ;;  %v888_v32 = vadd.f32 %v881_v23, %v841_v26  ;;  %v1657_v33 = vpop.f32.mrb[25].mxu1  ;;  %v764_v23 = vmax.f32 %v762_v15, 0.0 }
 0x11e   : >> { %v970_v34 = vpop.f32.mrb[26].mxu1 }
 0x11f   : >> { %v889_v35 = vadd.f32 %v884_v8, %v844_v30  ;;  %v1658_v36 = vpop.f32.mrb[27].mxu1 }
 0x122   : >> { %v924_v37 = vpop.f32.mrb[24].mxu0 }
 0x123   : >> { %v931_v38 = vadd.f32 %v924_v37, %v888_v32  ;;  %v1651_v39 = vpop.f32.mrb[25].mxu0 }
 0x124   : >> { %v927_v40 = vpop.f32.mrb[26].mxu0  ;;  %v1067_v41 = vpop.f32.mrb[28].mxu1 }
 0x125   : >> { %v932_v42 = vadd.f32 %v927_v40, %v889_v35  ;;  %v1652_v2 = vpop.f32.mrb[27].mxu0  ;;  %v974_v43 = vadd.f32 %v967_v29, %v931_v38  ;;  %v1669_v44 = vpop.f32.mrb[29].mxu1 }
 0x126   : >> { %v1070_v45 = vpop.f32.mrb[30].mxu1 }
 0x127   : >> { %v975_v46 = vadd.f32 %v970_v34, %v932_v42  ;;  %v1670_v47 = vpop.f32.mrb[31].mxu1 }
 0x12a   : >> { %v1010_v48 = vpop.f32.mrb[28].mxu0 }
 0x12b   : >> { %v1017_v49 = vadd.f32 %v1010_v48, %v974_v43  ;;  %v1663_v50 = vpop.f32.mrb[29].mxu0 }
 0x12c   : >> { %v1013_v51 = vpop.f32.mrb[30].mxu0  ;;  %v1189_v52 = vpop.f32.mrb[32].mxu1 }
 0x12d   : >> { %v1018_v53 = vadd.f32 %v1013_v51, %v975_v46  ;;  %v1664_v54 = vpop.f32.mrb[31].mxu0  ;;  %v1074_v55 = vadd.f32 %v1067_v41, %v1017_v49  ;;  %v1681_v56 = vpop.f32.mrb[33].mxu1 }
 0x12e   : >> { %v1192_v57 = vpop.f32.mrb[34].mxu1 }
 0x12f   : >> { %v1075_v58 = vadd.f32 %v1070_v45, %v1018_v53  ;;  %v1682_v59 = vpop.f32.mrb[35].mxu1 }
 0x132   : >> { %v1136_v63 = vpop.f32.mrb[32].mxu0 }
 0x133   : >> { %v1143_v1 = vadd.f32 %v1136_v63, %v1074_v55  ;;  %v1675_v3 = vpop.f32.mrb[33].mxu0 }
 0x134   : >> { %v1139_v5 = vpop.f32.mrb[34].mxu0 }
 0x135   : >> { %v1196_v10 = vadd.f32 %v1189_v52, %v1143_v1  ;;  %v1144_v13 = vadd.f32 %v1139_v5, %v1075_v58  ;;  %v1676_v14 = vpop.f32.mrb[35].mxu0 }
 0x137   : >> { %v1198_v16 = vadd.f32 %v1770_v0, %v1196_v10  ;;  %v1197_v17 = vadd.f32 %v1192_v57, %v1144_v13 }
 0x139   : >> { %v1200_v19 = vmax.f32 %v1198_v16, 0.0  ;;  %v1199_v22 = vadd.f32 %v1770_v0, %v1197_v17 }
 0x13b   : >> { %v1202_v6 = vmax.f32 %v763_v18, %v1200_v19  ;;  %v1201_v7 = vmax.f32 %v1199_v22, 0.0 }
 0x13d   : >> { %v1206_v8 = vcombine.high %v1202_v6, %v1202_v6  ;;  %v1213_v20 = vrot.slane %v1202_v6, %v1212_v21  ;;  %v1203_v25 = vmax.f32 %v764_v23, %v1201_v7 }
 0x13f   : >> { %v1220_v12 = vrot.slane %v1206_v8, %v1212_v21  ;;  %v1221_v26 = vcombine.high %v1213_v20, %v1213_v20  ;;  %v1249_v27 = vsel %vm1248_vm6, %v1213_v20, -inf  ;;  %v1223_v24 = vcombine.high %v1203_v25, %v1203_v25 }
 0x140   : >> { %v1250_v28 = vrot.slane %v1249_v27, 4  ;;  %v1230_v29 = vrot.slane %v1203_v25, %v1212_v21 }
 0x141   : >> { %v1222_v30 = vcombine.high %v1220_v12, %v1220_v12  ;;  %v1256_v31 = vsel %vm1248_vm6, %v1221_v26, -inf  ;;  %v1263_v32 = vsel %vm1248_vm6, %v1220_v12, -inf  ;;  %v1237_v33 = vrot.slane %v1223_v24, %v1212_v21 }
 0x142   : >> { %v1251_v34 = vmax.f32 %v1249_v27, %v1250_v28  ;;  %v1257_v35 = vrot.slane %v1256_v31, 4  ;;  %v1264_v36 = vrot.slane %v1263_v32, 4  ;;  %v1238_v37 = vcombine.high %v1230_v29, %v1230_v29 }
 0x143   : >> { %v1270_v38 = vsel %vm1248_vm6, %v1222_v30, -inf  ;;  %v1239_v39 = vcombine.high %v1237_v33, %v1237_v33  ;;  %v1277_v40 = vsel %vm1248_vm6, %v1230_v29, -inf  ;;  %v1291_v41 = vsel %vm1248_vm6, %v1237_v33, -inf }
 0x144   : >> { %v1252_v42 = vrot.slane %v1251_v34, 2  ;;  %v1258_v2 = vmax.f32 %v1256_v31, %v1257_v35  ;;  %v1265_v43 = vmax.f32 %v1263_v32, %v1264_v36  ;;  %v1271_v44 = vrot.slane %v1270_v38, 4 }
 0x145   : >> { %v1278_v45 = vrot.slane %v1277_v40, 4  ;;  %v1284_v46 = vsel %vm1248_vm6, %v1238_v37, -inf  ;;  %v1292_v47 = vrot.slane %v1291_v41, 4  ;;  %v1298_v48 = vsel %vm1248_vm6, %v1239_v39, -inf }
 0x146   : >> { %v1253_v49 = vmax.f32 %v1251_v34, %v1252_v42  ;;  %v1259_v50 = vrot.slane %v1258_v2, 2  ;;  %v1266_v51 = vrot.slane %v1265_v43, 2  ;;  %v1272_v52 = vmax.f32 %v1270_v38, %v1271_v44 }
 0x147   : >> { %v1279_v53 = vmax.f32 %v1277_v40, %v1278_v45  ;;  %v1285_v54 = vrot.slane %v1284_v46, 4  ;;  %v1293_v55 = vmax.f32 %v1291_v41, %v1292_v47  ;;  %v1299_v56 = vrot.slane %v1298_v48, 4 }
 0x148   : >> { %v1254_v57 = vrot.slane %v1253_v49, 1  ;;  %v1260_v58 = vmax.f32 %v1258_v2, %v1259_v50  ;;  %v1267_v59 = vmax.f32 %v1265_v43, %v1266_v51  ;;  %v1273_v60 = vrot.slane %v1272_v52, 2 }
 0x149   : >> { %v1280_v61 = vrot.slane %v1279_v53, 2  ;;  %v1286_v62 = vmax.f32 %v1284_v46, %v1285_v54  ;;  %v1294_v63 = vrot.slane %v1293_v55, 2  ;;  %v1300_v1 = vmax.f32 %v1298_v48, %v1299_v56 }
 0x14a   : >> { %v1255_v3 = vmax.f32 %v1253_v49, %v1254_v57  ;;  %v1261_v4 = vrot.slane %v1260_v58, 1  ;;  %v1268_v5 = vrot.slane %v1267_v59, 1  ;;  %v1274_v9 = vmax.f32 %v1272_v52, %v1273_v60 }
 0x14b   : >> { %v1281_v10 = vmax.f32 %v1279_v53, %v1280_v61  ;;  %v1287_v11 = vrot.slane %v1286_v62, 2  ;;  %v1295_v13 = vmax.f32 %v1293_v55, %v1294_v63  ;;  %v1301_v14 = vrot.slane %v1300_v1, 2 }
 0x14c   : >> { %v1262_v15 = vmax.f32 %v1260_v58, %v1261_v4  ;;  %v1269_v16 = vmax.f32 %v1267_v59, %v1268_v5  ;;  %v1275_v17 = vrot.slane %v1274_v9, 1  ;;  %v1531_v18 = vpack.c.bf16 %v1255_v3, %v1255_v3 }
 0x14d   : >> { %v1282_v19 = vrot.slane %v1281_v10, 1  ;;  %v1288_v21 = vmax.f32 %v1286_v62, %v1287_v11  ;;  %v1296_v22 = vrot.slane %v1295_v13, 1  ;;  %v1302_v23 = vmax.f32 %v1300_v1, %v1301_v14 }
 0x14e   : >> { %v1276_v6 = vmax.f32 %v1274_v9, %v1275_v17  ;;  %v1532_v7 = vpack.c.bf16 %v1262_v15, %v1262_v15  ;;  %v1533_v8 = vpack.c.bf16 %v1269_v16, %v1269_v16  ;;  %v1337_v24 = vunpack.c.l.b16 %v1531_v18 }
 0x14f   : >> { %v1283_v20 = vmax.f32 %v1281_v10, %v1282_v19  ;;  %v1289_v25 = vrot.slane %v1288_v21, 1  ;;  %v1297_v12 = vmax.f32 %v1295_v13, %v1296_v22  ;;  %v1303_v26 = vrot.slane %v1302_v23, 1 }
 0x150   : >> { %v1534_v27 = vpack.c.bf16 %v1276_v6, %v1276_v6  ;;  %v1338_v28 = vunpack.c.l.b16 %v1532_v7  ;;  %v1339_v29 = vunpack.c.l.b16 %v1533_v8 }
 0x151   : >> { %v1290_v30 = vmax.f32 %v1288_v21, %v1289_v25  ;;  %v1304_v31 = vmax.f32 %v1302_v23, %v1303_v26  ;;  %v1535_v32 = vpack.c.bf16 %v1283_v20, %v1283_v20  ;;  %v1537_v35 = vpack.c.bf16 %v1297_v12, %v1297_v12 }
 0x152   : >> { %v1340_v33 = vunpack.c.l.b16 %v1534_v27  ;;  %v1346_v34 = vsel %vm1345_vm7, %v1338_v28, %v1337_v24 }
 0x153   : >> { %v1348_v36 = vsel %vm1347_vm8, %v1339_v29, %v1346_v34  ;;  %v1536_v37 = vpack.c.bf16 %v1290_v30, %v1290_v30  ;;  %v1538_v38 = vpack.c.bf16 %v1304_v31, %v1304_v31  ;;  %v1341_v39 = vunpack.c.l.b16 %v1535_v32 }
 0x154   : >> { %v1350_v40 = vsel %vm1349_vm9, %v1340_v33, %v1348_v36  ;;  %v1343_v2 = vunpack.c.l.b16 %v1537_v35 }
 0x155   : >> { %v1342_v41 = vunpack.c.l.b16 %v1536_v37  ;;  %v1352_v42 = vsel %vm1351_vm10, %v1341_v39, %v1350_v40  ;;  %v1344_v43 = vunpack.c.l.b16 %v1538_v38 }
 0x156   : > { %177 = sbr.rel (!%p175_p4) target bundleno = 17 (0x11), region = 82 }
 0x157   : >> { %v1354_v44 = vsel %vm1353_vm11, %v1342_v41, %v1352_v42 }
 0x158   : >> { %v1356_v45 = vsel %vm1355_vm12, %v1343_v2, %v1354_v44 }
 0x159   : >> { %v1358_v46 = vsel %vm1357_vm13, %v1344_v43, %v1356_v45 }
 0x15a   : >> { %v1359_v47 = vpack.c.b16 %v1358_v46, %v1358_v46 }
 0x15c   : >> { %1364 = vst.msk [vmem:[%s1362_s21] sm:$0xf] %vm1363_vm14, %v1359_v47 }
 0x15d PF: > { %s13_s12 = sadd.s32 1, %s1729_s12  }
 0x15e   : > { %p10_p5 = scmp.ge.s32.totalorder %s13_s12, 4  }
 0x160   :  { %12 = sbr.rel (!%p10_p5) target bundleno = 1 (0x1), region = 93 }

// kernel: crnn_forward.12
= control target key start
LH: loop header
LB: loop body
LE: loop exit
PB: predicated region body
PF: predicated region fallthrough
CT: control target
= control target key end

     0   :  { %s2143_s12 = smov 0   ;;  %s2602_s0 = inlined_call_operand.vmem [shape: bf16[2,10,10,64], index: 0, kind: input, shape index: {}]   ;;  %s2603_s1 = inlined_call_operand.vmem [shape: bf16[9,64,128], index: 1, kind: input, shape index: {}]   ;;  %s2604_s2 = inlined_call_operand.vmem [shape: f32[1,128], index: 2, kind: input, shape index: {}]   ;;  %s2605_s3 = inlined_call_operand.vmem [shape: bf16[2,4,4,128], index: 3, kind: output, shape index: {}]  }
   0x1 LB: > { %s1568_s13 = sadd.s32 4294967295, %s2114_s12   ;;  %p1572_p0 = scmp.ge.s32.totalorder %s2114_s12, 1  ;;  %s2114_s12 = sphi %s2143_s12, %s13_s12  }
   0x2   : > { %p137_p1 = scmp.lt.s32.totalorder %s2114_s12, 3 }
   0x4   : > { %p138_p2 = pnand %p1572_p0, %p137_p1 }
   0x5   : > { %p161_p3 = scmp.lt.s32.totalorder (!%p138_p2), %s1568_s13, 1  ;;  %v2154_v0 = vld [vmem:[%s2604_s2] ss:$0 sm:$0xff] (!%p138_p2)  ;;  %s2166_s24 = smov (!%p138_p2), 0  }
   0x6   : > { %141 = sbr.rel (%p138_p2) target bundleno = 417 (0x1a1), region = 32 }
   0xd   : > { %s2607_s13 = smov (!%p161_p3, %s1568_s13), 1 }
   0xe   : > { %s2040_s16 = smul.u32 80, %s2607_s13  ;;  %s1728_s17 = sshll.u32 %s2607_s13, 3 }
   0xf   : > { %s2159_s20 = scalar_lea.vmem %s2605_s3, %s1728_s17 }
  0x10   : > { %s2164_s23 = scalar_lea.vmem %s2602_s0, %s2040_s16 }
  0x11 LB: >> { %v2174_v1 = vld [vmem:[%s2603_s1 + $0x20] sm:$0xff]   ;;  %v2120_v2 = vmov 0.0   ;;  %v2187_v4 = vld [vmem:[%s2603_s1 + $0x28] sm:$0xff]   ;;  %vm2121_vm0 = vmmov 0   ;;  %s1730_s4 = sshll.u32 %s2118_s24, 4  ;;  %v2209_v6 = vld [vmem:[%s2603_s1 + $0x30] sm:$0xff]   ;;  %s2118_s24 = sphi %s2166_s24, %s178_s24  }
  0x12   : >> { %1824 = vmatprep.subr.bf16.mxu0 %v2120_v2  ;;  %1836 = vmatprep.subr.bf16.mxu1 %v2120_v2  ;;  %v2181_v3 = vld [vmem:[%s2603_s1] sm:$0xff]   ;;  %v2197_v5 = vld [vmem:[%s2603_s1 + $0x8] sm:$0xff]   ;;  %s2203_s7 = scalar_lea.vmem %s2164_s23, %s1730_s4  ;;  %v2216_v7 = vld [vmem:[%s2603_s1 + $0x10] sm:$0xff]   ;;  %vm238_vm1 = vcmask 523264   ;;  %vm1374_vm2 = vcmask 1041408   ;;  %vm1472_vm3 = vcmask 1041409  }
  0x13   : >> { %1825 = vmatpush3.bf16.msra.mxu0 %v2174_v1  ;;  %1832 = vmatprep.mubr.msk.bf16.mxu0 %vm2121_vm0, %v2120_v2  ;;  %v183_v8 = vld [vmem:[%s2203_s7] sm:$0xf]  ;;  %v192_v9 = vld [vmem:[%s2203_s7 + $0x4] sm:$0x1]  ;;  %v2225_v11 = vld [vmem:[%s2603_s1 + $0x38] sm:$0xff]   ;;  %vm1475_vm4 = vcmask 1042434  }
  0x14   : >> { %1837 = vmatpush3.bf16.msra.mxu1 %v2181_v3  ;;  %1826 = vmatprep.subr.bf16.mxu0 %v2120_v2  ;;  %v1587_v10 = vcombine.low %v183_v8, %v192_v9  ;;  %v2232_v12 = vld [vmem:[%s2603_s1 + $0x18] sm:$0xff]   ;;  %v2239_v16 = vld [vmem:[%s2603_s1 + $0x40] sm:$0xff]   ;;  %v2255_v19 = vld [vmem:[%s2603_s1 + $0x48] sm:$0xff]   ;;  %vm1478_vm5 = vcmask 1043459  }
  0x15   : >> { %1838 = vmatprep.subr.bf16.mxu1 %v2120_v2  ;;  %1844 = vmatprep.mubr.msk.bf16.mxu1 %vm2121_vm0, %v2120_v2  ;;  %v2246_v18 = vld [vmem:[%s2603_s1 + $0x60] sm:$0xff]   ;;  %v2262_v20 = vld [vmem:[%s2603_s1 + $0x68] sm:$0xff]   ;;  %v2274_v22 = vld [vmem:[%s2603_s1 + $0x50] sm:$0xff]  }
  0x16   : >> { %v208_v13 = vshrl.u32 %v1587_v10, 16  ;;  %v210_v14 = vshll.u32 %v1587_v10, 16  ;;  %v349_v21 = vld [vmem:[%s2203_s7] sm:$0xe]  ;;  %v2281_v23 = vld [vmem:[%s2603_s1 + $0x70] sm:$0xff]   ;;  %v2288_v25 = vld [vmem:[%s2603_s1 + $0x58] sm:$0xff]  }
  0x17   : >> { %1827 = vmatpush3.bf16.msra.mxu0 %v2187_v4  ;;  %v1606_v24 = vcombine.low %v349_v21, %v192_v9  ;;  %v2295_v26 = vld [vmem:[%s2603_s1 + $0x78] sm:$0xff]   ;;  %v2301_v28 = vld [vmem:[%s2603_s1 + $0x80] sm:$0xff]   ;;  %v2304_v29 = vld [vmem:[%s2203_s7 + $0x8] sm:$0xf] }
  0x18   : >> { %1839 = vmatpush3.bf16.msra.mxu1 %v2197_v5  ;;  %1828 = vmatprep.subr.bf16.mxu0 %v2120_v2  ;;  %v212_v15 = vrot.slane %v210_v14, 1  ;;  %v2309_v30 = vld [vmem:[%s2603_s1 + $0xa0] sm:$0xff]   ;;  %v1628_v31 = vld [vmem:[%s2203_s7 + $0x8] sm:$0xf]  ;;  %v1629_v32 = vld [vmem:[%s2203_s7 + $0xc] sm:$0x1] }
  0x19   : >> { %1840 = vmatprep.subr.bf16.mxu1 %v2120_v2  ;;  %v362_v27 = vrot.slane %v1606_v24, 1  ;;  %v1638_v33 = vcombine.low %v1628_v31, %v1629_v32  ;;  %v2324_v34 = vld [vmem:[%s2603_s1 + $0x88] sm:$0xff]   ;;  %v2342_v37 = vld [vmem:[%s2603_s1 + $0x90] sm:$0xff]   ;;  %v2357_v42 = vld [vmem:[%s2603_s1 + $0x98] sm:$0xff]  }
  0x1a   : >> { %v213_v17 = vor.u32 %v212_v15, %v208_v13  ;;  %v2331_v35 = vld [vmem:[%s2603_s1 + $0xa8] sm:$0xff]   ;;  %v2349_v38 = vld [vmem:[%s2603_s1 + $0xb0] sm:$0xff]   ;;  %v2364_v44 = vld [vmem:[%s2603_s1 + $0xb8] sm:$0xff]  }
  0x1b   : >> { %1829 = vmatpush3.bf16.msra.mxu0 %v2209_v6  ;;  %v532_v36 = vshll.u32 %v1638_v33, 16  ;;  %v1644_v39 = vld [vmem:[%s2203_s7 + $0x8] sm:$0xe]  ;;  %v530_v40 = vshrl.u32 %v1638_v33, 16  ;;  %v2375_v47 = vld [vmem:[%s2603_s1 + $0xc0] sm:$0xff]   ;;  %v2413_v54 = vld [vmem:[%s2603_s1 + $0xd0] sm:$0xff]  }
  0x1c   : >> { %1841 = vmatpush3.bf16.msra.mxu1 %v2216_v7  ;;  %1830 = vmatprep.subr.bf16.mxu0 %v2120_v2  ;;  %v1653_v43 = vcombine.low %v1644_v39, %v1629_v32  ;;  %v2382_v48 = vld [vmem:[%s2603_s1 + $0xe0] sm:$0xff]   ;;  %v1675_v49 = vld [vmem:[%s2203_s7 + $0x10] sm:$0xf]  ;;  %v1676_v50 = vld [vmem:[%s2203_s7 + $0x14] sm:$0x1] }
  0x1d   : >> { %1842 = vmatprep.subr.bf16.mxu1 %v2120_v2  ;;  %v534_v41 = vrot.slane %v532_v36, 1  ;;  %v2395_v51 = vld [vmem:[%s2603_s1 + $0xc8] sm:$0xff]   ;;  %v1685_v52 = vcombine.low %v1675_v49, %v1676_v50  ;;  %v2420_v56 = vld [vmem:[%s2603_s1 + $0xf0] sm:$0xff]   ;;  %v2427_v57 = vld [vmem:[%s2603_s1 + $0xd8] sm:$0xff]  }
  0x1e   : >> { %v2370_v46 = vrot.slane %v1653_v43, 1  ;;  %v2402_v53 = vld [vmem:[%s2603_s1 + $0xe8] sm:$0xff]   ;;  %v2434_v60 = vld [vmem:[%s2603_s1 + $0xf8] sm:$0xff]   ;;  %v2439_v61 = vld [vmem:[%s2203_s7 + $0x10] sm:$0xf] }
  0x1f   : >> { %1831 = vmatpush3.bf16.msra.mxu0 %v2225_v11  ;;  %v2367_v45 = vor.u32 %v534_v41, %v530_v40  ;;  %v787_v55 = vshll.u32 %v1685_v52, 16  ;;  %v785_v58 = vshrl.u32 %v1685_v52, 16  ;;  %v2446_v63 = vld [vmem:[%s2603_s1 + $0x100] sm:$0xff]   ;;  %v2472_v9 = vld [vmem:[%s2603_s1 + $0x110] sm:$0xff]   ;;  %v2482_v13 = vld [vmem:[%s2603_s1 + $0x118] sm:$0xff]  }
  0x20   : >> { %1843 = vmatpush3.bf16.msra.mxu1 %v2232_v12  ;;  %1848 = vmatprep.subr.bf16.mxu0 %v2120_v2  ;;  %v1691_v10 = vld [vmem:[%s2203_s7 + $0x10] sm:$0xe] }
  0x21   : >> { %1860 = vmatprep.subr.bf16.mxu1 %v2120_v2  ;;  %v789_v59 = vrot.slane %v787_v55, 1 }
  0x22   : >> { %1833 = vmatmul.mubr.msk.bf16.vlgmr.msra.gmra.mrb[0].mxu0 %vm238_vm1, %v213_v17 }
  0x23   : >> { %1845 = vmatmul.mubr.msk.bf16.vlgmr.msra.gmra.mrb[0].mxu1 %vm238_vm1, %v183_v8  ;;  %1849 = vmatpush3.bf16.msra.mxu0 %v2239_v16  ;;  %v2441_v62 = vor.u32 %v789_v59, %v785_v58  ;;  %v2459_v8 = vld [vmem:[%s2603_s1 + $0x108] sm:$0xff]  }
  0x24   : >> { %1861 = vmatpush3.bf16.msra.mxu1 %v2246_v18  ;;  %1850 = vmatprep.subr.bf16.mxu0 %v2120_v2 }
  0x25   : >> { %1862 = vmatprep.subr.bf16.mxu1 %v2120_v2  ;;  %1856 = vmatprep.mubr.msk.bf16.mxu0 %vm2121_vm0, %v2120_v2 }
  0x26   : >> { %1868 = vmatprep.mubr.msk.bf16.mxu1 %vm2121_vm0, %v2120_v2 }
  0x27   : >> { %1851 = vmatpush3.bf16.msra.mxu0 %v2255_v19 }
  0x28   : >> { %1863 = vmatpush3.bf16.msra.mxu1 %v2262_v20  ;;  %1852 = vmatprep.subr.bf16.mxu0 %v2120_v2 }
  0x29   : >> { %1864 = vmatprep.subr.bf16.mxu1 %v2120_v2 }
  0x2b   : >> { %1853 = vmatpush3.bf16.msra.mxu0 %v2274_v22 }
  0x2c   : >> { %1865 = vmatpush3.bf16.msra.mxu1 %v2281_v23  ;;  %1854 = vmatprep.subr.bf16.mxu0 %v2120_v2 }
  0x2d   : >> { %1866 = vmatprep.subr.bf16.mxu1 %v2120_v2 }
  0x2f   : >> { %1855 = vmatpush3.bf16.msra.mxu0 %v2288_v25 }
  0x30   : >> { %1867 = vmatpush3.bf16.msra.mxu1 %v2295_v26  ;;  %1872 = vmatprep.subr.bf16.mxu0 %v2120_v2 }
  0x31   : >> { %1884 = vmatprep.subr.bf16.mxu1 %v2120_v2 }
  0x32   : >> { %1857 = vmatmul.mubr.msk.bf16.vlgmr.msra.gmra.mrb[4].mxu0 %vm238_vm1, %v362_v27 }
  0x33   : >> { %1869 = vmatmul.mubr.msk.bf16.vlgmr.msra.gmra.mrb[4].mxu1 %vm238_vm1, %v2304_v29  ;;  %1873 = vmatpush3.bf16.msra.mxu0 %v2301_v28 }
  0x34   : >> { %1885 = vmatpush3.bf16.msra.mxu1 %v2309_v30  ;;  %1874 = vmatprep.subr.bf16.mxu0 %v2120_v2 }
  0x35   : >> { %1886 = vmatprep.subr.bf16.mxu1 %v2120_v2  ;;  %1880 = vmatprep.mubr.msk.bf16.mxu0 %vm2121_vm0, %v2120_v2 }
  0x36   : >> { %1892 = vmatprep.mubr.msk.bf16.mxu1 %vm2121_vm0, %v2120_v2 }
  0x37   : >> { %1875 = vmatpush3.bf16.msra.mxu0 %v2324_v34 }
  0x38   : >> { %1887 = vmatpush3.bf16.msra.mxu1 %v2331_v35  ;;  %1876 = vmatprep.subr.bf16.mxu0 %v2120_v2 }
  0x39   : >> { %1888 = vmatprep.subr.bf16.mxu1 %v2120_v2 }
  0x3b   : >> { %1877 = vmatpush3.bf16.msra.mxu0 %v2342_v37 }
  0x3c   : >> { %1889 = vmatpush3.bf16.msra.mxu1 %v2349_v38  ;;  %1878 = vmatprep.subr.bf16.mxu0 %v2120_v2 }
  0x3d   : >> { %1890 = vmatprep.subr.bf16.mxu1 %v2120_v2 }
  0x3f   : >> { %1879 = vmatpush3.bf16.msra.mxu0 %v2357_v42 }
  0x40   : >> { %1891 = vmatpush3.bf16.msra.mxu1 %v2364_v44  ;;  %1896 = vmatprep.subr.bf16.mxu0 %v2120_v2 }
  0x41   : >> { %1908 = vmatprep.subr.bf16.mxu1 %v2120_v2 }
  0x42   : >> { %1881 = vmatmul.mubr.msk.bf16.vlgmr.msra.gmra.mrb[8].mxu0 %vm238_vm1, %v2367_v45 }
  0x43   : >> { %1893 = vmatmul.mubr.msk.bf16.vlgmr.msra.gmra.mrb[8].mxu1 %vm238_vm1, %v2370_v46  ;;  %1897 = vmatpush3.bf16.msra.mxu0 %v2375_v47 }
  0x44   : >> { %1909 = vmatpush3.bf16.msra.mxu1 %v2382_v48  ;;  %1898 = vmatprep.subr.bf16.mxu0 %v2120_v2 }
  0x45   : >> { %1910 = vmatprep.subr.bf16.mxu1 %v2120_v2  ;;  %1904 = vmatprep.mubr.msk.bf16.mxu0 %vm2121_vm0, %v2120_v2 }
  0x46   : >> { %1916 = vmatprep.mubr.msk.bf16.mxu1 %vm2121_vm0, %v2120_v2 }
  0x47   : >> { %1899 = vmatpush3.bf16.msra.mxu0 %v2395_v51 }
  0x48   : >> { %1911 = vmatpush3.bf16.msra.mxu1 %v2402_v53  ;;  %1900 = vmatprep.subr.bf16.mxu0 %v2120_v2 }
  0x49   : >> { %1912 = vmatprep.subr.bf16.mxu1 %v2120_v2 }
  0x4b   : >> { %1901 = vmatpush3.bf16.msra.mxu0 %v2413_v54 }
  0x4c   : >> { %1913 = vmatpush3.bf16.msra.mxu1 %v2420_v56  ;;  %1902 = vmatprep.subr.bf16.mxu0 %v2120_v2 }
  0x4d   : >> { %1914 = vmatprep.subr.bf16.mxu1 %v2120_v2 }
  0x4f   : >> { %1903 = vmatpush3.bf16.msra.mxu0 %v2427_v57 }
  0x50   : >> { %1915 = vmatpush3.bf16.msra.mxu1 %v2434_v60  ;;  %1920 = vmatprep.subr.bf16.mxu0 %v2120_v2 }
  0x51   : >> { %1932 = vmatprep.subr.bf16.mxu1 %v2120_v2 }
  0x52   : >> { %1905 = vmatmul.mubr.msk.bf16.vlgmr.msra.gmra.mrb[12].mxu0 %vm238_vm1, %v2439_v61 }
  0x53   : >> { %1917 = vmatmul.mubr.msk.bf16.vlgmr.msra.gmra.mrb[12].mxu1 %vm238_vm1, %v2441_v62  ;;  %1921 = vmatpush3.bf16.msra.mxu0 %v2446_v63 }
  0x54   : >> { %1933 = vmatpush3.bf16.msra.mxu1 %v2174_v1  ;;  %1922 = vmatprep.subr.bf16.mxu0 %v2120_v2  ;;  %v1700_v1 = vcombine.low %v1691_v10, %v1676_v50 }
  0x55   : >> { %1934 = vmatprep.subr.bf16.mxu1 %v2120_v2  ;;  %1928 = vmatprep.mubr.msk.bf16.mxu0 %vm2121_vm0, %v2120_v2 }
  0x56   : >> { %1940 = vmatprep.mubr.msk.bf16.mxu1 %vm2121_vm0, %v2120_v2  ;;  %v2487_v14 = vrot.slane %v1700_v1, 1 }
  0x57   : >> { %1923 = vmatpush3.bf16.msra.mxu0 %v2459_v8 }
  0x58   : >> { %1935 = vmatpush3.bf16.msra.mxu1 %v2187_v4  ;;  %1924 = vmatprep.subr.bf16.mxu0 %v2120_v2  ;;  %v1718_v4 = vld [vmem:[%s2203_s7 + $0x1c] sm:$0x1] }
  0x59   : >> { %1936 = vmatprep.subr.bf16.mxu1 %v2120_v2 }
  0x5b   : >> { %1925 = vmatpush3.bf16.msra.mxu0 %v2472_v9 }
  0x5c   : >> { %1937 = vmatpush3.bf16.msra.mxu1 %v2209_v6  ;;  %1926 = vmatprep.subr.bf16.mxu0 %v2120_v2 }
  0x5d   : >> { %1938 = vmatprep.subr.bf16.mxu1 %v2120_v2 }
  0x5f   : >> { %1927 = vmatpush3.bf16.msra.mxu0 %v2482_v13 }
  0x60   : >> { %1939 = vmatpush3.bf16.msra.mxu1 %v2225_v11  ;;  %1944 = vmatprep.subr.bf16.mxu0 %v2120_v2  ;;  %v1721_v11 = vld [vmem:[%s2203_s7 + $0x18] sm:$0xe] }
  0x61   : >> { %1956 = vmatprep.subr.bf16.mxu1 %v2120_v2 }
  0x62   : >> { %1929 = vmatmul.mubr.msk.bf16.vlgmr.msra.gmra.mrb[16].mxu0 %vm238_vm1, %v2487_v14 }
  0x63   : >> { %1941 = vmatmul.mubr.msk.bf16.vlgmr.msra.gmra.mrb[16].mxu1 %vm238_vm1, %v2367_v45  ;;  %1945 = vmatpush3.bf16.msra.mxu0 %v2181_v3  ;;  %v1717_v3 = vld [vmem:[%s2203_s7 + $0x18] sm:$0xf] }
  0x64   : >> { %1957 = vmatpush3.bf16.msra.mxu1 %v2239_v16  ;;  %1946 = vmatprep.subr.bf16.mxu0 %v2120_v2  ;;  %v1719_v6 = vcombine.low %v1717_v3, %v1718_v4  ;;  %v1722_v16 = vcombine.low %v1721_v11, %v1718_v4 }
  0x65   : >> { %1958 = vmatprep.subr.bf16.mxu1 %v2120_v2  ;;  %1952 = vmatprep.mubr.msk.bf16.mxu0 %vm2121_vm0, %v2120_v2 }
  0x66   : >> { %1964 = vmatprep.mubr.msk.bf16.mxu1 %vm2121_vm0, %v2120_v2 }
  0x67   : >> { %1947 = vmatpush3.bf16.msra.mxu0 %v2197_v5  ;;  %v1715_v5 = vld [vmem:[%s2203_s7 + $0x18] sm:$0xf]  ;;  %s1724_s7 = sshll.u32 %s2118_s24, 1  ;;  %s178_s24 = sadd.s32 1, %s2118_s24  }
  0x68   : >> { %1959 = vmatpush3.bf16.msra.mxu1 %v2255_v19  ;;  %1948 = vmatprep.subr.bf16.mxu0 %v2120_v2  ;;  %s1490_s5 = scalar_lea.vmem %s2159_s20, %s1724_s7  ;;  %p175_p4 = scmp.ge.s32.totalorder %s178_s24, 4  }
  0x69   : >> { %1960 = vmatprep.subr.bf16.mxu1 %v2120_v2 }
  0x6b   : >> { %1949 = vmatpush3.bf16.msra.mxu0 %v2216_v7  ;;  %v1252_v7 = vshll.u32 %v1719_v6, 16 }
  0x6c   : >> { %1961 = vmatpush3.bf16.msra.mxu1 %v2274_v22  ;;  %1950 = vmatprep.subr.bf16.mxu0 %v2120_v2 }
  0x6d   : >> { %1962 = vmatprep.subr.bf16.mxu1 %v2120_v2  ;;  %v1254_v15 = vrot.slane %v1252_v7, 1 }
  0x6f   : >> { %1951 = vmatpush3.bf16.msra.mxu0 %v2232_v12  ;;  %v1250_v12 = vshrl.u32 %v1719_v6, 16 }
  0x70   : >> { %1963 = vmatpush3.bf16.msra.mxu1 %v2288_v25  ;;  %1968 = vmatprep.subr.bf16.mxu0 %v2120_v2 }
  0x71   : >> { %1980 = vmatprep.subr.bf16.mxu1 %v2120_v2  ;;  %v1255_v17 = vor.u32 %v1254_v15, %v1250_v12 }
  0x72   : >> { %1953 = vmatmul.mubr.msk.bf16.vlgmr.msra.gmra.mrb[20].mxu0 %vm238_vm1, %v2304_v29 }
  0x73   : >> { %1965 = vmatmul.mubr.msk.bf16.vlgmr.msra.gmra.mrb[20].mxu1 %vm238_vm1, %v2370_v46  ;;  %1969 = vmatpush3.bf16.msra.mxu0 %v2246_v18  ;;  %v1304_v18 = vrot.slane %v1722_v16, 1 }
  0x74   : >> { %1981 = vmatpush3.bf16.msra.mxu1 %v2301_v28  ;;  %1970 = vmatprep.subr.bf16.mxu0 %v2120_v2 }
  0x75   : >> { %1982 = vmatprep.subr.bf16.mxu1 %v2120_v2  ;;  %1976 = vmatprep.mubr.msk.bf16.mxu0 %vm2121_vm0, %v2120_v2 }
  0x76   : >> { %1988 = vmatprep.mubr.msk.bf16.mxu1 %vm2121_vm0, %v2120_v2 }
  0x77   : >> { %1971 = vmatpush3.bf16.msra.mxu0 %v2262_v20 }
  0x78   : >> { %1983 = vmatpush3.bf16.msra.mxu1 %v2324_v34  ;;  %1972 = vmatprep.subr.bf16.mxu0 %v2120_v2 }
  0x79   : >> { %1984 = vmatprep.subr.bf16.mxu1 %v2120_v2 }
  0x7b   : >> { %1973 = vmatpush3.bf16.msra.mxu0 %v2281_v23 }
  0x7c   : >> { %1985 = vmatpush3.bf16.msra.mxu1 %v2342_v37  ;;  %1974 = vmatprep.subr.bf16.mxu0 %v2120_v2 }
  0x7d   : >> { %1986 = vmatprep.subr.bf16.mxu1 %v2120_v2 }
  0x7f   : >> { %1975 = vmatpush3.bf16.msra.mxu0 %v2295_v26 }
  0x80   : >> { %1987 = vmatpush3.bf16.msra.mxu1 %v2357_v42  ;;  %1992 = vmatprep.subr.bf16.mxu0 %v2120_v2 }
  0x81   : >> { %2004 = vmatprep.subr.bf16.mxu1 %v2120_v2 }
  0x82   : >> { %1977 = vmatmul.mubr.msk.bf16.vlgmr.msra.gmra.mrb[24].mxu0 %vm238_vm1, %v2439_v61 }
  0x83   : >> { %1989 = vmatmul.mubr.msk.bf16.vlgmr.msra.gmra.mrb[24].mxu1 %vm238_vm1, %v2441_v62  ;;  %1993 = vmatpush3.bf16.msra.mxu0 %v2309_v30 }
  0x84   : >> { %2005 = vmatpush3.bf16.msra.mxu1 %v2375_v47  ;;  %1994 = vmatprep.subr.bf16.mxu0 %v2120_v2 }
  0x85   : >> { %2006 = vmatprep.subr.bf16.mxu1 %v2120_v2  ;;  %2000 = vmatprep.mubr.msk.bf16.mxu0 %vm2121_vm0, %v2120_v2 }
  0x86   : >> { %2012 = vmatprep.mubr.msk.bf16.mxu1 %vm2121_vm0, %v2120_v2 }
  0x87   : >> { %1995 = vmatpush3.bf16.msra.mxu0 %v2331_v35 }
  0x88   : >> { %2007 = vmatpush3.bf16.msra.mxu1 %v2395_v51  ;;  %1996 = vmatprep.subr.bf16.mxu0 %v2120_v2 }
  0x89   : >> { %2008 = vmatprep.subr.bf16.mxu1 %v2120_v2 }
  0x8b   : >> { %1997 = vmatpush3.bf16.msra.mxu0 %v2349_v38 }
  0x8c   : >> { %2009 = vmatpush3.bf16.msra.mxu1 %v2413_v54  ;;  %1998 = vmatprep.subr.bf16.mxu0 %v2120_v2 }
  0x8d   : >> { %2010 = vmatprep.subr.bf16.mxu1 %v2120_v2 }
  0x8f   : >> { %1999 = vmatpush3.bf16.msra.mxu0 %v2364_v44 }
  0x90   : >> { %2011 = vmatpush3.bf16.msra.mxu1 %v2427_v57  ;;  %2016 = vmatprep.subr.bf16.mxu0 %v2120_v2 }
  0x91   : >> { %2028 = vmatprep.subr.bf16.mxu1 %v2120_v2 }
  0x92   : >> { %2001 = vmatmul.mubr.msk.bf16.vlgmr.msra.gmra.mrb[28].mxu0 %vm238_vm1, %v2487_v14 }
  0x93   : >> { %2013 = vmatmul.mubr.msk.bf16.vlgmr.msra.gmra.mrb[28].mxu1 %vm238_vm1, %v1715_v5  ;;  %2017 = vmatpush3.bf16.msra.mxu0 %v2382_v48 }
  0x94   : >> { %2029 = vmatpush3.bf16.msra.mxu1 %v2446_v63  ;;  %2018 = vmatprep.subr.bf16.mxu0 %v2120_v2 }
  0x95   : >> { %2030 = vmatprep.subr.bf16.mxu1 %v2120_v2  ;;  %2024 = vmatprep.mubr.msk.bf16.mxu0 %vm2121_vm0, %v2120_v2 }
  0x96   : >> { %2036 = vmatprep.mubr.msk.bf16.mxu1 %vm2121_vm0, %v2120_v2 }
  0x97   : >> { %2019 = vmatpush3.bf16.msra.mxu0 %v2402_v53 }
  0x98   : >> { %2031 = vmatpush3.bf16.msra.mxu1 %v2459_v8  ;;  %2020 = vmatprep.subr.bf16.mxu0 %v2120_v2 }
  0x99   : >> { %2032 = vmatprep.subr.bf16.mxu1 %v2120_v2 }
  0x9b   : >> { %2021 = vmatpush3.bf16.msra.mxu0 %v2420_v56 }
  0x9c   : >> { %2033 = vmatpush3.bf16.msra.mxu1 %v2472_v9  ;;  %2022 = vmatprep.subr.bf16.mxu0 %v2120_v2 }
  0x9d   : >> { %2034 = vmatprep.subr.bf16.mxu1 %v2120_v2 }
  0x9f   : >> { %2023 = vmatpush3.bf16.msra.mxu0 %v2434_v60 }
  0xa0   : >> { %2035 = vmatpush3.bf16.msra.mxu1 %v2482_v13 }
  0xa2   : >> { %2025 = vmatmul.mubr.msk.bf16.vlgmr.msra.gmra.mrb[32].mxu0 %vm238_vm1, %v1255_v17 }
  0xa3   : >> { %2037 = vmatmul.mubr.msk.bf16.vlgmr.msra.gmra.mrb[32].mxu1 %vm238_vm1, %v1304_v18 }
  0xf5   : >> { %v276_v19 = vpop.f32.mrb[0].mxu0 }
  0xf6   : >> { %v343_v20 = vpop.f32.mrb[0].mxu1  ;;  %v1834_v21 = vpop.f32.mrb[1].mxu0 }
  0xf7   : >> { %v344_v22 = vadd.f32 %v343_v20, %v276_v19  ;;  %v1846_v23 = vpop.f32.mrb[1].mxu1  ;;  %v279_v24 = vpop.f32.mrb[2].mxu0 }
  0xf8   : >> { %v346_v25 = vpop.f32.mrb[2].mxu1  ;;  %v1835_v26 = vpop.f32.mrb[3].mxu0 }
  0xf9   : >> { %v1847_v27 = vpop.f32.mrb[3].mxu1 }
 0x105   : >> { %v424_v2 = vpop.f32.mrb[4].mxu0 }
 0x106   : >> { %v430_v28 = vadd.f32 %v424_v2, %v344_v22  ;;  %v506_v29 = vpop.f32.mrb[4].mxu1  ;;  %v1858_v30 = vpop.f32.mrb[5].mxu0 }
 0x107   : >> { %v1870_v31 = vpop.f32.mrb[5].mxu1  ;;  %v427_v32 = vpop.f32.mrb[6].mxu0 }
 0x108   : >> { %v512_v33 = vadd.f32 %v506_v29, %v430_v28  ;;  %v509_v34 = vpop.f32.mrb[6].mxu1  ;;  %v1859_v35 = vpop.f32.mrb[7].mxu0 }
 0x109   : >> { %v1871_v36 = vpop.f32.mrb[7].mxu1  ;;  %v1357_v35 = vlaneseq }
 0x115   : >> { %v597_v37 = vpop.f32.mrb[8].mxu0 }
 0x116   : >> { %v603_v38 = vadd.f32 %v597_v37, %v512_v33  ;;  %v679_v39 = vpop.f32.mrb[8].mxu1  ;;  %v1882_v40 = vpop.f32.mrb[9].mxu0  ;;  %v2122_v33 = vmov 1983009808  }
 0x117   : >> { %v1894_v41 = vpop.f32.mrb[9].mxu1  ;;  %v600_v42 = vpop.f32.mrb[10].mxu0  ;;  %v1355_v34 = vunpack.c.l.s4 %v2122_v33 }
 0x118   : >> { %v685_v43 = vadd.f32 %v679_v39, %v603_v38  ;;  %v682_v44 = vpop.f32.mrb[10].mxu1  ;;  %v1883_v45 = vpop.f32.mrb[11].mxu0 }
 0x119   : >> { %v1895_v46 = vpop.f32.mrb[11].mxu1  ;;  %v1356_v44 = vunpack.c.0.s8 %v1355_v34  ;;  %v1358_v45 = vshrl.u32 %v1357_v35, 7 }
 0x125   : >> { %v761_v47 = vpop.f32.mrb[12].mxu0 }
 0x126   : >> { %v767_v48 = vadd.f32 %v761_v47, %v685_v43  ;;  %v852_v49 = vpop.f32.mrb[12].mxu1  ;;  %v1906_v50 = vpop.f32.mrb[13].mxu0 }
 0x127   : >> { %v1918_v51 = vpop.f32.mrb[13].mxu1  ;;  %v764_v52 = vpop.f32.mrb[14].mxu0 }
 0x128   : >> { %v858_v53 = vadd.f32 %v852_v49, %v767_v48  ;;  %v855_v54 = vpop.f32.mrb[14].mxu1  ;;  %v1907_v55 = vpop.f32.mrb[15].mxu0  ;;  %v1359_v52 = vsub.s32 %v1356_v44, %v1358_v45 }
 0x129   : >> { %v1919_v56 = vpop.f32.mrb[15].mxu1 }
 0x135   : >> { %v934_v57 = vpop.f32.mrb[16].mxu0 }
 0x136   : >> { %v940_v58 = vadd.f32 %v934_v57, %v858_v53  ;;  %v983_v59 = vpop.f32.mrb[16].mxu1  ;;  %v1930_v60 = vpop.f32.mrb[17].mxu0 }
 0x137   : >> { %v1942_v61 = vpop.f32.mrb[17].mxu1  ;;  %v937_v62 = vpop.f32.mrb[18].mxu0 }
 0x138   : >> { %v986_v63 = vpop.f32.mrb[18].mxu1  ;;  %v1931_v8 = vpop.f32.mrb[19].mxu0  ;;  %v947_v42 = vadd.f32 %v2154_v0, %v940_v58 }
 0x139   : >> { %v1943_v9 = vpop.f32.mrb[19].mxu1 }
 0x13a   : >> { %v948_v50 = vmax.f32 %v947_v42, 0.0 }
 0x145   : >> { %v1023_v10 = vpop.f32.mrb[20].mxu0 }
 0x146   : >> { %v1024_v1 = vadd.f32 %v1023_v10, %v983_v59  ;;  %v1063_v13 = vpop.f32.mrb[20].mxu1  ;;  %v1954_v14 = vpop.f32.mrb[21].mxu0 }
 0x147   : >> { %v1966_v3 = vpop.f32.mrb[21].mxu1  ;;  %v1026_v4 = vpop.f32.mrb[22].mxu0 }
 0x148   : >> { %v1069_v5 = vadd.f32 %v1063_v13, %v1024_v1  ;;  %v1066_v6 = vpop.f32.mrb[22].mxu1  ;;  %v1955_v7 = vpop.f32.mrb[23].mxu0 }
 0x149   : >> { %v1967_v11 = vpop.f32.mrb[23].mxu1 }
 0x155   : >> { %v1104_v12 = vpop.f32.mrb[24].mxu0 }
 0x156   : >> { %v1110_v15 = vadd.f32 %v1104_v12, %v1069_v5  ;;  %v1145_v16 = vpop.f32.mrb[24].mxu1  ;;  %v1978_v17 = vpop.f32.mrb[25].mxu0 }
 0x157   : >> { %v1990_v18 = vpop.f32.mrb[25].mxu1  ;;  %v1107_v19 = vpop.f32.mrb[26].mxu0 }
 0x158   : >> { %v1151_v20 = vadd.f32 %v1145_v16, %v1110_v15  ;;  %v1148_v21 = vpop.f32.mrb[26].mxu1  ;;  %v1979_v22 = vpop.f32.mrb[27].mxu0 }
 0x159   : >> { %v1991_v23 = vpop.f32.mrb[27].mxu1 }
 0x165   : >> { %v1186_v24 = vpop.f32.mrb[28].mxu0 }
 0x166   : >> { %v1192_v25 = vadd.f32 %v1186_v24, %v1151_v20  ;;  %v1235_v26 = vpop.f32.mrb[28].mxu1  ;;  %v2002_v27 = vpop.f32.mrb[29].mxu0 }
 0x167   : >> { %v2014_v2 = vpop.f32.mrb[29].mxu1  ;;  %v1189_v28 = vpop.f32.mrb[30].mxu0 }
 0x168   : >> { %v1241_v29 = vadd.f32 %v1235_v26, %v1192_v25  ;;  %v1238_v30 = vpop.f32.mrb[30].mxu1  ;;  %v2003_v31 = vpop.f32.mrb[31].mxu0 }
 0x169   : >> { %v2015_v32 = vpop.f32.mrb[31].mxu1 }
 0x175   : >> { %v1293_v36 = vpop.f32.mrb[32].mxu0 }
 0x176   : >> { %v1299_v37 = vadd.f32 %v1293_v36, %v1241_v29  ;;  %v1342_v38 = vpop.f32.mrb[32].mxu1  ;;  %v2026_v39 = vpop.f32.mrb[33].mxu0 }
 0x177   : >> { %v2038_v40 = vpop.f32.mrb[33].mxu1  ;;  %v1296_v41 = vpop.f32.mrb[34].mxu0 }
 0x178   : >> { %v1348_v43 = vadd.f32 %v1342_v38, %v1299_v37  ;;  %v1345_v46 = vpop.f32.mrb[34].mxu1  ;;  %v2027_v47 = vpop.f32.mrb[35].mxu0 }
 0x179   : >> { %v2039_v48 = vpop.f32.mrb[35].mxu1 }
 0x17a   : >> { %v1349_v49 = vadd.f32 %v2154_v0, %v1348_v43 }
 0x17c   : >> { %v1350_v51 = vmax.f32 %v1349_v49, 0.0 }
 0x17e   : >> { %v1351_v53 = vmax.f32 %v948_v50, %v1350_v51 }
 0x180   : >> { %v1353_v54 = vcombine.high %v1351_v53, %v1351_v53  ;;  %v1360_v55 = vrot.slane %v1351_v53, %v1359_v52 }
 0x182   : >> { %v1367_v56 = vrot.slane %v1353_v54, %v1359_v52  ;;  %v1368_v57 = vcombine.high %v1360_v55, %v1360_v55  ;;  %v1375_v59 = vsel %vm1374_vm2, %v1360_v55, -inf }
 0x183   : >> { %v1376_v60 = vrot.slane %v1375_v59, 4 }
 0x184   : >> { %v1369_v58 = vcombine.high %v1367_v56, %v1367_v56  ;;  %v1382_v61 = vsel %vm1374_vm2, %v1368_v57, -inf  ;;  %v1389_v62 = vsel %vm1374_vm2, %v1367_v56, -inf }
 0x185   : >> { %v1377_v63 = vmax.f32 %v1375_v59, %v1376_v60  ;;  %v1383_v8 = vrot.slane %v1382_v61, 4  ;;  %v1390_v9 = vrot.slane %v1389_v62, 4 }
 0x186   : >> { %v1396_v10 = vsel %vm1374_vm2, %v1369_v58, -inf }
 0x187   : >> { %v1378_v1 = vrot.slane %v1377_v63, 2  ;;  %v1384_v13 = vmax.f32 %v1382_v61, %v1383_v8  ;;  %v1391_v14 = vmax.f32 %v1389_v62, %v1390_v9  ;;  %v1397_v3 = vrot.slane %v1396_v10, 4 }
 0x189   : >> { %v1379_v4 = vmax.f32 %v1377_v63, %v1378_v1  ;;  %v1385_v5 = vrot.slane %v1384_v13, 2  ;;  %v1392_v6 = vrot.slane %v1391_v14, 2  ;;  %v1398_v7 = vmax.f32 %v1396_v10, %v1397_v3 }
 0x18b   : >> { %v1380_v11 = vrot.slane %v1379_v4, 1  ;;  %v1386_v12 = vmax.f32 %v1384_v13, %v1385_v5  ;;  %v1393_v15 = vmax.f32 %v1391_v14, %v1392_v6  ;;  %v1399_v16 = vrot.slane %v1398_v7, 2 }
 0x18d   : >> { %v1381_v17 = vmax.f32 %v1379_v4, %v1380_v11  ;;  %v1387_v18 = vrot.slane %v1386_v12, 1  ;;  %v1394_v19 = vrot.slane %v1393_v15, 1  ;;  %v1400_v20 = vmax.f32 %v1398_v7, %v1399_v16 }
 0x18f   : >> { %v1388_v21 = vmax.f32 %v1386_v12, %v1387_v18  ;;  %v1395_v22 = vmax.f32 %v1393_v15, %v1394_v19  ;;  %v1401_v23 = vrot.slane %v1400_v20, 1  ;;  %v1403_v24 = vpack.c.bf16 %v1381_v17, %v1381_v17 }
 0x191   : >> { %v1402_v25 = vmax.f32 %v1400_v20, %v1401_v23  ;;  %v1404_v26 = vpack.c.bf16 %v1388_v21, %v1388_v21  ;;  %v1405_v27 = vpack.c.bf16 %v1395_v22, %v1395_v22  ;;  %v1417_v2 = vrot.slane %v1403_v24, %v1359_v52 }
 0x193   : >> { %v1406_v28 = vpack.c.bf16 %v1402_v25, %v1402_v25  ;;  %v1424_v29 = vrot.slane %v1404_v26, %v1359_v52  ;;  %v1431_v30 = vrot.slane %v1405_v27, %v1359_v52  ;;  %v1445_v32 = vrot.slane %v1417_v2, %v1359_v52 }
 0x195   : >> { %v1438_v31 = vrot.slane %v1406_v28, %v1359_v52  ;;  %v1452_v33 = vrot.slane %v1424_v29, %v1359_v52  ;;  %v1459_v34 = vrot.slane %v1431_v30, %v1359_v52  ;;  %v1467_v38 = vunpack.c.l.b16 %v1445_v32 }
 0x197   : >> { %v1466_v35 = vrot.slane %v1438_v31, %v1359_v52  ;;  %v1468_v36 = vunpack.c.l.b16 %v1452_v33  ;;  %v1469_v37 = vunpack.c.l.b16 %v1459_v34 }
 0x199   : >> { %v1470_v39 = vunpack.c.l.b16 %v1466_v35  ;;  %v1471_v40 = vrot.slane %v1468_v36, 7  ;;  %v1474_v41 = vrot.slane %v1469_v37, 6 }
 0x19a   : > { %177 = sbr.rel (!%p175_p4) target bundleno = 17 (0x11), region = 82 }
 0x19b   : >> { %v1473_v42 = vsel %vm1472_vm3, %v1471_v40, %v1467_v38  ;;  %v1477_v43 = vrot.slane %v1470_v39, 5 }
 0x19c   : >> { %v1476_v44 = vsel %vm1475_vm4, %v1474_v41, %v1473_v42 }
 0x19d   : >> { %v1479_v45 = vsel %vm1478_vm5, %v1477_v43, %v1476_v44 }
 0x19e   : >> { %v1480_v46 = vpack.c.b16 %v1479_v45, %v1479_v45 }
 0x1a0   : >> { %1725 = vst.sshfl [vmem:[%s1490_s5] sm:$0x3 pattern:$0x76325410] %v1480_v46 }
 0x1a1 PF: > { %s13_s12 = sadd.s32 1, %s2114_s12  }
 0x1a2   : > { %p10_p5 = scmp.ge.s32.totalorder %s13_s12, 4  }
 0x1a4   :  { %12 = sbr.rel (!%p10_p5) target bundleno = 1 (0x1), region = 93 }

// kernel: crnn_forward.13
= control target key start
LH: loop header
LB: loop body
LE: loop exit
PB: predicated region body
PF: predicated region fallthrough
CT: control target
= control target key end

     0   :  { %s2749_s12 = smov 0   ;;  %s3866_s0 = inlined_call_operand.vmem [shape: bf16[2,6,6,128], index: 0, kind: input, shape index: {}]   ;;  %s3867_s1 = inlined_call_operand.vmem [shape: bf16[9,128,256], index: 1, kind: input, shape index: {}]   ;;  %s3868_s2 = inlined_call_operand.vmem [shape: f32[1,256], index: 2, kind: input, shape index: {}]   ;;  %s3869_s3 = inlined_call_operand.vmem [shape: bf16[2,2,2,256], index: 3, kind: output, shape index: {}]  }
   0x1 LB: > { %s2151_s13 = sadd.s32 4294967295, %s2719_s12   ;;  %p2155_p0 = scmp.ge.s32.totalorder %s2719_s12, 1  ;;  %s2719_s12 = sphi %s2749_s12, %s13_s12  }
   0x2   : > { %p137_p1 = scmp.lt.s32.totalorder %s2719_s12, 3 }
   0x4   : > { %p138_p2 = pnand %p2155_p0, %p137_p1 }
   0x5   : > { %p160_p3 = scmp.lt.s32.totalorder (!%p138_p2), %s2151_s13, 1  ;;  %v2760_v0 = vld [vmem:[%s3868_s2] sm:$0x3] (!%p138_p2)  ;;  %s2772_s24 = smov (!%p138_p2), 0  }
   0x6   : > { %141 = sbr.rel (%p138_p2) target bundleno = 573 (0x23d), region = 32  ;;  %3949 = vst [vmem:[#allocation2_spill] sm:$0xff] (!%p138_p2), %v2760_v0 }
   0xd   : > { %s4104_s13 = smov (!%p160_p3, %s2151_s13), 1 }
   0xe   : > { %s2464_s16 = smul.u32 24, %s4104_s13  ;;  %s2157_s17 = sshll.u32 %s4104_s13, 2 }
   0xf   : > { %s2765_s20 = scalar_lea.vmem %s3869_s3, %s2157_s17 }
  0x10   : > { %s2770_s23 = scalar_lea.vmem %s3866_s0, %s2464_s16 }
  0x11 LB: >> { %v2780_v1 = vld [vmem:[%s3867_s1 + $0x84] ss:$8 sps:$4 sm:$0xff]   ;;  %v3870_v3 = vmov 0   ;;  %v2793_v4 = vld [vmem:[%s3867_s1 + $0x80] ss:$8 sps:$4 sm:$0xff]   ;;  %s2460_s18 = sshll.u32 %s2723_s24, 3  ;;  %s2723_s24 = sphi %s2772_s24, %s176_s24  }
  0x12   : >> { %v2785_v2 = vld [vmem:[%s3867_s1 + $0x4] ss:$8 sps:$4 sm:$0xff]   ;;  %338 = vmatprep.mubr.bf16.mxu0 %v3870_v3  ;;  %459 = vmatprep.mubr.bf16.mxu1 %v3870_v3  ;;  %v2798_v5 = vld [vmem:[%s3867_s1] ss:$8 sps:$4 sm:$0xff]   ;;  %v2804_v6 = vld [vmem:[%s3867_s1 + $0x94] ss:$8 sps:$4 sm:$0xff]   ;;  %s2909_s22 = scalar_lea.vmem %s2770_s23, %s2460_s18 }
  0x13   : >> { %306 = vmatprep.subr.bf16.mxu0 %v2780_v1  ;;  %427 = vmatprep.subr.bf16.mxu1 %v2785_v2  ;;  %v2811_v7 = vld [vmem:[%s3867_s1 + $0x14] ss:$8 sps:$4 sm:$0xff]   ;;  %v2816_v8 = vld [vmem:[%s3867_s1 + $0x90] ss:$8 sps:$4 sm:$0xff]   ;;  %v2828_v10 = vld [vmem:[%s3867_s1 + $0xa4] ss:$8 sps:$4 sm:$0xff]  }
  0x14   : >> { %307 = vmatpush1.bf16.msra.mxu0 %v2793_v4  ;;  %428 = vmatpush1.bf16.msra.mxu1 %v2798_v5  ;;  %v2822_v9 = vld [vmem:[%s3867_s1 + $0x10] ss:$8 sps:$4 sm:$0xff]   ;;  %v2833_v11 = vld [vmem:[%s3867_s1 + $0x24] ss:$8 sps:$4 sm:$0xff]   ;;  %v2838_v12 = vld [vmem:[%s3867_s1 + $0xa0] ss:$8 sps:$4 sm:$0xff]  }
  0x15   : >> { %308 = vmatprep.subr.bf16.mxu0 %v2804_v6  ;;  %429 = vmatprep.subr.bf16.mxu1 %v2811_v7  ;;  %v2843_v13 = vld [vmem:[%s3867_s1 + $0x20] ss:$8 sps:$4 sm:$0xff]   ;;  %v2850_v14 = vld [vmem:[%s3867_s1 + $0xb4] ss:$8 sps:$4 sm:$0xff]   ;;  %v2862_v16 = vld [vmem:[%s3867_s1 + $0xb0] ss:$8 sps:$4 sm:$0xff]  }
  0x16   : >> { %v2857_v15 = vld [vmem:[%s3867_s1 + $0x34] ss:$8 sps:$4 sm:$0xff]   ;;  %v2869_v17 = vld [vmem:[%s3867_s1 + $0x30] ss:$8 sps:$4 sm:$0xff]   ;;  %v2874_v18 = vld [vmem:[%s3867_s1 + $0xc4] ss:$8 sps:$4 sm:$0xff]  }
  0x17   : >> { %v2881_v19 = vld [vmem:[%s3867_s1 + $0x44] ss:$8 sps:$4 sm:$0xff]   ;;  %v2886_v20 = vld [vmem:[%s3867_s1 + $0xc0] ss:$8 sps:$4 sm:$0xff]   ;;  %v2898_v22 = vld [vmem:[%s3867_s1 + $0xd4] ss:$8 sps:$4 sm:$0xff]  }
  0x18   : >> { %309 = vmatpush1.bf16.msra.mxu0 %v2816_v8  ;;  %430 = vmatpush1.bf16.msra.mxu1 %v2822_v9  ;;  %v2891_v21 = vld [vmem:[%s3867_s1 + $0x40] ss:$8 sps:$4 sm:$0xff]   ;;  %v2906_v23 = vld [vmem:[%s3867_s1 + $0x54] ss:$8 sps:$4 sm:$0xff]   ;;  %v2916_v24 = vld [vmem:[%s3867_s1 + $0xd0] ss:$8 sps:$4 sm:$0xff]  }
  0x19   : >> { %310 = vmatprep.subr.bf16.mxu0 %v2828_v10  ;;  %431 = vmatprep.subr.bf16.mxu1 %v2833_v11  ;;  %v2921_v25 = vld [vmem:[%s3867_s1 + $0x50] ss:$8 sps:$4 sm:$0xff]   ;;  %v2928_v26 = vld [vmem:[%s3867_s1 + $0xe4] ss:$8 sps:$4 sm:$0xff]   ;;  %v2939_v29 = vld [vmem:[%s3867_s1 + $0xe0] ss:$8 sps:$4 sm:$0xff]  }
  0x1a   : >> { %v2933_v27 = vld [vmem:[%s3867_s1 + $0x64] ss:$8 sps:$4 sm:$0xff]   ;;  %v2533_v28 = vld [vmem:[%s2909_s22] ss:$0 sps:$4 sm:$0x77]   ;;  %vm1955_vm0 = vcmask 1041408  }
  0x1b   : >> { %v2946_v30 = vld [vmem:[%s3867_s1 + $0x60] ss:$8 sps:$4 sm:$0xff]   ;;  %v221_v31 = vshll.u32 %v2533_v28, 16  ;;  %v2953_v32 = vld [vmem:[%s3867_s1 + $0xf4] ss:$8 sps:$4 sm:$0xff]   ;;  %v219_v35 = vshrl.u32 %v2533_v28, 16 }
  0x1c   : >> { %311 = vmatpush1.bf16.msra.mxu0 %v2838_v12  ;;  %432 = vmatpush1.bf16.msra.mxu1 %v2843_v13  ;;  %v2958_v33 = vld [vmem:[%s3867_s1 + $0x74] ss:$8 sps:$4 sm:$0xff]   ;;  %v2963_v34 = vld [vmem:[%s3867_s1 + $0xf0] ss:$8 sps:$4 sm:$0xff]   ;;  %v2975_v38 = vld [vmem:[%s3867_s1 + $0x104] ss:$8 sps:$4 sm:$0xff]  }
  0x1d   : >> { %312 = vmatprep.subr.bf16.mxu0 %v2850_v14  ;;  %433 = vmatprep.subr.bf16.mxu1 %v2857_v15  ;;  %v223_v36 = vrot.slane %v221_v31, 1  ;;  %v2970_v37 = vld [vmem:[%s3867_s1 + $0x70] ss:$8 sps:$4 sm:$0xff]   ;;  %v2982_v39 = vld [vmem:[%s3867_s1 + $0x184] ss:$8 sps:$4 sm:$0xff]   ;;  %vm2055_vm1 = vcmask 1041409  }
  0x1e   : >> { %v180_v41 = vld [vmem:[%s2909_s22] sm:$0x3]  ;;  %v3000_v44 = vld [vmem:[%s3867_s1 + $0x114] ss:$8 sps:$4 sm:$0xff]   ;;  %v3012_v46 = vld [vmem:[%s3867_s1 + $0x110] ss:$8 sps:$4 sm:$0xff]  }
  0x1f   : >> { %v224_v40 = vor.u32 %v223_v36, %v219_v35  ;;  %v2988_v42 = vld [vmem:[%s3867_s1 + $0x100] ss:$8 sps:$4 sm:$0xff]   ;;  %v3007_v45 = vld [vmem:[%s3867_s1 + $0x194] ss:$8 sps:$4 sm:$0xff]   ;;  %v3019_v47 = vld [vmem:[%s3867_s1 + $0x190] ss:$8 sps:$4 sm:$0xff]  }
  0x20   : >> { %313 = vmatpush1.bf16.msra.mxu0 %v2862_v16  ;;  %434 = vmatpush1.bf16.msra.mxu1 %v2869_v17  ;;  %v2995_v43 = vld [vmem:[%s3867_s1 + $0x180] ss:$8 sps:$4 sm:$0xff]   ;;  %3951 = vst [vmem:[#allocation4_spill] sm:$0xff] %v3007_v45  ;;  %3952 = vst [vmem:[#allocation5_spill] sm:$0xff] %v3019_v47  ;;  %v3024_v48 = vld [vmem:[%s3867_s1 + $0x124] ss:$8 sps:$4 sm:$0xff]  }
  0x21   : >> { %314 = vmatprep.subr.bf16.mxu0 %v2874_v18  ;;  %435 = vmatprep.subr.bf16.mxu1 %v2881_v19  ;;  %3950 = vst [vmem:[#allocation3_spill] sm:$0xff] %v2995_v43  ;;  %v3031_v49 = vld [vmem:[%s3867_s1 + $0x1a4] ss:$8 sps:$4 sm:$0xff]   ;;  %v3038_v50 = vld [vmem:[%s3867_s1 + $0x120] ss:$8 sps:$4 sm:$0xff]  }
  0x22   : >> { %3953 = vst [vmem:[#allocation6_spill] sm:$0xff] %v3031_v49  ;;  %v3045_v51 = vld [vmem:[%s3867_s1 + $0x1a0] ss:$8 sps:$4 sm:$0xff]   ;;  %v3050_v52 = vld [vmem:[%s3867_s1 + $0x134] ss:$8 sps:$4 sm:$0xff]  }
  0x23   : >> { %3954 = vst [vmem:[#allocation7_spill] sm:$0xff] %v3045_v51  ;;  %v3057_v53 = vld [vmem:[%s3867_s1 + $0x1b4] ss:$8 sps:$4 sm:$0xff]   ;;  %v3064_v54 = vld [vmem:[%s3867_s1 + $0x130] ss:$8 sps:$4 sm:$0xff]  }
  0x24   : >> { %315 = vmatpush1.bf16.msra.mxu0 %v2886_v20  ;;  %436 = vmatpush1.bf16.msra.mxu1 %v2891_v21  ;;  %3955 = vst [vmem:[#allocation8_spill] sm:$0xff] %v3057_v53  ;;  %v3069_v55 = vld [vmem:[%s3867_s1 + $0x1b0] ss:$8 sps:$4 sm:$0xff]   ;;  %v3076_v56 = vld [vmem:[%s3867_s1 + $0x144] ss:$8 sps:$4 sm:$0xff]  }
  0x25   : >> { %316 = vmatprep.subr.bf16.mxu0 %v2898_v22  ;;  %437 = vmatprep.subr.bf16.mxu1 %v2906_v23  ;;  %3956 = vst [vmem:[#allocation9_spill] sm:$0xff] %v3069_v55  ;;  %v3081_v57 = vld [vmem:[%s3867_s1 + $0x1c4] ss:$8 sps:$4 sm:$0xff]   ;;  %v3088_v58 = vld [vmem:[%s3867_s1 + $0x140] ss:$8 sps:$4 sm:$0xff]  }
  0x26   : >> { %3957 = vst [vmem:[#allocation10_spill] sm:$0xff] %v3081_v57  ;;  %v3093_v59 = vld [vmem:[%s3867_s1 + $0x1c0] ss:$8 sps:$4 sm:$0xff]   ;;  %v3100_v60 = vld [vmem:[%s3867_s1 + $0x154] ss:$8 sps:$4 sm:$0xff]  }
  0x27   : >> { %3958 = vst [vmem:[#allocation11_spill] sm:$0xff] %v3093_v59  ;;  %v3105_v61 = vld [vmem:[%s3867_s1 + $0x1d4] ss:$8 sps:$4 sm:$0xff]   ;;  %v3112_v62 = vld [vmem:[%s3867_s1 + $0x150] ss:$8 sps:$4 sm:$0xff]  }
  0x28   : >> { %317 = vmatpush1.bf16.msra.mxu0 %v2916_v24  ;;  %438 = vmatpush1.bf16.msra.mxu1 %v2921_v25  ;;  %3959 = vst [vmem:[#allocation12_spill] sm:$0xff] %v3105_v61  ;;  %v3117_v63 = vld [vmem:[%s3867_s1 + $0x1d0] ss:$8 sps:$4 sm:$0xff]   ;;  %v3124_v28 = vld [vmem:[%s3867_s1 + $0x164] ss:$8 sps:$4 sm:$0xff]  }
  0x29   : >> { %318 = vmatprep.subr.bf16.mxu0 %v2928_v26  ;;  %439 = vmatprep.subr.bf16.mxu1 %v2933_v27  ;;  %3960 = vst [vmem:[#allocation13_spill] sm:$0xff] %v3117_v63  ;;  %v3129_v31 = vld [vmem:[%s3867_s1 + $0x1e4] ss:$8 sps:$4 sm:$0xff]   ;;  %v3136_v35 = vld [vmem:[%s3867_s1 + $0x160] ss:$8 sps:$4 sm:$0xff]  }
  0x2a   : >> { %3961 = vst [vmem:[#allocation14_spill] sm:$0xff] %v3129_v31  ;;  %v3141_v36 = vld [vmem:[%s3867_s1 + $0x1e0] ss:$8 sps:$4 sm:$0xff]   ;;  %v3161_v0 = vld [vmem:[%s3867_s1 + $0x170] ss:$8 sps:$4 sm:$0xff]  }
  0x2b   : >> { %3962 = vst [vmem:[#allocation15_spill] sm:$0xff] %v3141_v36 }
  0x2c   : >> { %319 = vmatpush1.bf16.msra.mxu0 %v2939_v29  ;;  %440 = vmatpush1.bf16.msra.mxu1 %v2946_v30 }
  0x2d   : >> { %320 = vmatprep.subr.bf16.mxu0 %v2953_v32  ;;  %441 = vmatprep.subr.bf16.mxu1 %v2958_v33 }
  0x30   : >> { %321 = vmatpush1.bf16.msra.mxu0 %v2963_v34  ;;  %442 = vmatpush1.bf16.msra.mxu1 %v2970_v37 }
  0x31   : >> { %571 = vmatprep.subr.bf16.mxu0 %v2975_v38  ;;  %715 = vmatprep.subr.bf16.mxu1 %v2982_v39 }
  0x33   : >> { %339 = vmatmul.mubr.bf16.vlgmr.msra.gmra.mrb[0].mxu0 %v224_v40  ;;  %460 = vmatmul.mubr.bf16.vlgmr.msra.gmra.mrb[0].mxu1 %v180_v41  ;;  %v3148_v40 = vld [vmem:[%s3867_s1 + $0x174] ss:$8 sps:$4 sm:$0xff]  }
  0x34   : >> { %572 = vmatpush1.bf16.msra.mxu0 %v2988_v42  ;;  %716 = vmatpush1.bf16.msra.mxu1 %v2995_v43  ;;  %v3153_v41 = vld [vmem:[%s3867_s1 + $0x1f4] ss:$8 sps:$4 sm:$0xff]   ;;  %v3363_v43 = vld [vmem:[%s3867_s1 + $0x270] ss:$8 sps:$4 sm:$0xff]  }
  0x35   : >> { %573 = vmatprep.subr.bf16.mxu0 %v3000_v44  ;;  %717 = vmatprep.subr.bf16.mxu1 %v3007_v45  ;;  %3963 = vst [vmem:[#allocation16_spill] sm:$0xff] %v3153_v41  ;;  %3995 = vst [vmem:[#allocation47_spill] sm:$0xff] %v3363_v43 }
  0x36   : >> { %603 = vmatprep.mubr.bf16.mxu0 %v3870_v3  ;;  %747 = vmatprep.mubr.bf16.mxu1 %v3870_v3  ;;  %v2582_v3 = vld [vmem:[%s2909_s22] ss:$0 sps:$4 sm:$0x66]  }
  0x38   : >> { %574 = vmatpush1.bf16.msra.mxu0 %v3012_v46  ;;  %718 = vmatpush1.bf16.msra.mxu1 %v3019_v47  ;;  %v2631_v47 = vld [vmem:[%s2909_s22 + $0x4] ss:$0 sps:$4 sm:$0x77]  }
  0x39   : >> { %575 = vmatprep.subr.bf16.mxu0 %v3024_v48  ;;  %719 = vmatprep.subr.bf16.mxu1 %v3031_v49  ;;  %v3249_v49 = vld [vmem:[%s3867_s1 + $0x234] ss:$8 sps:$4 sm:$0xff]   ;;  %v780_v45 = vshrl.u32 %v2631_v47, 16 }
  0x3a   : >> { %3977 = vst [vmem:[#allocation29_spill] sm:$0xff] %v3249_v49 }
  0x3c   : >> { %576 = vmatpush1.bf16.msra.mxu0 %v3038_v50  ;;  %720 = vmatpush1.bf16.msra.mxu1 %v3045_v51  ;;  %v3237_v51 = vld [vmem:[%s3867_s1 + $0x220] ss:$8 sps:$4 sm:$0xff]  }
  0x3d   : >> { %577 = vmatprep.subr.bf16.mxu0 %v3050_v52  ;;  %721 = vmatprep.subr.bf16.mxu1 %v3057_v53  ;;  %v3974_v53 = vmov 0   ;;  %3975 = vst [vmem:[#allocation27_spill] sm:$0xff] %v3237_v51 }
  0x40   : >> { %578 = vmatpush1.bf16.msra.mxu0 %v3064_v54  ;;  %722 = vmatpush1.bf16.msra.mxu1 %v3069_v55  ;;  %v3218_v55 = vld [vmem:[%s3867_s1 + $0x290] ss:$8 sps:$4 sm:$0xff]  }
  0x41   : >> { %579 = vmatprep.subr.bf16.mxu0 %v3076_v56  ;;  %723 = vmatprep.subr.bf16.mxu1 %v3081_v57  ;;  %v3193_v57 = vld [vmem:[%s3867_s1 + $0x280] ss:$8 sps:$4 sm:$0xff]   ;;  %3971 = vst [vmem:[#allocation24_spill] sm:$0xff] %v3218_v55 }
  0x42   : >> { %3967 = vst [vmem:[#allocation20_spill] sm:$0xff] %v3193_v57 }
  0x44   : >> { %580 = vmatpush1.bf16.msra.mxu0 %v3088_v58  ;;  %724 = vmatpush1.bf16.msra.mxu1 %v3093_v59  ;;  %v3181_v59 = vld [vmem:[%s2909_s22 + $0x4] sm:$0x3] }
  0x45   : >> { %581 = vmatprep.subr.bf16.mxu0 %v3100_v60  ;;  %725 = vmatprep.subr.bf16.mxu1 %v3105_v61  ;;  %v489_v61 = vrot.slane %v2582_v3, 1  ;;  %v3200_v3 = vld [vmem:[%s3867_s1 + $0x214] ss:$8 sps:$4 sm:$0xff]  }
  0x46   : >> { %3968 = vst [vmem:[#allocation21_spill] sm:$0xff] %v3200_v3 }
  0x48   : >> { %582 = vmatpush1.bf16.msra.mxu0 %v3112_v62  ;;  %726 = vmatpush1.bf16.msra.mxu1 %v3117_v63  ;;  %v3173_v63 = vld [vmem:[%s3867_s1 + $0x204] ss:$8 sps:$4 sm:$0xff]  }
  0x49   : >> { %583 = vmatprep.subr.bf16.mxu0 %v3124_v28  ;;  %727 = vmatprep.subr.bf16.mxu1 %v3129_v31  ;;  %v3166_v31 = vld [vmem:[%s3867_s1 + $0x1f0] ss:$8 sps:$4 sm:$0xff]  }
  0x4a   : >> { %3964 = vst [vmem:[#allocation17_spill] sm:$0xff] %v3166_v31 }
  0x4c   : >> { %584 = vmatpush1.bf16.msra.mxu0 %v3136_v35  ;;  %728 = vmatpush1.bf16.msra.mxu1 %v3141_v36  ;;  %v3178_v36 = vld [vmem:[%s3867_s1 + $0x284] ss:$8 sps:$4 sm:$0xff]  }
  0x4d   : >> { %585 = vmatprep.subr.bf16.mxu0 %v3148_v40  ;;  %729 = vmatprep.subr.bf16.mxu1 %v3153_v41  ;;  %3965 = vst [vmem:[#allocation18_spill] sm:$0xff] %v3178_v36  ;;  %v3188_v41 = vld [vmem:[%s3867_s1 + $0x200] ss:$8 sps:$4 sm:$0xff]  }
  0x4e   : >> { %3966 = vst [vmem:[#allocation19_spill] sm:$0xff] %v3188_v41 }
  0x50   : >> { %586 = vmatpush1.bf16.msra.mxu0 %v3161_v0  ;;  %730 = vmatpush1.bf16.msra.mxu1 %v3166_v31  ;;  %v3205_v31 = vld [vmem:[%s3867_s1 + $0x294] ss:$8 sps:$4 sm:$0xff]  }
  0x51   : >> { %867 = vmatprep.subr.bf16.mxu0 %v3173_v63  ;;  %1013 = vmatprep.subr.bf16.mxu1 %v3178_v36  ;;  %3969 = vst [vmem:[#allocation22_spill] sm:$0xff] %v3205_v31  ;;  %v3213_v36 = vld [vmem:[%s3867_s1 + $0x210] ss:$8 sps:$4 sm:$0xff]  }
  0x52   : >> { %3970 = vst [vmem:[#allocation23_spill] sm:$0xff] %v3213_v36 }
  0x53   : >> { %604 = vmatmul.mubr.bf16.vlgmr.msra.gmra.mrb[4].mxu0 %v489_v61  ;;  %748 = vmatmul.mubr.bf16.vlgmr.msra.gmra.mrb[4].mxu1 %v3181_v59  ;;  %v3223_v61 = vld [vmem:[%s3867_s1 + $0x224] ss:$8 sps:$4 sm:$0xff]  }
  0x54   : >> { %868 = vmatpush1.bf16.msra.mxu0 %v3188_v41  ;;  %1014 = vmatpush1.bf16.msra.mxu1 %v3193_v57  ;;  %3972 = vst [vmem:[#allocation25_spill] sm:$0xff] %v3223_v61  ;;  %v3230_v57 = vld [vmem:[%s3867_s1 + $0x2a4] ss:$8 sps:$4 sm:$0xff]  }
  0x55   : >> { %869 = vmatprep.subr.bf16.mxu0 %v3200_v3  ;;  %1015 = vmatprep.subr.bf16.mxu1 %v3205_v31  ;;  %3973 = vst [vmem:[#allocation26_spill] sm:$0xff] %v3230_v57  ;;  %v3244_v31 = vld [vmem:[%s3867_s1 + $0x2a0] ss:$8 sps:$4 sm:$0xff]   ;;  %v782_v3 = vshll.u32 %v2631_v47, 16  ;;  %v3380_v47 = vld [vmem:[%s3867_s1 + $0x384] ss:$8 sps:$4 sm:$0xff]  }
  0x56   : >> { %899 = vmatprep.mubr.bf16.mxu0 %v3974_v53  ;;  %1045 = vmatprep.mubr.bf16.mxu1 %v3974_v53  ;;  %3976 = vst [vmem:[#allocation28_spill] sm:$0xff] %v3244_v31  ;;  %3998 = vst [vmem:[#allocation50_spill] sm:$0xff] %v3380_v47 }
  0x57   : >> { %v784_v41 = vrot.slane %v782_v3, 1 }
  0x58   : >> { %870 = vmatpush1.bf16.msra.mxu0 %v3213_v36  ;;  %1016 = vmatpush1.bf16.msra.mxu1 %v3218_v55  ;;  %v3256_v36 = vld [vmem:[%s3867_s1 + $0x2b4] ss:$8 sps:$4 sm:$0xff]   ;;  %v3261_v55 = vld [vmem:[%s3867_s1 + $0x230] ss:$8 sps:$4 sm:$0xff]  }
  0x59   : >> { %871 = vmatprep.subr.bf16.mxu0 %v3223_v61  ;;  %1017 = vmatprep.subr.bf16.mxu1 %v3230_v57  ;;  %3978 = vst [vmem:[#allocation30_spill] sm:$0xff] %v3256_v36  ;;  %3979 = vst [vmem:[#allocation31_spill] sm:$0xff] %v3261_v55  ;;  %v3268_v61 = vld [vmem:[%s3867_s1 + $0x2b0] ss:$8 sps:$4 sm:$0xff]   ;;  %v3273_v57 = vld [vmem:[%s3867_s1 + $0x244] ss:$8 sps:$4 sm:$0xff]   ;;  %v3382_v3 = vor.u32 %v784_v41, %v780_v45 }
  0x5a   : >> { %3980 = vst [vmem:[#allocation32_spill] sm:$0xff] %v3268_v61  ;;  %3981 = vst [vmem:[#allocation33_spill] sm:$0xff] %v3273_v57  ;;  %v3400_v45 = vld [vmem:[%s3867_s1 + $0x314] ss:$8 sps:$4 sm:$0xff]  }
  0x5b   : >> { %4001 = vst [vmem:[#allocation53_spill] sm:$0xff] %v3400_v45  ;;  %v3407_v41 = vld [vmem:[%s3867_s1 + $0x394] ss:$8 sps:$4 sm:$0xff]  }
  0x5c   : >> { %872 = vmatpush1.bf16.msra.mxu0 %v3237_v51  ;;  %1018 = vmatpush1.bf16.msra.mxu1 %v3244_v31  ;;  %v3280_v51 = vld [vmem:[%s3867_s1 + $0x2c4] ss:$8 sps:$4 sm:$0xff]   ;;  %v3285_v31 = vld [vmem:[%s3867_s1 + $0x240] ss:$8 sps:$4 sm:$0xff]   ;;  %4002 = vst [vmem:[#allocation54_spill] sm:$0xff] %v3407_v41 }
  0x5d   : >> { %873 = vmatprep.subr.bf16.mxu0 %v3249_v49  ;;  %1019 = vmatprep.subr.bf16.mxu1 %v3256_v36  ;;  %3982 = vst [vmem:[#allocation34_spill] sm:$0xff] %v3280_v51  ;;  %3983 = vst [vmem:[#allocation35_spill] sm:$0xff] %v3285_v31  ;;  %v3292_v49 = vld [vmem:[%s3867_s1 + $0x2c0] ss:$8 sps:$4 sm:$0xff]   ;;  %v3297_v36 = vld [vmem:[%s3867_s1 + $0x254] ss:$8 sps:$4 sm:$0xff]  }
  0x5e   : >> { %3984 = vst [vmem:[#allocation36_spill] sm:$0xff] %v3292_v49  ;;  %3985 = vst [vmem:[#allocation37_spill] sm:$0xff] %v3297_v36 }
  0x60   : >> { %874 = vmatpush1.bf16.msra.mxu0 %v3261_v55  ;;  %1020 = vmatpush1.bf16.msra.mxu1 %v3268_v61  ;;  %v3304_v55 = vld [vmem:[%s3867_s1 + $0x2d4] ss:$8 sps:$4 sm:$0xff]   ;;  %v3309_v61 = vld [vmem:[%s3867_s1 + $0x250] ss:$8 sps:$4 sm:$0xff]  }
  0x61   : >> { %875 = vmatprep.subr.bf16.mxu0 %v3273_v57  ;;  %1021 = vmatprep.subr.bf16.mxu1 %v3280_v51  ;;  %3986 = vst [vmem:[#allocation38_spill] sm:$0xff] %v3304_v55  ;;  %3987 = vst [vmem:[#allocation39_spill] sm:$0xff] %v3309_v61  ;;  %v3317_v51 = vld [vmem:[%s3867_s1 + $0x2d0] ss:$8 sps:$4 sm:$0xff]   ;;  %v3322_v57 = vld [vmem:[%s3867_s1 + $0x264] ss:$8 sps:$4 sm:$0xff]  }
  0x62   : >> { %3988 = vst [vmem:[#allocation40_spill] sm:$0xff] %v3317_v51  ;;  %3989 = vst [vmem:[#allocation41_spill] sm:$0xff] %v3322_v57 }
  0x64   : >> { %876 = vmatpush1.bf16.msra.mxu0 %v3285_v31  ;;  %1022 = vmatpush1.bf16.msra.mxu1 %v3292_v49  ;;  %v3329_v31 = vld [vmem:[%s3867_s1 + $0x2e4] ss:$8 sps:$4 sm:$0xff]   ;;  %v3334_v49 = vld [vmem:[%s3867_s1 + $0x260] ss:$8 sps:$4 sm:$0xff]  }
  0x65   : >> { %877 = vmatprep.subr.bf16.mxu0 %v3297_v36  ;;  %1023 = vmatprep.subr.bf16.mxu1 %v3304_v55  ;;  %3990 = vst [vmem:[#allocation42_spill] sm:$0xff] %v3329_v31  ;;  %3991 = vst [vmem:[#allocation43_spill] sm:$0xff] %v3334_v49  ;;  %v3341_v36 = vld [vmem:[%s3867_s1 + $0x2e0] ss:$8 sps:$4 sm:$0xff]   ;;  %v3346_v55 = vld [vmem:[%s3867_s1 + $0x274] ss:$8 sps:$4 sm:$0xff]  }
  0x66   : >> { %3992 = vst [vmem:[#allocation44_spill] sm:$0xff] %v3341_v36  ;;  %3993 = vst [vmem:[#allocation45_spill] sm:$0xff] %v3346_v55 }
  0x68   : >> { %878 = vmatpush1.bf16.msra.mxu0 %v3309_v61  ;;  %1024 = vmatpush1.bf16.msra.mxu1 %v3317_v51  ;;  %v3353_v61 = vld [vmem:[%s3867_s1 + $0x2f4] ss:$8 sps:$4 sm:$0xff]   ;;  %v3356_v51 = vld [vmem:[%s2909_s22 + $0x4] ss:$0 sps:$4 sm:$0x66]  }
  0x69   : >> { %879 = vmatprep.subr.bf16.mxu0 %v3322_v57  ;;  %1025 = vmatprep.subr.bf16.mxu1 %v3329_v31  ;;  %3994 = vst [vmem:[#allocation46_spill] sm:$0xff] %v3353_v61  ;;  %v3368_v31 = vld [vmem:[%s3867_s1 + $0x2f0] ss:$8 sps:$4 sm:$0xff]   ;;  %v3373_v57 = vld [vmem:[%s3867_s1 + $0x304] ss:$8 sps:$4 sm:$0xff]  }
  0x6a   : >> { %3996 = vst [vmem:[#allocation48_spill] sm:$0xff] %v3368_v31  ;;  %3997 = vst [vmem:[#allocation49_spill] sm:$0xff] %v3373_v57 }
  0x6c   : >> { %880 = vmatpush1.bf16.msra.mxu0 %v3334_v49  ;;  %1026 = vmatpush1.bf16.msra.mxu1 %v3341_v36  ;;  %v3918_v36 = vrot.slane %v3356_v51, 1  ;;  %v3388_v49 = vld [vmem:[%s3867_s1 + $0x300] ss:$8 sps:$4 sm:$0xff]  }
  0x6d   : >> { %881 = vmatprep.subr.bf16.mxu0 %v3346_v55  ;;  %1027 = vmatprep.subr.bf16.mxu1 %v3353_v61  ;;  %3999 = vst [vmem:[#allocation51_spill] sm:$0xff] %v3388_v49  ;;  %v3395_v61 = vld [vmem:[%s3867_s1 + $0x380] ss:$8 sps:$4 sm:$0xff]  }
  0x6e   : >> { %4000 = vst [vmem:[#allocation52_spill] sm:$0xff] %v3395_v61 }
  0x70   : >> { %882 = vmatpush1.bf16.msra.mxu0 %v3363_v43  ;;  %1028 = vmatpush1.bf16.msra.mxu1 %v3368_v31  ;;  %v3417_v31 = vld [vmem:[%s3867_s1 + $0x310] ss:$8 sps:$4 sm:$0xff]  }
  0x71   : >> { %1157 = vmatprep.subr.bf16.mxu0 %v3373_v57  ;;  %1309 = vmatprep.subr.bf16.mxu1 %v3380_v47  ;;  %4003 = vst [vmem:[#allocation55_spill] sm:$0xff] %v3417_v31  ;;  %v3422_v47 = vld [vmem:[%s3867_s1 + $0x390] ss:$8 sps:$4 sm:$0xff]  }
  0x72   : >> { %4004 = vst [vmem:[#allocation56_spill] sm:$0xff] %v3422_v47 }
  0x73   : >> { %900 = vmatmul.mubr.bf16.vlgmr.msra.gmra.mrb[8].mxu0 %v3382_v3  ;;  %1046 = vmatmul.mubr.bf16.vlgmr.msra.gmra.mrb[8].mxu1 %v3918_v36  ;;  %v3429_v36 = vld [vmem:[%s3867_s1 + $0x324] ss:$8 sps:$4 sm:$0xff]  }
  0x74   : >> { %1158 = vmatpush1.bf16.msra.mxu0 %v3388_v49  ;;  %1310 = vmatpush1.bf16.msra.mxu1 %v3395_v61  ;;  %4005 = vst [vmem:[#allocation57_spill] sm:$0xff] %v3429_v36  ;;  %v3434_v61 = vld [vmem:[%s3867_s1 + $0x3a4] ss:$8 sps:$4 sm:$0xff]   ;;  %v2681_v49 = vld [vmem:[%s2909_s22 + $0x8] ss:$0 sps:$4 sm:$0x77]  }
  0x75   : >> { %1159 = vmatprep.subr.bf16.mxu0 %v3400_v45  ;;  %1311 = vmatprep.subr.bf16.mxu1 %v3407_v41  ;;  %4006 = vst [vmem:[#allocation58_spill] sm:$0xff] %v3434_v61  ;;  %v3443_v41 = vld [vmem:[%s3867_s1 + $0x320] ss:$8 sps:$4 sm:$0xff]   ;;  %v1224_v57 = vshll.u32 %v2681_v49, 16  ;;  %v1222_v43 = vshrl.u32 %v2681_v49, 16 }
  0x76   : >> { %1189 = vmatprep.mubr.bf16.mxu0 %v3974_v53  ;;  %1341 = vmatprep.mubr.bf16.mxu1 %v3974_v53  ;;  %4007 = vst [vmem:[#allocation59_spill] sm:$0xff] %v3443_v41  ;;  %v3448_v45 = vld [vmem:[%s3867_s1 + $0x3a0] ss:$8 sps:$4 sm:$0xff]   ;;  %v3576_v49 = vld [vmem:[%s3867_s1 + $0x404] ss:$8 sps:$4 sm:$0xff]  }
  0x77   : >> { %4008 = vst [vmem:[#allocation60_spill] sm:$0xff] %v3448_v45  ;;  %v1226_v55 = vrot.slane %v1224_v57, 1 }
  0x78   : >> { %1160 = vmatpush1.bf16.msra.mxu0 %v3417_v31  ;;  %1312 = vmatpush1.bf16.msra.mxu1 %v3422_v47  ;;  %v3455_v31 = vld [vmem:[%s3867_s1 + $0x334] ss:$8 sps:$4 sm:$0xff]  }
  0x79   : >> { %1161 = vmatprep.subr.bf16.mxu0 %v3429_v36  ;;  %1313 = vmatprep.subr.bf16.mxu1 %v3434_v61  ;;  %4009 = vst [vmem:[#allocation61_spill] sm:$0xff] %v3455_v31  ;;  %v3460_v47 = vld [vmem:[%s3867_s1 + $0x3b4] ss:$8 sps:$4 sm:$0xff]   ;;  %v3467_v36 = vld [vmem:[%s3867_s1 + $0x330] ss:$8 sps:$4 sm:$0xff]   ;;  %v3578_v57 = vor.u32 %v1226_v55, %v1222_v43 }
  0x7a   : >> { %4010 = vst [vmem:[#allocation62_spill] sm:$0xff] %v3460_v47  ;;  %4011 = vst [vmem:[#allocation63_spill] sm:$0xff] %v3467_v36  ;;  %v3472_v61 = vld [vmem:[%s3867_s1 + $0x3b0] ss:$8 sps:$4 sm:$0xff]   ;;  %v3595_v43 = vld [vmem:[%s3867_s1 + $0x414] ss:$8 sps:$4 sm:$0xff]  }
  0x7b   : >> { %4012 = vst [vmem:[#allocation64_spill] sm:$0xff] %v3472_v61  ;;  %v3604_v55 = vld [vmem:[%s3867_s1 + $0x410] ss:$8 sps:$4 sm:$0xff]  }
  0x7c   : >> { %1162 = vmatpush1.bf16.msra.mxu0 %v3443_v41  ;;  %1314 = vmatpush1.bf16.msra.mxu1 %v3448_v45  ;;  %v3479_v41 = vld [vmem:[%s3867_s1 + $0x344] ss:$8 sps:$4 sm:$0xff]  }
  0x7d   : >> { %1163 = vmatprep.subr.bf16.mxu0 %v3455_v31  ;;  %1315 = vmatprep.subr.bf16.mxu1 %v3460_v47  ;;  %4013 = vst [vmem:[#allocation65_spill] sm:$0xff] %v3479_v41  ;;  %v3484_v45 = vld [vmem:[%s3867_s1 + $0x3c4] ss:$8 sps:$4 sm:$0xff]   ;;  %v3491_v31 = vld [vmem:[%s3867_s1 + $0x340] ss:$8 sps:$4 sm:$0xff]  }
  0x7e   : >> { %4014 = vst [vmem:[#allocation66_spill] sm:$0xff] %v3484_v45  ;;  %4015 = vst [vmem:[#allocation67_spill] sm:$0xff] %v3491_v31  ;;  %v3496_v47 = vld [vmem:[%s3867_s1 + $0x3c0] ss:$8 sps:$4 sm:$0xff]  }
  0x7f   : >> { %4016 = vst [vmem:[#allocation68_spill] sm:$0xff] %v3496_v47 }
  0x80   : >> { %1164 = vmatpush1.bf16.msra.mxu0 %v3467_v36  ;;  %1316 = vmatpush1.bf16.msra.mxu1 %v3472_v61  ;;  %v3503_v36 = vld [vmem:[%s3867_s1 + $0x354] ss:$8 sps:$4 sm:$0xff]  }
  0x81   : >> { %1165 = vmatprep.subr.bf16.mxu0 %v3479_v41  ;;  %1317 = vmatprep.subr.bf16.mxu1 %v3484_v45  ;;  %4017 = vst [vmem:[#allocation69_spill] sm:$0xff] %v3503_v36  ;;  %v3508_v61 = vld [vmem:[%s3867_s1 + $0x3d4] ss:$8 sps:$4 sm:$0xff]   ;;  %v3516_v41 = vld [vmem:[%s3867_s1 + $0x350] ss:$8 sps:$4 sm:$0xff]  }
  0x82   : >> { %4018 = vst [vmem:[#allocation70_spill] sm:$0xff] %v3508_v61  ;;  %4019 = vst [vmem:[#allocation71_spill] sm:$0xff] %v3516_v41  ;;  %v3521_v45 = vld [vmem:[%s3867_s1 + $0x3d0] ss:$8 sps:$4 sm:$0xff]  }
  0x83   : >> { %4020 = vst [vmem:[#allocation72_spill] sm:$0xff] %v3521_v45 }
  0x84   : >> { %1166 = vmatpush1.bf16.msra.mxu0 %v3491_v31  ;;  %1318 = vmatpush1.bf16.msra.mxu1 %v3496_v47  ;;  %v3528_v31 = vld [vmem:[%s3867_s1 + $0x364] ss:$8 sps:$4 sm:$0xff]  }
  0x85   : >> { %1167 = vmatprep.subr.bf16.mxu0 %v3503_v36  ;;  %1319 = vmatprep.subr.bf16.mxu1 %v3508_v61  ;;  %4021 = vst [vmem:[#allocation73_spill] sm:$0xff] %v3528_v31  ;;  %v3533_v47 = vld [vmem:[%s3867_s1 + $0x3e4] ss:$8 sps:$4 sm:$0xff]   ;;  %v3540_v36 = vld [vmem:[%s3867_s1 + $0x360] ss:$8 sps:$4 sm:$0xff]  }
  0x86   : >> { %4022 = vst [vmem:[#allocation74_spill] sm:$0xff] %v3533_v47  ;;  %4023 = vst [vmem:[#allocation75_spill] sm:$0xff] %v3540_v36  ;;  %v3545_v61 = vld [vmem:[%s3867_s1 + $0x3e0] ss:$8 sps:$4 sm:$0xff]  }
  0x87   : >> { %4024 = vst [vmem:[#allocation76_spill] sm:$0xff] %v3545_v61 }
  0x88   : >> { %1168 = vmatpush1.bf16.msra.mxu0 %v3516_v41  ;;  %1320 = vmatpush1.bf16.msra.mxu1 %v3521_v45  ;;  %v3552_v41 = vld [vmem:[%s3867_s1 + $0x374] ss:$8 sps:$4 sm:$0xff]  }
  0x89   : >> { %1169 = vmatprep.subr.bf16.mxu0 %v3528_v31  ;;  %1321 = vmatprep.subr.bf16.mxu1 %v3533_v47  ;;  %v3557_v45 = vld [vmem:[%s3867_s1 + $0x3f4] ss:$8 sps:$4 sm:$0xff]   ;;  %v3564_v47 = vld [vmem:[%s3867_s1 + $0x370] ss:$8 sps:$4 sm:$0xff]  }
  0x8a   : >> { %v3569_v31 = vld [vmem:[%s3867_s1 + $0x3f0] ss:$8 sps:$4 sm:$0xff]  }
  0x8b   : >> { %4025 = vst [vmem:[#allocation77_spill] sm:$0xff] %v3569_v31 }
  0x8c   : >> { %1170 = vmatpush1.bf16.msra.mxu0 %v3540_v36  ;;  %1322 = vmatpush1.bf16.msra.mxu1 %v3545_v61  ;;  %v3583_v61 = vld [vmem:[%s2909_s22 + $0x8] sm:$0x3] }
  0x8d   : >> { %1171 = vmatprep.subr.bf16.mxu0 %v3552_v41  ;;  %1323 = vmatprep.subr.bf16.mxu1 %v3557_v45  ;;  %v3588_v36 = vld [vmem:[%s3867_s1 + $0x400] ss:$8 sps:$4 sm:$0xff]  }
  0x90   : >> { %1172 = vmatpush1.bf16.msra.mxu0 %v3564_v47  ;;  %1324 = vmatpush1.bf16.msra.mxu1 %v3569_v31  ;;  %v3686_v31 = vld [vmem:[%s2909_s22 + $0x8] ss:$0 sps:$4 sm:$0x66]  }
  0x91   : >> { %1455 = vmatprep.subr.bf16.mxu0 %v3576_v49  ;;  %1513 = vmatprep.subr.bf16.mxu1 %v2780_v1  ;;  %v3611_v1 = vld [vmem:[%s3867_s1 + $0x424] ss:$8 sps:$4 sm:$0xff]  }
  0x93   : >> { %1190 = vmatmul.mubr.bf16.vlgmr.msra.gmra.mrb[12].mxu0 %v3583_v61  ;;  %1342 = vmatmul.mubr.bf16.vlgmr.msra.gmra.mrb[12].mxu1 %v3578_v57 }
  0x94   : >> { %1456 = vmatpush1.bf16.msra.mxu0 %v3588_v36  ;;  %1514 = vmatpush1.bf16.msra.mxu1 %v2793_v4  ;;  %v3620_v4 = vld [vmem:[%s3867_s1 + $0x420] ss:$8 sps:$4 sm:$0xff]  }
  0x95   : >> { %1457 = vmatprep.subr.bf16.mxu0 %v3595_v43  ;;  %1515 = vmatprep.subr.bf16.mxu1 %v2804_v6  ;;  %v3627_v6 = vld [vmem:[%s3867_s1 + $0x434] ss:$8 sps:$4 sm:$0xff]  }
  0x96   : >> { %1487 = vmatprep.mubr.bf16.mxu0 %v3974_v53  ;;  %1545 = vmatprep.mubr.bf16.mxu1 %v3974_v53 }
  0x98   : >> { %1458 = vmatpush1.bf16.msra.mxu0 %v3604_v55  ;;  %1516 = vmatpush1.bf16.msra.mxu1 %v2816_v8  ;;  %v3634_v8 = vld [vmem:[%s3867_s1 + $0x430] ss:$8 sps:$4 sm:$0xff]  }
  0x99   : >> { %1459 = vmatprep.subr.bf16.mxu0 %v3611_v1  ;;  %1517 = vmatprep.subr.bf16.mxu1 %v2828_v10  ;;  %v3641_v10 = vld [vmem:[%s3867_s1 + $0x444] ss:$8 sps:$4 sm:$0xff]  }
  0x9c   : >> { %1460 = vmatpush1.bf16.msra.mxu0 %v3620_v4  ;;  %1518 = vmatpush1.bf16.msra.mxu1 %v2838_v12  ;;  %v3648_v12 = vld [vmem:[%s3867_s1 + $0x440] ss:$8 sps:$4 sm:$0xff]  }
  0x9d   : >> { %1461 = vmatprep.subr.bf16.mxu0 %v3627_v6  ;;  %1519 = vmatprep.subr.bf16.mxu1 %v2850_v14  ;;  %v3655_v14 = vld [vmem:[%s3867_s1 + $0x454] ss:$8 sps:$4 sm:$0xff]  }
  0xa0   : >> { %1462 = vmatpush1.bf16.msra.mxu0 %v3634_v8  ;;  %1520 = vmatpush1.bf16.msra.mxu1 %v2862_v16  ;;  %v3662_v16 = vld [vmem:[%s3867_s1 + $0x450] ss:$8 sps:$4 sm:$0xff]  }
  0xa1   : >> { %1463 = vmatprep.subr.bf16.mxu0 %v3641_v10  ;;  %1521 = vmatprep.subr.bf16.mxu1 %v2874_v18  ;;  %v3669_v18 = vld [vmem:[%s3867_s1 + $0x464] ss:$8 sps:$4 sm:$0xff]  }
  0xa4   : >> { %1464 = vmatpush1.bf16.msra.mxu0 %v3648_v12  ;;  %1522 = vmatpush1.bf16.msra.mxu1 %v2886_v20  ;;  %v3676_v20 = vld [vmem:[%s3867_s1 + $0x460] ss:$8 sps:$4 sm:$0xff]  }
  0xa5   : >> { %1465 = vmatprep.subr.bf16.mxu0 %v3655_v14  ;;  %1523 = vmatprep.subr.bf16.mxu1 %v2898_v22  ;;  %v3683_v22 = vld [vmem:[%s3867_s1 + $0x474] ss:$8 sps:$4 sm:$0xff]  }
  0xa8   : >> { %1466 = vmatpush1.bf16.msra.mxu0 %v3662_v16  ;;  %1524 = vmatpush1.bf16.msra.mxu1 %v2916_v24  ;;  %v3693_v24 = vld [vmem:[%s3867_s1 + $0x470] ss:$8 sps:$4 sm:$0xff]  }
  0xa9   : >> { %1467 = vmatprep.subr.bf16.mxu0 %v3669_v18  ;;  %1525 = vmatprep.subr.bf16.mxu1 %v2928_v26  ;;  %v1373_v26 = vrot.slane %v3686_v31, 1  ;;  %v4091_v31 = vld [vmem:[#allocation58_spill] sm:$0xff] }
  0xac   : >> { %1468 = vmatpush1.bf16.msra.mxu0 %v3676_v20  ;;  %1526 = vmatpush1.bf16.msra.mxu1 %v2939_v29  ;;  %v4040_v29 = vld [vmem:[#allocation31_spill] sm:$0xff] }
  0xad   : >> { %1469 = vmatprep.subr.bf16.mxu0 %v3683_v22  ;;  %1527 = vmatprep.subr.bf16.mxu1 %v2953_v32  ;;  %v4042_v32 = vld [vmem:[#allocation33_spill] sm:$0xff] }
  0xb0   : >> { %1470 = vmatpush1.bf16.msra.mxu0 %v3693_v24  ;;  %1528 = vmatpush1.bf16.msra.mxu1 %v2963_v34  ;;  %v4044_v34 = vld [vmem:[#allocation35_spill] sm:$0xff] }
  0xb1   : >> { %1554 = vmatprep.subr.bf16.mxu0 %v2785_v2  ;;  %1595 = vmatprep.subr.bf16.mxu1 %v2975_v38  ;;  %v4026_v2 = vrot.slane %v3356_v51, 1  ;;  %v4046_v38 = vld [vmem:[#allocation37_spill] sm:$0xff]  ;;  %v4053_v51 = vld [vmem:[#allocation16_spill] sm:$0xff] }
  0xb3   : >> { %1488 = vmatmul.mubr.bf16.vlgmr.msra.gmra.mrb[16].mxu0 %v1373_v26  ;;  %1546 = vmatmul.mubr.bf16.vlgmr.msra.gmra.mrb[16].mxu1 %v3382_v3  ;;  %v4065_v3 = vld [vmem:[#allocation26_spill] sm:$0xff] }
  0xb4   : >> { %1555 = vmatpush1.bf16.msra.mxu0 %v2798_v5  ;;  %1596 = vmatpush1.bf16.msra.mxu1 %v2988_v42  ;;  %v4027_v5 = vld [vmem:[#allocation3_spill] sm:$0xff] }
  0xb5   : >> { %1556 = vmatprep.subr.bf16.mxu0 %v2811_v7  ;;  %1597 = vmatprep.subr.bf16.mxu1 %v3000_v44  ;;  %v4028_v7 = vld [vmem:[#allocation19_spill] sm:$0xff]  ;;  %v4049_v44 = vld [vmem:[#allocation14_spill] sm:$0xff] }
  0xb6   : >> { %1586 = vmatprep.mubr.bf16.mxu0 %v3974_v53  ;;  %1627 = vmatprep.mubr.bf16.mxu1 %v3974_v53  ;;  %v4048_v42 = vld [vmem:[#allocation39_spill] sm:$0xff] }
  0xb8   : >> { %1557 = vmatpush1.bf16.msra.mxu0 %v2822_v9  ;;  %1598 = vmatpush1.bf16.msra.mxu1 %v3012_v46  ;;  %v4029_v9 = vld [vmem:[#allocation4_spill] sm:$0xff]  ;;  %v4050_v46 = vld [vmem:[#allocation41_spill] sm:$0xff] }
  0xb9   : >> { %1558 = vmatprep.subr.bf16.mxu0 %v2833_v11  ;;  %1599 = vmatprep.subr.bf16.mxu1 %v3024_v48  ;;  %v4030_v11 = vld [vmem:[#allocation21_spill] sm:$0xff]  ;;  %v4051_v48 = vld [vmem:[#allocation15_spill] sm:$0xff] }
  0xbc   : >> { %1559 = vmatpush1.bf16.msra.mxu0 %v2843_v13  ;;  %1600 = vmatpush1.bf16.msra.mxu1 %v3038_v50  ;;  %v4032_v13 = vld [vmem:[#allocation23_spill] sm:$0xff] }
  0xbd   : >> { %1560 = vmatprep.subr.bf16.mxu0 %v2857_v15  ;;  %1601 = vmatprep.subr.bf16.mxu1 %v3050_v52  ;;  %v4033_v15 = vld [vmem:[#allocation6_spill] sm:$0xff]  ;;  %v4052_v50 = vld [vmem:[#allocation43_spill] sm:$0xff]  ;;  %v4054_v52 = vld [vmem:[#allocation45_spill] sm:$0xff] }
  0xc0   : >> { %1561 = vmatpush1.bf16.msra.mxu0 %v2869_v17  ;;  %1602 = vmatpush1.bf16.msra.mxu1 %v3064_v54  ;;  %v4034_v17 = vld [vmem:[#allocation25_spill] sm:$0xff] }
  0xc1   : >> { %1562 = vmatprep.subr.bf16.mxu0 %v2881_v19  ;;  %1603 = vmatprep.subr.bf16.mxu1 %v3076_v56  ;;  %v4035_v19 = vld [vmem:[#allocation7_spill] sm:$0xff]  ;;  %v4055_v54 = vld [vmem:[#allocation17_spill] sm:$0xff] }
  0xc2   : >> { %v4056_v56 = vld [vmem:[#allocation47_spill] sm:$0xff] }
  0xc4   : >> { %1563 = vmatpush1.bf16.msra.mxu0 %v2891_v21  ;;  %1604 = vmatpush1.bf16.msra.mxu1 %v3088_v58  ;;  %v4036_v21 = vld [vmem:[#allocation27_spill] sm:$0xff]  ;;  %v4057_v58 = vld [vmem:[#allocation18_spill] sm:$0xff] }
  0xc5   : >> { %1564 = vmatprep.subr.bf16.mxu0 %v2906_v23  ;;  %1605 = vmatprep.subr.bf16.mxu1 %v3100_v60  ;;  %v4037_v23 = vld [vmem:[#allocation8_spill] sm:$0xff] }
  0xc6   : >> { %v4059_v60 = vld [vmem:[#allocation20_spill] sm:$0xff] }
  0xc8   : >> { %1565 = vmatpush1.bf16.msra.mxu0 %v2921_v25  ;;  %1606 = vmatpush1.bf16.msra.mxu1 %v3112_v62  ;;  %v4038_v25 = vld [vmem:[#allocation29_spill] sm:$0xff]  ;;  %v4060_v62 = vld [vmem:[#allocation51_spill] sm:$0xff] }
  0xc9   : >> { %1566 = vmatprep.subr.bf16.mxu0 %v2933_v27  ;;  %1607 = vmatprep.subr.bf16.mxu1 %v3124_v28  ;;  %v4039_v27 = vld [vmem:[#allocation9_spill] sm:$0xff] }
  0xca   : >> { %v4062_v28 = vld [vmem:[#allocation53_spill] sm:$0xff] }
  0xcc   : >> { %1567 = vmatpush1.bf16.msra.mxu0 %v2946_v30  ;;  %1608 = vmatpush1.bf16.msra.mxu1 %v3136_v35  ;;  %v4041_v30 = vld [vmem:[#allocation10_spill] sm:$0xff]  ;;  %v4063_v35 = vld [vmem:[#allocation24_spill] sm:$0xff] }
  0xcd   : >> { %1568 = vmatprep.subr.bf16.mxu0 %v2958_v33  ;;  %1609 = vmatprep.subr.bf16.mxu1 %v3148_v40  ;;  %v4043_v33 = vld [vmem:[#allocation11_spill] sm:$0xff] }
  0xce   : >> { %v4064_v40 = vld [vmem:[#allocation55_spill] sm:$0xff] }
  0xd0   : >> { %1569 = vmatpush1.bf16.msra.mxu0 %v2970_v37  ;;  %1610 = vmatpush1.bf16.msra.mxu1 %v3161_v0  ;;  %v4031_v0 = vld [vmem:[#allocation5_spill] sm:$0xff]  ;;  %v4045_v37 = vld [vmem:[#allocation12_spill] sm:$0xff] }
  0xd1   : >> { %1638 = vmatprep.subr.bf16.mxu0 %v2982_v39  ;;  %1681 = vmatprep.subr.bf16.mxu1 %v3173_v63  ;;  %v4047_v39 = vld [vmem:[#allocation13_spill] sm:$0xff]  ;;  %v4061_v63 = vld [vmem:[#allocation22_spill] sm:$0xff] }
  0xd3   : >> { %1587 = vmatmul.mubr.bf16.vlgmr.msra.gmra.mrb[20].mxu0 %v3181_v59  ;;  %1628 = vmatmul.mubr.bf16.vlgmr.msra.gmra.mrb[20].mxu1 %v4026_v2  ;;  %v4058_v59 = vld [vmem:[#allocation49_spill] sm:$0xff]  ;;  %v4068_v2 = vld [vmem:[#allocation59_spill] sm:$0xff] }
  0xd4   : >> { %1639 = vmatpush1.bf16.msra.mxu0 %v4027_v5  ;;  %1682 = vmatpush1.bf16.msra.mxu1 %v4028_v7  ;;  %v4069_v5 = vld [vmem:[#allocation30_spill] sm:$0xff]  ;;  %v4070_v7 = vld [vmem:[#allocation61_spill] sm:$0xff] }
  0xd5   : >> { %1640 = vmatprep.subr.bf16.mxu0 %v4029_v9  ;;  %1683 = vmatprep.subr.bf16.mxu1 %v4030_v11  ;;  %v4071_v9 = vld [vmem:[#allocation32_spill] sm:$0xff]  ;;  %v4072_v11 = vld [vmem:[#allocation63_spill] sm:$0xff] }
  0xd6   : >> { %1670 = vmatprep.mubr.bf16.mxu0 %v3974_v53  ;;  %1713 = vmatprep.mubr.bf16.mxu1 %v3974_v53 }
  0xd8   : >> { %1641 = vmatpush1.bf16.msra.mxu0 %v4031_v0  ;;  %1684 = vmatpush1.bf16.msra.mxu1 %v4032_v13  ;;  %v4073_v0 = vld [vmem:[#allocation34_spill] sm:$0xff]  ;;  %v4074_v13 = vld [vmem:[#allocation65_spill] sm:$0xff] }
  0xd9   : >> { %1642 = vmatprep.subr.bf16.mxu0 %v4033_v15  ;;  %1685 = vmatprep.subr.bf16.mxu1 %v4034_v17  ;;  %v4075_v15 = vld [vmem:[#allocation36_spill] sm:$0xff]  ;;  %v4076_v17 = vld [vmem:[#allocation67_spill] sm:$0xff] }
  0xdc   : >> { %1643 = vmatpush1.bf16.msra.mxu0 %v4035_v19  ;;  %1686 = vmatpush1.bf16.msra.mxu1 %v4036_v21  ;;  %v4077_v19 = vld [vmem:[#allocation38_spill] sm:$0xff]  ;;  %v4078_v21 = vld [vmem:[#allocation69_spill] sm:$0xff] }
  0xdd   : >> { %1644 = vmatprep.subr.bf16.mxu0 %v4037_v23  ;;  %1687 = vmatprep.subr.bf16.mxu1 %v4038_v25 }
  0xe0   : >> { %1645 = vmatpush1.bf16.msra.mxu0 %v4039_v27  ;;  %1688 = vmatpush1.bf16.msra.mxu1 %v4040_v29 }
  0xe1   : >> { %1646 = vmatprep.subr.bf16.mxu0 %v4041_v30  ;;  %1689 = vmatprep.subr.bf16.mxu1 %v4042_v32 }
  0xe4   : >> { %1647 = vmatpush1.bf16.msra.mxu0 %v4043_v33  ;;  %1690 = vmatpush1.bf16.msra.mxu1 %v4044_v34 }
  0xe5   : >> { %1648 = vmatprep.subr.bf16.mxu0 %v4045_v37  ;;  %1691 = vmatprep.subr.bf16.mxu1 %v4046_v38  ;;  %v4079_v37 = vld [vmem:[#allocation40_spill] sm:$0xff]  ;;  %v4080_v38 = vld [vmem:[#allocation71_spill] sm:$0xff] }
  0xe8   : >> { %1649 = vmatpush1.bf16.msra.mxu0 %v4047_v39  ;;  %1692 = vmatpush1.bf16.msra.mxu1 %v4048_v42 }
  0xe9   : >> { %1650 = vmatprep.subr.bf16.mxu0 %v4049_v44  ;;  %1693 = vmatprep.subr.bf16.mxu1 %v4050_v46  ;;  %v4081_v44 = vld [vmem:[#allocation42_spill] sm:$0xff]  ;;  %v4082_v46 = vld [vmem:[#allocation73_spill] sm:$0xff] }
  0xec   : >> { %1651 = vmatpush1.bf16.msra.mxu0 %v4051_v48  ;;  %1694 = vmatpush1.bf16.msra.mxu1 %v4052_v50  ;;  %v4083_v48 = vld [vmem:[#allocation44_spill] sm:$0xff]  ;;  %v4084_v50 = vld [vmem:[#allocation75_spill] sm:$0xff] }
  0xed   : >> { %1652 = vmatprep.subr.bf16.mxu0 %v4053_v51  ;;  %1695 = vmatprep.subr.bf16.mxu1 %v4054_v52  ;;  %v4085_v51 = vld [vmem:[#allocation46_spill] sm:$0xff]  ;;  %v4086_v52 = vld [vmem:[#allocation48_spill] sm:$0xff] }
  0xf0   : >> { %1653 = vmatpush1.bf16.msra.mxu0 %v4055_v54  ;;  %1696 = vmatpush1.bf16.msra.mxu1 %v4056_v56  ;;  %v2450_v54 = vld [vmem:[%s2909_s22 + $0xc] sm:$0x3]  ;;  %v4087_v56 = vld [vmem:[#allocation50_spill] sm:$0xff] }
  0xf1   : >> { %1724 = vmatprep.subr.bf16.mxu0 %v4057_v58  ;;  %1771 = vmatprep.subr.bf16.mxu1 %v4058_v59  ;;  %v4088_v58 = vld [vmem:[#allocation52_spill] sm:$0xff]  ;;  %v4089_v59 = vld [vmem:[#allocation54_spill] sm:$0xff] }
  0xf3   : >> { %1671 = vmatmul.mubr.bf16.vlgmr.msra.gmra.mrb[24].mxu0 %v3583_v61  ;;  %1714 = vmatmul.mubr.bf16.vlgmr.msra.gmra.mrb[24].mxu1 %v3578_v57  ;;  %v4066_v61 = vld [vmem:[#allocation57_spill] sm:$0xff]  ;;  %v4067_v57 = vld [vmem:[#allocation28_spill] sm:$0xff] }
  0xf4   : >> { %1725 = vmatpush1.bf16.msra.mxu0 %v4059_v60  ;;  %1772 = vmatpush1.bf16.msra.mxu1 %v4060_v62 }
  0xf5   : >> { %1726 = vmatprep.subr.bf16.mxu0 %v4061_v63  ;;  %1773 = vmatprep.subr.bf16.mxu1 %v4062_v28 }
  0xf6   : >> { %1756 = vmatprep.mubr.bf16.mxu0 %v3974_v53  ;;  %1803 = vmatprep.mubr.bf16.mxu1 %v3974_v53 }
  0xf8   : >> { %1727 = vmatpush1.bf16.msra.mxu0 %v4063_v35  ;;  %1774 = vmatpush1.bf16.msra.mxu1 %v4064_v40 }
  0xf9   : >> { %1728 = vmatprep.subr.bf16.mxu0 %v4065_v3  ;;  %1775 = vmatprep.subr.bf16.mxu1 %v4066_v61  ;;  %v4099_v61 = vld [vmem:[#allocation74_spill] sm:$0xff] }
  0xfc   : >> { %1729 = vmatpush1.bf16.msra.mxu0 %v4067_v57  ;;  %1776 = vmatpush1.bf16.msra.mxu1 %v4068_v2 }
  0xfd   : >> { %1730 = vmatprep.subr.bf16.mxu0 %v4069_v5  ;;  %1777 = vmatprep.subr.bf16.mxu1 %v4070_v7  ;;  %v2708_v5 = vld [vmem:[%s2909_s22 + $0xc] ss:$0 sps:$4 sm:$0x66]   ;;  %v4100_v7 = vld [vmem:[#allocation76_spill] sm:$0xff] }
 0x100   : >> { %1731 = vmatpush1.bf16.msra.mxu0 %v4071_v9  ;;  %1778 = vmatpush1.bf16.msra.mxu1 %v4072_v11  ;;  %v1873_v9 = vrot.slane %v2708_v5, 1  ;;  %v4101_v11 = vld [vmem:[#allocation77_spill] sm:$0xff] }
 0x101   : >> { %1732 = vmatprep.subr.bf16.mxu0 %v4073_v0  ;;  %1779 = vmatprep.subr.bf16.mxu1 %v4074_v13 }
 0x104   : >> { %1733 = vmatpush1.bf16.msra.mxu0 %v4075_v15  ;;  %1780 = vmatpush1.bf16.msra.mxu1 %v4076_v17 }
 0x105   : >> { %1734 = vmatprep.subr.bf16.mxu0 %v4077_v19  ;;  %1781 = vmatprep.subr.bf16.mxu1 %v4078_v21 }
 0x106   : >> { %v340_v23 = vpop.f32.mrb[0].mxu0  ;;  %v461_v25 = vpop.f32.mrb[0].mxu1 }
 0x107   : >> { %v462_v27 = vadd.f32 %v461_v25, %v340_v23  ;;  %v342_v29 = vpop.f32.mrb[1].mxu0  ;;  %v463_v30 = vpop.f32.mrb[1].mxu1 }
 0x108   : >> { %v464_v32 = vadd.f32 %v463_v30, %v342_v29  ;;  %v344_v33 = vpop.f32.mrb[2].mxu0  ;;  %v465_v34 = vpop.f32.mrb[2].mxu1  ;;  %1735 = vmatpush1.bf16.msra.mxu0 %v4079_v37  ;;  %1782 = vmatpush1.bf16.msra.mxu1 %v4080_v38 }
 0x109   : >> { %v345_v39 = vpop.f32.mrb[3].mxu0  ;;  %v466_v42 = vpop.f32.mrb[3].mxu1  ;;  %1736 = vmatprep.subr.bf16.mxu0 %v4081_v44  ;;  %1783 = vmatprep.subr.bf16.mxu1 %v4082_v46 }
 0x10c   : >> { %1737 = vmatpush1.bf16.msra.mxu0 %v4083_v48  ;;  %1784 = vmatpush1.bf16.msra.mxu1 %v4084_v50 }
 0x10d   : >> { %1738 = vmatprep.subr.bf16.mxu0 %v4085_v51  ;;  %1785 = vmatprep.subr.bf16.mxu1 %v3552_v41  ;;  %v4092_v41 = vld [vmem:[#allocation60_spill] sm:$0xff] }
 0x110   : >> { %1739 = vmatpush1.bf16.msra.mxu0 %v4086_v52  ;;  %1786 = vmatpush1.bf16.msra.mxu1 %v3564_v47  ;;  %v4090_v47 = vld [vmem:[#allocation56_spill] sm:$0xff] }
 0x111   : >> { %1826 = vmatprep.subr.bf16.mxu0 %v4087_v56  ;;  %1875 = vmatprep.subr.bf16.mxu1 %v3576_v49  ;;  %v4094_v49 = vld [vmem:[#allocation64_spill] sm:$0xff] }
 0x113   : >> { %1757 = vmatmul.mubr.bf16.vlgmr.msra.gmra.mrb[28].mxu0 %v1373_v26  ;;  %1804 = vmatmul.mubr.bf16.vlgmr.msra.gmra.mrb[28].mxu1 %v2450_v54 }
 0x114   : >> { %1827 = vmatpush1.bf16.msra.mxu0 %v4088_v58  ;;  %1876 = vmatpush1.bf16.msra.mxu1 %v3588_v36  ;;  %v4093_v36 = vld [vmem:[#allocation62_spill] sm:$0xff] }
 0x115   : >> { %1828 = vmatprep.subr.bf16.mxu0 %v4089_v59  ;;  %1877 = vmatprep.subr.bf16.mxu1 %v3595_v43  ;;  %v2707_v43 = vld [vmem:[%s2909_s22 + $0xc] ss:$0 sps:$4 sm:$0x77]   ;;  %s2158_s22 = sshll.u32 %s2723_s24, 1  ;;  %s176_s24 = sadd.s32 1, %s2723_s24  }
 0x116   : >> { %1858 = vmatprep.mubr.bf16.mxu0 %v3974_v53  ;;  %1907 = vmatprep.mubr.bf16.mxu1 %v3974_v53  ;;  %v4095_v53 = vld [vmem:[#allocation66_spill] sm:$0xff]  ;;  %v1819_v57 = vshrl.u32 %v2707_v43, 16  ;;  %s2075_s27 = scalar_lea.vmem %s2765_s20, %s2158_s22  ;;  %p173_p4 = scmp.ge.s32.totalorder %s176_s24, 2  }
 0x118   : >> { %1829 = vmatpush1.bf16.msra.mxu0 %v4090_v47  ;;  %1878 = vmatpush1.bf16.msra.mxu1 %v3604_v55  ;;  %v4096_v55 = vld [vmem:[#allocation68_spill] sm:$0xff] }
 0x119   : >> { %1830 = vmatprep.subr.bf16.mxu0 %v4091_v31  ;;  %1879 = vmatprep.subr.bf16.mxu1 %v3611_v1  ;;  %v4097_v1 = vld [vmem:[#allocation70_spill] sm:$0xff] }
 0x11c   : >> { %1831 = vmatpush1.bf16.msra.mxu0 %v4092_v41  ;;  %1880 = vmatpush1.bf16.msra.mxu1 %v3620_v4 }
 0x11d   : >> { %1832 = vmatprep.subr.bf16.mxu0 %v4093_v36  ;;  %1881 = vmatprep.subr.bf16.mxu1 %v3627_v6 }
 0x120   : >> { %1833 = vmatpush1.bf16.msra.mxu0 %v4094_v49  ;;  %1882 = vmatpush1.bf16.msra.mxu1 %v3634_v8  ;;  %v1821_v8 = vshll.u32 %v2707_v43, 16 }
 0x121   : >> { %1834 = vmatprep.subr.bf16.mxu0 %v4095_v53  ;;  %1883 = vmatprep.subr.bf16.mxu1 %v3641_v10  ;;  %v4098_v10 = vld [vmem:[#allocation72_spill] sm:$0xff] }
 0x122   : >> { %v1823_v2 = vrot.slane %v1821_v8, 1 }
 0x124   : >> { %1835 = vmatpush1.bf16.msra.mxu0 %v4096_v55  ;;  %1884 = vmatpush1.bf16.msra.mxu1 %v3648_v12 }
 0x125   : >> { %1836 = vmatprep.subr.bf16.mxu0 %v4097_v1  ;;  %1885 = vmatprep.subr.bf16.mxu1 %v3655_v14 }
 0x126   : >> { %v605_v4 = vpop.f32.mrb[4].mxu0  ;;  %v749_v26 = vpop.f32.mrb[4].mxu1 }
 0x127   : >> { %v612_v6 = vadd.f32 %v605_v4, %v462_v27  ;;  %v607_v60 = vpop.f32.mrb[5].mxu0  ;;  %v751_v62 = vpop.f32.mrb[5].mxu1 }
 0x128   : >> { %v613_v63 = vadd.f32 %v607_v60, %v464_v32  ;;  %v609_v28 = vpop.f32.mrb[6].mxu0  ;;  %v753_v35 = vpop.f32.mrb[6].mxu1  ;;  %1837 = vmatpush1.bf16.msra.mxu0 %v4098_v10  ;;  %1886 = vmatpush1.bf16.msra.mxu1 %v3662_v16  ;;  %v1824_v16 = vor.u32 %v1823_v2, %v1819_v57 }
 0x129   : >> { %v756_v40 = vadd.f32 %v749_v26, %v612_v6  ;;  %v610_v12 = vpop.f32.mrb[7].mxu0  ;;  %v754_v3 = vpop.f32.mrb[7].mxu1  ;;  %1838 = vmatprep.subr.bf16.mxu0 %v4099_v61  ;;  %1887 = vmatprep.subr.bf16.mxu1 %v3669_v18 }
 0x12a   : >> { %v757_v14 = vadd.f32 %v751_v62, %v613_v63 }
 0x12c   : >> { %1839 = vmatpush1.bf16.msra.mxu0 %v4100_v7  ;;  %1888 = vmatpush1.bf16.msra.mxu1 %v3676_v20 }
 0x12d   : >> { %1840 = vmatprep.subr.bf16.mxu0 %v3557_v45  ;;  %1889 = vmatprep.subr.bf16.mxu1 %v3683_v22 }
 0x130   : >> { %1841 = vmatpush1.bf16.msra.mxu0 %v4101_v11  ;;  %1890 = vmatpush1.bf16.msra.mxu1 %v3693_v24 }
 0x133   : >> { %1859 = vmatmul.mubr.bf16.vlgmr.msra.gmra.mrb[32].mxu0 %v1824_v16  ;;  %1908 = vmatmul.mubr.bf16.vlgmr.msra.gmra.mrb[32].mxu1 %v1873_v9 }
 0x146   : >> { %v901_v18 = vpop.f32.mrb[8].mxu0  ;;  %v1047_v0 = vpop.f32.mrb[8].mxu1 }
 0x147   : >> { %v908_v13 = vadd.f32 %v901_v18, %v756_v40  ;;  %v903_v15 = vpop.f32.mrb[9].mxu0  ;;  %v1049_v17 = vpop.f32.mrb[9].mxu1 }
 0x148   : >> { %v909_v19 = vadd.f32 %v903_v15, %v757_v14  ;;  %v905_v21 = vpop.f32.mrb[10].mxu0  ;;  %v1051_v20 = vpop.f32.mrb[10].mxu1 }
 0x149   : >> { %v1054_v23 = vadd.f32 %v1047_v0, %v908_v13  ;;  %v906_v45 = vpop.f32.mrb[11].mxu0  ;;  %v1052_v25 = vpop.f32.mrb[11].mxu1  ;;  %v1499_v21 = vlaneseq }
 0x14a   : >> { %v1055_v22 = vadd.f32 %v1049_v17, %v909_v19  ;;  %v4102_v25 = vld [vmem:[#allocation2_spill] sm:$0xff] }
 0x14b   : >> { %v3849_v20 = vshrl.u32 %v1499_v21, 7 }
 0x14d   : >> { %v1505_v45 = vsub.s32 1, %v3849_v20 }
 0x166   : >> { %v1191_v27 = vpop.f32.mrb[12].mxu0  ;;  %v1343_v29 = vpop.f32.mrb[12].mxu1 }
 0x167   : >> { %v1198_v30 = vadd.f32 %v1191_v27, %v1054_v23  ;;  %v1193_v32 = vpop.f32.mrb[13].mxu0  ;;  %v1345_v33 = vpop.f32.mrb[13].mxu1  ;;  %v1501_v23 = vsub.s32 0, %v3849_v20  ;;  %v1506_v27 = vrot.slane %v4102_v25, %v1505_v45 }
 0x168   : >> { %v1199_v24 = vadd.f32 %v1193_v32, %v1055_v22  ;;  %v1195_v34 = vpop.f32.mrb[14].mxu0  ;;  %v1347_v37 = vpop.f32.mrb[14].mxu1 }
 0x169   : >> { %v1350_v38 = vadd.f32 %v1343_v29, %v1198_v30  ;;  %v1196_v39 = vpop.f32.mrb[15].mxu0  ;;  %v1348_v42 = vpop.f32.mrb[15].mxu1  ;;  %v1502_v22 = vrot.slane %v4102_v25, %v1501_v23  ;;  %v2726_v37 = vmov 1983009808  }
 0x16a   : >> { %v1351_v44 = vadd.f32 %v1345_v33, %v1199_v24 }
 0x186   : >> { %v1489_v46 = vpop.f32.mrb[16].mxu0  ;;  %v1547_v48 = vpop.f32.mrb[16].mxu1 }
 0x187   : >> { %v1496_v50 = vadd.f32 %v1489_v46, %v1350_v38  ;;  %v1491_v51 = vpop.f32.mrb[17].mxu0  ;;  %v1549_v52 = vpop.f32.mrb[17].mxu1  ;;  %v1928_v38 = vunpack.c.l.s4 %v2726_v37 }
 0x188   : >> { %v1497_v54 = vadd.f32 %v1491_v51, %v1351_v44  ;;  %v1493_v56 = vpop.f32.mrb[18].mxu0  ;;  %v1551_v58 = vpop.f32.mrb[18].mxu1 }
 0x189   : >> { %v1494_v59 = vpop.f32.mrb[19].mxu0  ;;  %v1552_v47 = vpop.f32.mrb[19].mxu1  ;;  %v1509_v44 = vadd.f32 %v1502_v22, %v1496_v50 }
 0x18a   : >> { %v1929_v47 = vunpack.c.0.s8 %v1928_v38 }
 0x1a6   : >> { %v1588_v31 = vpop.f32.mrb[20].mxu0  ;;  %v1629_v41 = vpop.f32.mrb[20].mxu1 }
 0x1a7   : >> { %v1589_v36 = vadd.f32 %v1588_v31, %v1547_v48  ;;  %v1590_v49 = vpop.f32.mrb[21].mxu0  ;;  %v1631_v53 = vpop.f32.mrb[21].mxu1  ;;  %v1511_v31 = vmax.f32 %v1509_v44, 0.0 }
 0x1a8   : >> { %v1591_v43 = vadd.f32 %v1590_v49, %v1549_v52  ;;  %v1592_v55 = vpop.f32.mrb[22].mxu0  ;;  %v1633_v1 = vpop.f32.mrb[22].mxu1  ;;  %v1510_v52 = vadd.f32 %v1506_v27, %v1497_v54 }
 0x1a9   : >> { %v1636_v4 = vadd.f32 %v1629_v41, %v1589_v36  ;;  %v1593_v26 = vpop.f32.mrb[23].mxu0  ;;  %v1634_v6 = vpop.f32.mrb[23].mxu1  ;;  %v1932_v55 = vsub.s32 %v1929_v47, %v3849_v20 }
 0x1aa   : >> { %v1637_v60 = vadd.f32 %v1631_v53, %v1591_v43  ;;  %v1512_v36 = vmax.f32 %v1510_v52, 0.0 }
 0x1c6   : >> { %v1672_v62 = vpop.f32.mrb[24].mxu0  ;;  %v1715_v8 = vpop.f32.mrb[24].mxu1 }
 0x1c7   : >> { %v1679_v63 = vadd.f32 %v1672_v62, %v1636_v4  ;;  %v1674_v28 = vpop.f32.mrb[25].mxu0  ;;  %v1717_v35 = vpop.f32.mrb[25].mxu1 }
 0x1c8   : >> { %v1680_v10 = vadd.f32 %v1674_v28, %v1637_v60  ;;  %v1676_v40 = vpop.f32.mrb[26].mxu0  ;;  %v1719_v12 = vpop.f32.mrb[26].mxu1 }
 0x1c9   : >> { %v1722_v3 = vadd.f32 %v1715_v8, %v1679_v63  ;;  %v1677_v61 = vpop.f32.mrb[27].mxu0  ;;  %v1720_v14 = vpop.f32.mrb[27].mxu1  ;;  %v2727_v12 = vmov 1966171168  }
 0x1ca   : >> { %v1723_v57 = vadd.f32 %v1717_v35, %v1680_v10 }
 0x1e6   : >> { %v1758_v2 = vpop.f32.mrb[28].mxu0  ;;  %v1805_v5 = vpop.f32.mrb[28].mxu1 }
 0x1e7   : >> { %v1765_v7 = vadd.f32 %v1758_v2, %v1722_v3  ;;  %v1760_v16 = vpop.f32.mrb[29].mxu0  ;;  %v1807_v9 = vpop.f32.mrb[29].mxu1  ;;  %v1994_v3 = vunpack.c.l.s4 %v2727_v12 }
 0x1e8   : >> { %v1766_v11 = vadd.f32 %v1760_v16, %v1723_v57  ;;  %v1762_v18 = vpop.f32.mrb[30].mxu0  ;;  %v1809_v0 = vpop.f32.mrb[30].mxu1 }
 0x1e9   : >> { %v1812_v13 = vadd.f32 %v1805_v5, %v1765_v7  ;;  %v1763_v15 = vpop.f32.mrb[31].mxu0  ;;  %v1810_v17 = vpop.f32.mrb[31].mxu1  ;;  %v1995_v18 = vunpack.c.0.s8 %v1994_v3  ;;  %v2728_v0 = vmov 1935823168  }
 0x1ea   : >> { %v1813_v19 = vadd.f32 %v1807_v9, %v1766_v11 }
 0x206   : >> { %v1860_v29 = vpop.f32.mrb[32].mxu0  ;;  %v1909_v30 = vpop.f32.mrb[32].mxu1 }
 0x207   : >> { %v1867_v32 = vadd.f32 %v1860_v29, %v1812_v13  ;;  %v1862_v33 = vpop.f32.mrb[33].mxu0  ;;  %v1911_v24 = vpop.f32.mrb[33].mxu1  ;;  %v2023_v13 = vunpack.c.l.s4 %v2728_v0  ;;  %v1998_v29 = vsub.s32 %v1995_v18, %v3849_v20 }
 0x208   : >> { %v1868_v34 = vadd.f32 %v1862_v33, %v1813_v19  ;;  %v1864_v39 = vpop.f32.mrb[34].mxu0  ;;  %v1913_v42 = vpop.f32.mrb[34].mxu1 }
 0x209   : >> { %v1916_v46 = vadd.f32 %v1909_v30, %v1867_v32  ;;  %v1865_v48 = vpop.f32.mrb[35].mxu0  ;;  %v1914_v51 = vpop.f32.mrb[35].mxu1 }
 0x20a   : >> { %v1917_v56 = vadd.f32 %v1911_v24, %v1868_v34 }
 0x20b   : >> { %v1918_v58 = vadd.f32 %v1916_v46, %v1502_v22 }
 0x20c   : >> { %v1919_v59 = vadd.f32 %v1917_v56, %v1506_v27  ;;  %v2024_v27 = vunpack.c.0.s8 %v2023_v13 }
 0x20d   : >> { %v1920_v41 = vmax.f32 %v1918_v58, 0.0 }
 0x20e   : >> { %v1921_v49 = vmax.f32 %v1919_v59, 0.0  ;;  %v2027_v38 = vsub.s32 %v2024_v27, %v3849_v20 }
 0x20f   : >> { %v1922_v53 = vmax.f32 %v1511_v31, %v1920_v41 }
 0x210   : >> { %v1923_v43 = vmax.f32 %v1512_v36, %v1921_v49 }
 0x212   : >> { %v1926_v1 = vcombine.low %v1922_v53, %v1923_v43 }
 0x214   : >> { %v1933_v4 = vrot.slane %v1926_v1, %v1932_v55 }
 0x216   : >> { %v1934_v50 = vcombine.high %v1933_v4, %v1933_v4  ;;  %v1941_v26 = vrot.slane %v1933_v4, %v1932_v55 }
 0x218   : >> { %v1942_v6 = vcombine.high %v1941_v26, %v1941_v26  ;;  %v1949_v60 = vrot.slane %v1934_v50, %v1932_v55  ;;  %v1956_v54 = vsel %vm1955_vm0, %v1941_v26, -inf }
 0x219   : >> { %v1957_v62 = vrot.slane %v1956_v54, 4 }
 0x21a   : >> { %v1950_v8 = vcombine.high %v1949_v60, %v1949_v60  ;;  %v1963_v63 = vsel %vm1955_vm0, %v1942_v6, -inf  ;;  %v1970_v28 = vsel %vm1955_vm0, %v1949_v60, -inf }
 0x21b   : >> { %v1958_v35 = vmax.f32 %v1956_v54, %v1957_v62  ;;  %v1964_v10 = vrot.slane %v1963_v63, 4  ;;  %v1971_v40 = vrot.slane %v1970_v28, 4 }
 0x21c   : >> { %v1977_v61 = vsel %vm1955_vm0, %v1950_v8, -inf }
 0x21d   : >> { %v1959_v14 = vrot.slane %v1958_v35, 2  ;;  %v1965_v57 = vmax.f32 %v1963_v63, %v1964_v10  ;;  %v1972_v2 = vmax.f32 %v1970_v28, %v1971_v40  ;;  %v1978_v5 = vrot.slane %v1977_v61, 4 }
 0x21f   : >> { %v1960_v7 = vmax.f32 %v1958_v35, %v1959_v14  ;;  %v1966_v16 = vrot.slane %v1965_v57, 2  ;;  %v1973_v9 = vrot.slane %v1972_v2, 2  ;;  %v1979_v11 = vmax.f32 %v1977_v61, %v1978_v5 }
 0x221   : >> { %v1961_v15 = vrot.slane %v1960_v7, 1  ;;  %v1967_v17 = vmax.f32 %v1965_v57, %v1966_v16  ;;  %v1974_v19 = vmax.f32 %v1972_v2, %v1973_v9  ;;  %v1980_v21 = vrot.slane %v1979_v11, 2 }
 0x223   : >> { %v1968_v23 = vrot.slane %v1967_v17, 1  ;;  %v1975_v45 = vrot.slane %v1974_v19, 1  ;;  %v1981_v22 = vmax.f32 %v1979_v11, %v1980_v21  ;;  %v1962_v30 = vmax.f32 %v1960_v7, %v1961_v15 }
 0x225   : >> { %v1969_v32 = vmax.f32 %v1967_v17, %v1968_v23  ;;  %v1982_v33 = vrot.slane %v1981_v22, 1  ;;  %v1976_v24 = vmax.f32 %v1974_v19, %v1975_v45 }
 0x227   : >> { %v1983_v34 = vmax.f32 %v1981_v22, %v1982_v33  ;;  %v2455_v37 = vpack.c.bf16 %v1969_v32, %v1962_v30 }
 0x229   : >> { %v1999_v39 = vrot.slane %v2455_v37, %v1998_v29  ;;  %v2456_v42 = vpack.c.bf16 %v1983_v34, %v1976_v24 }
 0x22b   : >> { %v2006_v44 = vrot.slane %v1999_v39, %v1998_v29  ;;  %v2014_v46 = vrot.slane %v2456_v42, %v1998_v29 }
 0x22d   : >> { %v2021_v48 = vrot.slane %v2014_v46, %v1998_v29  ;;  %v2028_v51 = vrot.slane %v2006_v44, %v2027_v38 }
 0x22f   : >> { %v2042_v52 = vrot.slane %v2021_v48, %v2027_v38  ;;  %v2035_v56 = vrot.slane %v2028_v51, %v2027_v38 }
 0x231   : >> { %v2049_v58 = vrot.slane %v2042_v52, %v2027_v38  ;;  %v2050_v31 = vunpack.c.l.b16 %v2035_v56  ;;  %v2051_v41 = vunpack.c.h.b16 %v2035_v56 }
 0x233   : >> { %v2052_v59 = vunpack.c.l.b16 %v2049_v58  ;;  %v2053_v47 = vunpack.c.h.b16 %v2049_v58 }
 0x235   : >> { %v2054_v36 = vrot.slane %v2052_v59, 7  ;;  %v2057_v49 = vrot.slane %v2053_v47, 7 }
 0x236   : > { %175 = sbr.rel (!%p173_p4) target bundleno = 17 (0x11), region = 82 }
 0x237   : >> { %v2056_v20 = vsel %vm2055_vm1, %v2054_v36, %v2050_v31  ;;  %v2058_v53 = vsel %vm2055_vm1, %v2057_v49, %v2051_v41 }
 0x238   : >> { %v2059_v43 = vpack.c.b16 %v2058_v53, %v2056_v20 }
 0x23a   : >> { %v2066_v55 = vrot.slane %v2059_v43, %v1998_v29 }
 0x23c   : >> { %2457 = vst.sshfl [vmem:[%s2075_s27] sm:$0x5 pattern:$0x73625140] %v2066_v55 }
 0x23d PF: > { %s13_s12 = sadd.s32 1, %s2719_s12  }
 0x23e   : > { %p10_p5 = scmp.ge.s32.totalorder %s13_s12, 4  }
 0x240   :  { %12 = sbr.rel (!%p10_p5) target bundleno = 1 (0x1), region = 93 }

// kernel: crnn_forward.15
= control target key start
LH: loop header
LB: loop body
LE: loop exit
PB: predicated region body
PF: predicated region fallthrough
CT: control target
= control target key end

     0   :  { %s352_s1 = inlined_call_operand.vmem [shape: bf16[256,128], index: 1, kind: input, shape index: {}]   ;;  %s353_s0 = inlined_call_operand.vmem [shape: bf16[16,256], index: 0, kind: input, shape index: {}]   ;;  %s354_s2 = inlined_call_operand.vmem [shape: f32[1,128], index: 2, kind: input, shape index: {}]   ;;  %s355_s3 = inlined_call_operand.vmem [shape: f32[16,128], index: 3, kind: output, shape index: {}]  }
   0x1   :  { %v250_v0 = vld [vmem:[%s352_s1 + $0x40] sm:$0xff]   ;;  %v252_v2 = vld [vmem:[%s352_s1 + $0x48] sm:$0xff]   ;;  %v254_v4 = vld [vmem:[%s352_s1 + $0x50] sm:$0xff]  }
   0x2   :  { %v251_v1 = vld [vmem:[%s352_s1] sm:$0xff]   ;;  %228 = vmatprep.subr.bf16.mxu0 %v250_v0  ;;  %v253_v3 = vld [vmem:[%s352_s1 + $0x8] sm:$0xff]   ;;  %v255_v5 = vld [vmem:[%s352_s1 + $0x10] sm:$0xff]  }
   0x3   :  { %229 = vmatpush3.bf16.msra.mxu0 %v251_v1  ;;  %v256_v6 = vld [vmem:[%s352_s1 + $0x58] sm:$0xff]   ;;  %v258_v8 = vld [vmem:[%s352_s1 + $0x60] sm:$0xff]   ;;  %v260_v10 = vld [vmem:[%s352_s1 + $0x68] sm:$0xff]  }
   0x4   :  { %230 = vmatprep.subr.bf16.mxu0 %v252_v2  ;;  %v257_v7 = vld [vmem:[%s352_s1 + $0x18] sm:$0xff]   ;;  %v259_v9 = vld [vmem:[%s352_s1 + $0x20] sm:$0xff]   ;;  %v261_v12 = vld [vmem:[%s352_s1 + $0x28] sm:$0xff]  }
   0x5   :  { %v268_v11 = vld [vmem:[%s353_s0 + $0x4] ss:$8 sps:$4 sm:$0xff]   ;;  %v262_v13 = vld [vmem:[%s352_s1 + $0x70] sm:$0xff]   ;;  %v264_v15 = vld [vmem:[%s352_s1 + $0x78] sm:$0xff]  }
   0x6   :  { %194 = vmatprep.mubr.bf16.mxu0 %v268_v11  ;;  %v263_v14 = vld [vmem:[%s352_s1 + $0x30] sm:$0xff]   ;;  %v265_v16 = vld [vmem:[%s352_s1 + $0x38] sm:$0xff]   ;;  %v266_v17 = vld [vmem:[%s353_s0] ss:$8 sps:$4 sm:$0xff]  }
   0x7   :  { %231 = vmatpush3.bf16.msra.mxu0 %v253_v3  ;;  %v209_v19 = vld [vmem:[%s354_s2] ss:$0 sm:$0xff] }
   0x8   :  { %232 = vmatprep.subr.bf16.mxu0 %v254_v4 }
   0xb   :  { %233 = vmatpush3.bf16.msra.mxu0 %v255_v5 }
   0xc   :  { %234 = vmatprep.subr.bf16.mxu0 %v256_v6 }
   0xf   :  { %235 = vmatpush3.bf16.msra.mxu0 %v257_v7 }
  0x10   :  { %236 = vmatprep.subr.bf16.mxu0 %v258_v8 }
  0x13   :  { %237 = vmatpush3.bf16.msra.mxu0 %v259_v9 }
  0x14   :  { %238 = vmatprep.subr.bf16.mxu0 %v260_v10 }
  0x17   :  { %239 = vmatpush3.bf16.msra.mxu0 %v261_v12 }
  0x18   :  { %240 = vmatprep.subr.bf16.mxu0 %v262_v13 }
  0x1b   :  { %241 = vmatpush3.bf16.msra.mxu0 %v263_v14 }
  0x1c   :  { %242 = vmatprep.subr.bf16.mxu0 %v264_v15 }
  0x1f   :  { %243 = vmatpush3.bf16.msra.mxu0 %v265_v16 }
  0x22   :  { %195 = vmatmul.mubr.bf16.vlgmr.msra.gmra.mrb[0].mxu0 %v266_v17 }
  0xf5   :  { %v244_v18 = vpop.f32.mrb[0].mxu0 }
  0xf6   :  { %v245_v20 = vpop.f32.mrb[1].mxu0 }
  0xf7   :  { %v246_v21 = vadd.f32 %v245_v20, %v244_v18  ;;  %v247_v22 = vpop.f32.mrb[2].mxu0 }
  0xf8   :  { %v248_v23 = vpop.f32.mrb[3].mxu0 }
  0xf9   :  { %v197_v24 = vadd.f32 %v246_v21, %v209_v19  ;;  %v249_v25 = vadd.f32 %v248_v23, %v247_v22 }
  0xfb   :  { %203 = vst [vmem:[%s355_s3] sm:$0xff] %v197_v24  ;;  %v200_v26 = vadd.f32 %v249_v25, %v209_v19 }
  0xfd   :  { %204 = vst [vmem:[%s355_s3 + $0x8] sm:$0xff] %v200_v26 }

// kernel: crnn_forward.17
= control target key start
LH: loop header
LB: loop body
LE: loop exit
PB: predicated region body
PF: predicated region fallthrough
CT: control target
= control target key end

     0   :  { %s694_s9 = smov 0   ;;  %s696_s10 = smov 0   ;;  %s782_s0 = inlined_call_operand.vmem [shape: f32[2,2,8,128], index: 0, kind: input, shape index: {}]   ;;  %s783_s1 = inlined_call_operand.vmem [shape: bf16[2,32,128], index: 1, kind: input, shape index: {}]   ;;  %s784_s2 = inlined_call_operand.vmem [shape: bf16[2,2,8,32], index: 2, kind: output, shape index: {}]  }
   0x1   :  { %s698_s11 = smov 0  }
   0x2 LB: > { %s24_s12 = sadd.s32 1, %s655_s10  ;;  %p532_p0 = scmp.ge.s32.totalorder %s659_s11, 1  ;;  %s659_s11 = sphi %s698_s11, %s12_s11   ;;  %s655_s10 = sphi %s696_s10, %s788_s10   ;;  %s651_s9 = sphi %s694_s9, %s787_s9  }
   0x3   : > { %p26_p1 = scmp.ge.s32.totalorder %s24_s12, 2  ;;  %p173_p2 = scmp.lt.s32.totalorder %s659_s11, 3 }
   0x5   : > { %s790_s12 = smov (%p26_p1, %s24_s12), 0  ;;  %p174_p3 = pnand %p532_p0, %p173_p2 }
   0x6   : > { %p224_p4 = scmp.lt.s32.totalorder (!%p174_p3), %s651_s9, 1  ;;  %vm268_vm0 = vcmask (!%p174_p3), 261120   ;;  %v673_v0 = vmov (!%p174_p3), 0.0   ;;  %s743_s25 = smov (!%p174_p3), 0  }
   0x7   : > { %177 = sbr.rel (%p174_p3) target bundleno = 738 (0x2e2), region = 28  ;;  %269 = vst.msk [vmem:[#allocation2] sm:$0xff] (!%p174_p3), %vm268_vm0, %v673_v0  ;;  %270 = vst.msk [vmem:[#allocation3] sm:$0xff] (!%p174_p3), %vm268_vm0, %v673_v0 }
   0xe   : > { %s225_s13 = scalar_select %p224_p4, %s651_s9, 1  ;;  %v275_v5 = vld [vmem:[#allocation2] sm:$0xff]   ;;  %v276_v6 = vld [vmem:[#allocation3] sm:$0xff]  }
  0x10   : > { %s548_s14 = sshll.u32 %s225_s13, 4  ;;  %s550_s15 = sshll.u32 %s225_s13, 3 }
  0x11   : > { %s721_s18 = scalar_lea.vmem %s782_s0, %s548_s14  ;;  %s242_s21 = scalar_lea.vmem %s783_s1, %s548_s14 }
  0x12   : > { %s729_s24 = scalar_lea.vmem %s784_s2, %s550_s15  ;;  %v731_v1 = vld [vmem:[%s242_s21] sm:$0xf]  ;;  %v733_v2 = vld [vmem:[%s242_s21 + $0x4] sm:$0xf]  ;;  %v735_v3 = vld [vmem:[%s242_s21 + $0x8] sm:$0xf] }
  0x13   : > { %v737_v4 = vld [vmem:[%s242_s21 + $0xc] sm:$0xf] }
  0x14 LB: >> { %v540_v7 = vcombine.low %v731_v1, %v733_v2  ;;  %v674_v8 = vmov 0.0   ;;  %vm675_vm1 = vmmov 0   ;;  %v541_v9 = vcombine.low %v735_v3, %v737_v4  ;;  %p285_p5 = scmp.eq.s32.totalorder %s651_s9, 0  ;;  %s286_s26 = ssub.s32 1, %s671_s25  ;;  %s671_s25 = sphi %s743_s25, %s282_s25   ;;  %v667_v5 = vphi %v275_v5, %v786_v5   ;;  %v663_v6 = vphi %v276_v6, %v785_v6  }
  0x15   : >> { %555 = vmatprep.subr.bf16.mxu0 %v674_v8  ;;  %559 = vmatprep.mubr.msk.bf16.mxu0 %vm675_vm1, %v674_v8  ;;  %v291_v10 = vpack.c.bf16 %v667_v5, %v667_v5  ;;  %s676_s30 = smov 64   ;;  %s677_s3 = smov 32   ;;  %vm386_vm2 = vcmask 257024  }
  0x16   : >> { %556 = vmatpush3.bf16.msra.mxu0 %v540_v7  ;;  %s758_s27 = scalar_select %p285_p5, %s671_s25, %s286_s26 }
  0x17   : >> { %557 = vmatprep.subr.bf16.mxu0 %v674_v8  ;;  %s678_s4 = smov 96   ;;  %s282_s25 = sadd.s32 1, %s671_s25  }
  0x18   : >> { %s539_s28 = sshll.u32 %s758_s27, 3  ;;  %s545_s5 = sshll.u32 %s758_s27, 2 }
  0x19   : >> { %s289_s29 = scalar_lea.vmem %s721_s18, %s539_s28  ;;  %s385_s6 = scalar_lea.vmem %s729_s24, %s545_s5 }
  0x1a   : >> { %558 = vmatpush3.bf16.msra.mxu0 %v541_v9  ;;  %v290_v11 = vld [vmem:[%s289_s29] sm:$0xff]  ;;  %p279_p6 = scmp.ge.s32.totalorder %s282_s25, 2  }
  0x1d   : >> { %560 = vmatmul.mubr.msk.bf16.vlgmr.msra.gmra.mrb[0].mxu0 %vm268_vm0, %v291_v10 }
  0xf0   : >> { %v342_v12 = vpop.f32.mrb[0].mxu0 }
  0xf1   : >> { %v348_v13 = vadd.f32 %v342_v12, %v290_v11  ;;  %v561_v14 = vpop.f32.mrb[1].mxu0 }
  0xf2   : >> { %v345_v15 = vpop.f32.mrb[2].mxu0 }
  0xf3   : >> { %617 = vtanh.f32 %v348_v13  ;;  %v562_v16 = vpop.f32.mrb[3].mxu0  ;;  %v543_v18 = vmul.f32 -1.442695, %v348_v13 }
  0xf5   : >> { %619 = vpow2.f32 %v543_v18 }
  0xfd   : >> { %v618_v17 = vpop.eup %617 }
  0xfe   : >> { %362 = vrot.lane.b32.xlu0 %v618_v17, %s676_s30 }
  0xff   : >> { %v620_v19 = vpop.eup %619 }
 0x100   : >> { %v352_v20 = vadd.f32 1.0, %v620_v19 }
 0x102   : >> { %357 = vrot.lane.b32.xlu0 %v663_v6, %s677_s3  ;;  %621 = vrcp.f32 %v352_v20 }
 0x10c   : >> { %v622_v21 = vpop.eup %621 }
 0x170   : >> { %v363_v22 = vpop.permute.xlu0 %362 }
 0x171   : >> { %v365_v23 = vmul.f32 %v622_v21, %v363_v22 }
 0x173   : >> { %367 = vrot.lane.b32.xlu1 %v365_v23, %s677_s3 }
 0x174   : >> { %v358_v24 = vpop.permute.xlu0 %357 }
 0x175   : >> { %v360_v25 = vmul.f32 %v622_v21, %v358_v24 }
 0x1e5   : >> { %v368_v26 = vpop.permute.xlu1 %367 }
 0x1e6   : >> { %v370_v27 = vadd.f32 %v368_v26, %v360_v25 }
 0x1e8   : >> { %623 = vtanh.f32 %v370_v27 }
 0x1f2   : >> { %v624_v28 = vpop.eup %623 }
 0x1f3   : >> { %373 = vrot.lane.b32.xlu1 %v624_v28, %s676_s30 }
 0x265   : >> { %v374_v29 = vpop.permute.xlu1 %373 }
 0x266   : >> { %v376_v30 = vmul.f32 %v622_v21, %v374_v29 }
 0x268   : >> { %v551_v31 = vpack.c.bf16 %v376_v30, %v376_v30  ;;  %389 = vrot.lane.b32.xlu1 %v376_v30, %s677_s3 }
 0x26a   : >> { %381 = vrot.lane.b32.xlu0 %v551_v31, %s677_s3 }
 0x26e   : >> { %393 = vrot.lane.b32.xlu0 %v370_v27, %s678_s4 }
 0x2da   : >> { %v390_v32 = vpop.permute.xlu1 %389  }
 0x2db   : >> { %v786_v5 = vmov %v390_v32  ;;  %281 = sbr.rel (!%p279_p6) target bundleno = 20 (0x14), region = 74  ;;  %397 = vst.msk [vmem:[#allocation2] sm:$0xff] (%p279_p6), %vm268_vm0, %v390_v32 }
 0x2dc   : >> { %v382_v33 = vpop.permute.xlu0 %381 }
 0x2dd   : >> { %387 = vst.msk [vmem:[%s385_s6] sm:$0xf] %vm386_vm2, %v382_v33 }
 0x2e0   : >> { %v394_v34 = vpop.permute.xlu0 %393  }
 0x2e1   : >> { %v785_v6 = vmov %v394_v34  ;;  %398 = vst.msk [vmem:[#allocation3] sm:$0xff] (%p279_p6), %vm268_vm0, %v394_v34 }
 0x2e2 PF: > { %s12_s11 = sadd.s32 1, %s659_s11   ;;  %s787_s9 = smov %s655_s10 }
 0x2e3   : > { %p9_p7 = scmp.ge.s32.totalorder %s12_s11, 4   ;;  %s788_s10 = smov %s790_s12 }
 0x2e5   :  { %11 = sbr.rel (!%p9_p7) target bundleno = 2 (0x2), region = 85 }

// kernel: crnn_forward.18
= control target key start
LH: loop header
LB: loop body
LE: loop exit
PB: predicated region body
PF: predicated region fallthrough
CT: control target
= control target key end

     0   :  { %v143_v0 = vmov 0.0   ;;  %vm144_vm0 = vmmov 0   ;;  %vm61_vm1 = vcmask 523264   ;;  %s189_s1 = inlined_call_operand.vmem [shape: bf16[64,128], index: 1, kind: input, shape index: {}]   ;;  %s190_s0 = inlined_call_operand.vmem [shape: bf16[16,64], index: 0, kind: input, shape index: {}]   ;;  %s191_s2 = inlined_call_operand.vmem [shape: f32[1,128], index: 2, kind: input, shape index: {}]   ;;  %s192_s3 = inlined_call_operand.vmem [shape: f32[16,128], index: 3, kind: output, shape index: {}]  }
   0x1   :  { %124 = vmatprep.subr.bf16.mxu0 %v143_v0  ;;  %v138_v1 = vld [vmem:[%s189_s1] sm:$0xff]   ;;  %132 = vmatprep.mubr.msk.bf16.mxu0 %vm144_vm0, %v143_v0  ;;  %v139_v2 = vld [vmem:[%s189_s1 + $0x8] sm:$0xff]   ;;  %v140_v3 = vld [vmem:[%s189_s1 + $0x10] sm:$0xff]  }
   0x2   :  { %125 = vmatpush3.bf16.msra.mxu0 %v138_v1  ;;  %v141_v4 = vld [vmem:[%s189_s1 + $0x18] sm:$0xff]   ;;  %v142_v5 = vld [vmem:[%s190_s0] sm:$0xff]  }
   0x3   :  { %126 = vmatprep.subr.bf16.mxu0 %v143_v0  ;;  %v112_v6 = vld [vmem:[%s191_s2] ss:$0 sm:$0xff] }
   0x6   :  { %127 = vmatpush3.bf16.msra.mxu0 %v139_v2 }
   0x7   :  { %128 = vmatprep.subr.bf16.mxu0 %v143_v0 }
   0xa   :  { %129 = vmatpush3.bf16.msra.mxu0 %v140_v3 }
   0xb   :  { %130 = vmatprep.subr.bf16.mxu0 %v143_v0 }
   0xe   :  { %131 = vmatpush3.bf16.msra.mxu0 %v141_v4 }
  0x11   :  { %133 = vmatmul.mubr.msk.bf16.vlgmr.msra.gmra.mrb[0].mxu0 %vm61_vm1, %v142_v5 }
  0xe4   :  { %v99_v7 = vpop.f32.mrb[0].mxu0 }
  0xe5   :  { %v100_v8 = vadd.f32 %v112_v6, %v99_v7  ;;  %v134_v9 = vpop.f32.mrb[1].mxu0 }
  0xe6   :  { %v102_v10 = vpop.f32.mrb[2].mxu0 }
  0xe7   :  { %106 = vst [vmem:[%s192_s3] sm:$0xff] %v100_v8  ;;  %v103_v11 = vadd.f32 %v112_v6, %v102_v10  ;;  %v135_v12 = vpop.f32.mrb[3].mxu0 }
  0xe9   :  { %107 = vst [vmem:[%s192_s3 + $0x8] sm:$0xff] %v103_v11 }

// kernel: crnn_forward.21
= control target key start
LH: loop header
LB: loop body
LE: loop exit
PB: predicated region body
PF: predicated region fallthrough
CT: control target
= control target key end

     0   :  { %v144_v0 = vmov 0.0   ;;  %vm145_vm0 = vmmov 0   ;;  %vm61_vm1 = vcmask 523264   ;;  %vm106_vm2 = vcmask 80896   ;;  %s190_s1 = inlined_call_operand.vmem [shape: bf16[64,10], index: 1, kind: input, shape index: {}]   ;;  %s191_s0 = inlined_call_operand.vmem [shape: bf16[16,64], index: 0, kind: input, shape index: {}]   ;;  %s192_s2 = inlined_call_operand.vmem [shape: f32[1,10], index: 2, kind: input, shape index: {}]   ;;  %s193_s3 = inlined_call_operand.vmem [shape: f32[16,10], index: 3, kind: output, shape index: {}]  }
   0x1   :  { %125 = vmatprep.subr.bf16.mxu0 %v144_v0  ;;  %v139_v1 = vld [vmem:[%s190_s1] sm:$0xff]   ;;  %133 = vmatprep.mubr.msk.bf16.mxu0 %vm145_vm0, %v144_v0  ;;  %v140_v2 = vld [vmem:[%s190_s1 + $0x8] sm:$0xff]   ;;  %v141_v3 = vld [vmem:[%s190_s1 + $0x10] sm:$0xff]  }
   0x2   :  { %126 = vmatpush3.bf16.msra.mxu0 %v139_v1  ;;  %v142_v4 = vld [vmem:[%s190_s1 + $0x18] sm:$0xff]   ;;  %v143_v5 = vld [vmem:[%s191_s0] sm:$0xff]  }
   0x3   :  { %127 = vmatprep.subr.bf16.mxu0 %v144_v0  ;;  %v113_v6 = vld [vmem:[%s192_s2] ss:$0 sm:$0xff] }
   0x6   :  { %128 = vmatpush3.bf16.msra.mxu0 %v140_v2 }
   0x7   :  { %129 = vmatprep.subr.bf16.mxu0 %v144_v0 }
   0xa   :  { %130 = vmatpush3.bf16.msra.mxu0 %v141_v3 }
   0xb   :  { %131 = vmatprep.subr.bf16.mxu0 %v144_v0 }
   0xe   :  { %132 = vmatpush3.bf16.msra.mxu0 %v142_v4 }
  0x11   :  { %134 = vmatmul.mubr.msk.bf16.vlgmr.msra.gmra.mrb[0].mxu0 %vm61_vm1, %v143_v5 }
  0xe4   :  { %v99_v7 = vpop.f32.mrb[0].mxu0 }
  0xe5   :  { %v100_v8 = vadd.f32 %v113_v6, %v99_v7  ;;  %v135_v9 = vpop.f32.mrb[1].mxu0 }
  0xe6   :  { %v102_v10 = vpop.f32.mrb[2].mxu0 }
  0xe7   :  { %107 = vst.msk [vmem:[%s193_s3] sm:$0xff] %vm106_vm2, %v100_v8  ;;  %v103_v11 = vadd.f32 %v113_v6, %v102_v10  ;;  %v136_v12 = vpop.f32.mrb[3].mxu0 }
  0xe9   :  { %108 = vst.msk [vmem:[%s193_s3 + $0x8] sm:$0xff] %vm106_vm2, %v103_v11 }

</bundles_post_ra>
